<compile_context>
chip_gen: v5e
topology: v5e:2x2
jax: 0.10.0
libtpu: 0.0.40
codegen_flags: <defaults>
</compile_context>

<pallas_src>
import jax
import jax.numpy as jnp
from jax.experimental import pallas as pl
from jax.experimental.pallas import tpu as pltpu

_BN_EPS = 1e-5
_CPAD = 128                      # lane-dense channel padding
_APRON = 8                       # aligned zero apron for the W halo (sublane axis)
_VMEM_LIMIT = 32 * 1024 * 1024   # safe on v5e/v6e/v7x; working set here is ~1 MiB


# ----------------------------- kernel helpers -------------------------------

def _conv3x3_acc(x, w_ref):
    """3x3 'same' conv as 9 shifted MXU dots; halo built in VMEM (never in HBM).

    x:      (bb, hp, wp, cpad) bf16 (activation already applied, no halo)
    w_ref:  (9, cpad, cpad)    bf16 taps, t = dy*3 + dx, laid out (cin, cout)
    returns (bb*hp*wp, cpad)   f32 accumulator
    """
    bb, hp, wp, cpad = x.shape
    cout = w_ref.shape[2]

    # W halo: 8-wide zero aprons so every sublane-axis concat piece is aligned.
    zw = jnp.zeros((bb, hp, _APRON, cpad), x.dtype)
    xw = jnp.concatenate([zw, x, zw], axis=2)                 # (bb, hp, wp+16, cpad)
    # H halo: leading-dim concat (no layout constraints).
    zh = jnp.zeros((bb, 1, wp + 2 * _APRON, cpad), x.dtype)
    xp = jnp.concatenate([zh, xw, zh], axis=1)                # (bb, hp+2, wp+16, cpad)

    acc = jnp.zeros((bb * hp * wp, cout), jnp.float32)
    # Hoist the dx (sublane) shifts: 3 shifted slabs instead of 9 per-tap slices.
    for dx in range(3):
        off = _APRON - 1 + dx                                 # 7 / 8 / 9
        xs = xp[:, :, off:off + wp, :]                        # (bb, hp+2, wp, cpad)
        for dy in range(3):
            win = xs[:, dy:dy + hp, :, :].reshape(bb * hp * wp, cpad)
            acc += jnp.dot(win, w_ref[dy * 3 + dx],
                           preferred_element_type=jnp.float32)
    return acc


# ------------------------------- kernels -------------------------------------

def _conv_stats_kernel(x_ref, w_ref, y_ref, s_ref, ss_ref):
    """Conv3x3 (no bias) + per-grid-step BN partial statistics.

    x_ref:  (bb, hp, wp, cpad) bf16   pooled, channel-padded input
    w_ref:  (9, cpad, cpad)    bf16   taps
    y_ref:  (bb, hp, wp, cpad) bf16   raw conv output (pre-BN)
    s_ref:  (1, 1, cpad)       f32    partial sum for this grid step
    ss_ref: (1, 1, cpad)       f32    partial sum of squares for this grid step
    """
    bb, hp, wp, cpad = y_ref.shape
    acc = _conv3x3_acc(x_ref[...], w_ref)
    y_ref[...] = acc.reshape(bb, hp, wp, cpad).astype(y_ref.dtype)
    s_ref[...] = jnp.sum(acc, axis=0, keepdims=True).reshape(1, 1, cpad)
    ss_ref[...] = jnp.sum(acc * acc, axis=0, keepdims=True).reshape(1, 1, cpad)


def _bn_relu_conv_stats_kernel(y_ref, scale_ref, shift_ref, w_ref,
                               o_ref, s_ref, ss_ref):
    """Fused: BN(layer-1) normalize + ReLU + halo pad + Conv3x3 + BN-2 partial stats.

    y_ref:     (bb, hp, wp, cpad) bf16   raw conv-1 output
    scale_ref: (1, cpad)          f32    folded gamma/rsqrt(var+eps)
    shift_ref: (1, cpad)          f32    folded beta - mean*scale
    """
    bb, hp, wp, cpad = o_ref.shape
    scale = scale_ref[...].reshape(1, 1, 1, cpad)
    shift = shift_ref[...].reshape(1, 1, 1, cpad)
    h = jnp.maximum(y_ref[...].astype(jnp.float32) * scale + shift, 0.0)
    acc = _conv3x3_acc(h.astype(jnp.bfloat16), w_ref)
    o_ref[...] = acc.reshape(bb, hp, wp, cpad).astype(o_ref.dtype)
    s_ref[...] = jnp.sum(acc, axis=0, keepdims=True).reshape(1, 1, cpad)
    ss_ref[...] = jnp.sum(acc * acc, axis=0, keepdims=True).reshape(1, 1, cpad)


def _bn_relu_kernel(y_ref, scale_ref, shift_ref, o_ref):
    """Final-layer BatchNorm (pre-folded scale/shift) + ReLU."""
    cpad = o_ref.shape[3]
    scale = scale_ref[...].reshape(1, 1, 1, cpad)
    shift = shift_ref[...].reshape(1, 1, 1, cpad)
    h = y_ref[...].astype(jnp.float32) * scale + shift
    o_ref[...] = jnp.maximum(h, 0.0).astype(o_ref.dtype)


# --------------------------- pallas_call wrappers ----------------------------

def _conv1(x, w_taps, bb):
    n, hp, wp, cp = x.shape
    g = n // bb
    return pl.pallas_call(
        _conv_stats_kernel,
        grid=(g,),
        in_specs=[
            pl.BlockSpec((bb, hp, wp, cp), lambda i: (i, 0, 0, 0)),
            pl.BlockSpec((9, cp, cp), lambda i: (0, 0, 0)),     # VMEM-resident
        ],
        out_specs=[
            pl.BlockSpec((bb, hp, wp, cp), lambda i: (i, 0, 0, 0)),
            pl.BlockSpec((1, 1, cp), lambda i: (i, 0, 0)),      # per-step partials
            pl.BlockSpec((1, 1, cp), lambda i: (i, 0, 0)),
        ],
        out_shape=(
            jax.ShapeDtypeStruct((n, hp, wp, cp), jnp.bfloat16),
            jax.ShapeDtypeStruct((g, 1, cp), jnp.float32),
            jax.ShapeDtypeStruct((g, 1, cp), jnp.float32),
        ),
        compiler_params=pltpu.CompilerParams(
            dimension_semantics=("parallel",),      # megacore-splittable on v7x
            vmem_limit_bytes=_VMEM_LIMIT,
        ),
    )(x, w_taps)


def _conv2_fused(y1, scale1, shift1, w_taps, bb):
    n, hp, wp, cp = y1.shape
    g = n // bb
    return pl.pallas_call(
        _bn_relu_conv_stats_kernel,
        grid=(g,),
        in_specs=[
            pl.BlockSpec((bb, hp, wp, cp), lambda i: (i, 0, 0, 0)),
            pl.BlockSpec((1, cp), lambda i: (0, 0)),
            pl.BlockSpec((1, cp), lambda i: (0, 0)),
            pl.BlockSpec((9, cp, cp), lambda i: (0, 0, 0)),
        ],
        out_specs=[
            pl.BlockSpec((bb, hp, wp, cp), lambda i: (i, 0, 0, 0)),
            pl.BlockSpec((1, 1, cp), lambda i: (i, 0, 0)),
            pl.BlockSpec((1, 1, cp), lambda i: (i, 0, 0)),
        ],
        out_shape=(
            jax.ShapeDtypeStruct((n, hp, wp, cp), jnp.bfloat16),
            jax.ShapeDtypeStruct((g, 1, cp), jnp.float32),
            jax.ShapeDtypeStruct((g, 1, cp), jnp.float32),
        ),
        compiler_params=pltpu.CompilerParams(
            dimension_semantics=("parallel",),
            vmem_limit_bytes=_VMEM_LIMIT,
        ),
    )(y1, scale1, shift1, w_taps)


def _bn_relu_final(y, scale, shift, bb, out_dtype):
    n, hp, wp, cp = y.shape
    g = n // bb
    return pl.pallas_call(
        _bn_relu_kernel,
        grid=(g,),
        in_specs=[
            pl.BlockSpec((bb, hp, wp, cp), lambda i: (i, 0, 0, 0)),
            pl.BlockSpec((1, cp), lambda i: (0, 0)),
            pl.BlockSpec((1, cp), lambda i: (0, 0)),
        ],
        out_specs=pl.BlockSpec((bb, hp, wp, cp), lambda i: (i, 0, 0, 0)),
        out_shape=jax.ShapeDtypeStruct((n, hp, wp, cp), out_dtype),
        compiler_params=pltpu.CompilerParams(
            dimension_semantics=("parallel",),
            vmem_limit_bytes=_VMEM_LIMIT,
        ),
    )(y, scale, shift)


# --------------------------------- glue --------------------------------------

def _bn_scale_shift(s_part, ss_part, gamma, beta, count):
    """Fold train-mode BN (batch stats, biased var, eps=1e-5) into scale/shift.

    Tiny (1,128)-vector math on partial sums; left in XLA glue on purpose.
    """
    s = jnp.sum(s_part, axis=0)                       # (1, cp)
    ss = jnp.sum(ss_part, axis=0)
    inv = 1.0 / float(count)
    mean = s * inv
    var = jnp.maximum(ss * inv - mean * mean, 0.0)    # f32 cancellation guard
    scale = gamma * jax.lax.rsqrt(var + _BN_EPS)
    shift = beta - mean * scale
    return scale, shift


def _pick_bblk(n, hp, wp):
    """Batch elements per grid step: target ~256 flattened MXU rows, divisor of n."""
    rows = max(hp * wp, 1)
    bb = max(1, min(n, max(1, 256 // rows)))
    while n % bb:
        bb -= 1
    return bb


def down_step(params, x_nchw, out_channels):
    """Forward of PyTorch DownStep: MaxPool2d(2,2) -> (Conv3x3+BN+ReLU) x 2."""
    n, cin, h, w = x_nchw.shape
    hp, wp = h // 2, w // 2

    # TODO(synk): 2x2 maxpool + NCHW->NHWC + channel pad + bf16 cast kept as
    # fused XLA glue over the tiny lane-sparse (C=4) input.
    x = x_nchw.astype(jnp.float32).reshape(n, cin, hp, 2, wp, 2).max(axis=(3, 5))
    x = jnp.transpose(x, (0, 2, 3, 1))                               # NHWC
    x = jnp.pad(x, ((0, 0), (0, 0), (0, 0), (0, _CPAD - cin)))       # lane-dense C
    x = x.astype(jnp.bfloat16)

    bb = _pick_bblk(n, hp, wp)
    count = n * hp * wp
    p1, p2 = params["c1"], params["c2"]

    # Layer 1: conv + BN-1 partial stats (bf16 intermediate in HBM).
    y1, s1, ss1 = _conv1(x, p1["w"], bb)
    sc1, sh1 = _bn_scale_shift(s1, ss1, p1["gamma"], p1["beta"], count)

    # Layer 2: BN-1 normalize + ReLU + halo pad fused into conv-2 + BN-2 stats.
    y2, s2, ss2 = _conv2_fused(y1, sc1, sh1, p2["w"], bb)
    sc2, sh2 = _bn_scale_shift(s2, ss2, p2["gamma"], p2["beta"], count)

    # Final BN-2 normalize + ReLU.
    out = _bn_relu_final(y2, sc2, sh2, bb, jnp.float32)              # (n,hp,wp,128)

    out = out[..., :out_channels]                                    # drop C padding
    return jnp.transpose(out, (0, 3, 1, 2))                          # back to NCHW


# --------------------------- deterministic params ----------------------------

def init_params(key, in_ch=4, out_ch=8):
    k1, k2 = jax.random.split(key)

    def conv3(k, cin, cout):
        # PyTorch Conv2d weight layout (cout, cin, kh, kw).  The conv bias is
        # dropped: exactly cancelled by train-mode BN's mean subtraction.
        w = jax.random.normal(k, (cout, cin, 3, 3), jnp.float32) / jnp.sqrt(9.0 * cin)
        taps = jnp.transpose(w, (2, 3, 1, 0)).reshape(9, cin, cout)  # t = dy*3+dx
        taps = jnp.pad(taps, ((0, 0), (0, _CPAD - cin), (0, _CPAD - cout)))
        return {
            "w": taps.astype(jnp.bfloat16),
            "gamma": jnp.ones((1, _CPAD), jnp.float32),   # BN affine init
            "beta": jnp.zeros((1, _CPAD), jnp.float32),
        }

    return {"c1": conv3(k1, in_ch, out_ch), "c2": conv3(k2, out_ch, out_ch)}


# ---------------------------------- main --------------------------------------

if __name__ == "__main__":
    key = jax.random.PRNGKey(0)
    pkey, xkey = jax.random.split(key)

    in_ch, out_ch = 4, 8
    params = init_params(pkey, in_ch=in_ch, out_ch=out_ch)
    x = jax.random.normal(xkey, (2, in_ch, 16, 16), jnp.float32)     # NCHW input

    fwd = jax.jit(down_step, static_argnames="out_channels")
    out = jax.block_until_ready(fwd(params, x, out_channels=out_ch))

    assert out.shape == (2, out_ch, 8, 8), out.shape
    assert bool(jnp.all(jnp.isfinite(out)))
    assert bool(jnp.all(out >= 0.0))           # ReLU output
    print("KERNEL_OK")
</pallas_src>

<mosaic_0001>
module attributes {stable_mosaic.version = 11 : i64} {
  func.func @_conv_stats_kernel(%arg0: i32, %arg1: memref<2x8x8x128xbf16, #tpu.memory_space<vmem>>, %arg2: memref<9x128x128xbf16, #tpu.memory_space<vmem>>, %arg3: memref<2x8x8x128xbf16, #tpu.memory_space<vmem>>, %arg4: memref<1x1x128xf32, #tpu.memory_space<vmem>>, %arg5: memref<1x1x128xf32, #tpu.memory_space<vmem>>) attributes {dimension_semantics = [#tpu.dimension_semantics<parallel>], iteration_bounds = array<i64: 1>, scalar_prefetch = 0 : i64, scratch_operands = 0 : i64, tpu.core_type = #tpu.core_type<tc>, window_params = [{transform_indices = @transform_0, window_bounds = array<i64: 2, 8, 8, 128>}, {pipeline_mode = #tpu.pipeline_mode<synchronous>, transform_indices = @transform_1, window_bounds = array<i64: 9, 128, 128>}, {transform_indices = @transform_2, window_bounds = array<i64: 2, 8, 8, 128>}, {transform_indices = @transform_3, window_bounds = array<i64: 1, 1, 128>}, {transform_indices = @transform_4, window_bounds = array<i64: 1, 1, 128>}]} {
    %c0 = arith.constant 0 : index
    %c0_0 = arith.constant 0 : index
    %c0_1 = arith.constant 0 : index
    %c0_2 = arith.constant 0 : index
    %0 = vector.load %arg1[%c0, %c0_0, %c0_1, %c0_2] : memref<2x8x8x128xbf16, #tpu.memory_space<vmem>>, vector<2x8x8x128xbf16>
    %cst = arith.constant 0.000000e+00 : bf16
    %1 = vector.broadcast %cst : bf16 to vector<2x8x8x128xbf16>
    %2 = tpu.concatenate %1, %0, %1 in 2 : vector<2x8x8x128xbf16>, vector<2x8x8x128xbf16>, vector<2x8x8x128xbf16> -> vector<2x8x24x128xbf16>
    %cst_3 = arith.constant 0.000000e+00 : bf16
    %3 = vector.broadcast %cst_3 : bf16 to vector<2x1x24x128xbf16>
    %4 = tpu.concatenate %3, %2, %3 in 1 : vector<2x1x24x128xbf16>, vector<2x8x24x128xbf16>, vector<2x1x24x128xbf16> -> vector<2x10x24x128xbf16>
    %cst_4 = arith.constant 0.000000e+00 : f32
    %5 = vector.broadcast %cst_4 : f32 to vector<128x128xf32>
    %6 = vector.extract_strided_slice %4 {offsets = [0, 0, 7, 0], sizes = [2, 10, 8, 128], strides = [1, 1, 1, 1]} : vector<2x10x24x128xbf16> to vector<2x10x8x128xbf16>
    %7 = vector.extract_strided_slice %6 {offsets = [0, 0, 0, 0], sizes = [2, 8, 8, 128], strides = [1, 1, 1, 1]} : vector<2x10x8x128xbf16> to vector<2x8x8x128xbf16>
    %8 = vector.shape_cast %7 : vector<2x8x8x128xbf16> to vector<128x128xbf16>
    %c0_5 = arith.constant 0 : index
    %c0_6 = arith.constant 0 : index
    %c0_7 = arith.constant 0 : index
    %9 = vector.load %arg2[%c0_5, %c0_6, %c0_7] : memref<9x128x128xbf16, #tpu.memory_space<vmem>>, vector<1x128x128xbf16>
    %10 = vector.shape_cast %9 : vector<1x128x128xbf16> to vector<128x128xbf16>
    %cst_8 = arith.constant dense<0.000000e+00> : vector<128x128xf32>
    %11 = tpu.matmul %8, %10, %cst_8 {dimension_numbers = #tpu.dot_dimension_numbers<[1], [0], [0], [1], [0, 0, 1, 1], [], []>} : vector<128x128xbf16>, vector<128x128xbf16>, vector<128x128xf32> -> vector<128x128xf32>
    %12 = arith.addf %5, %11 : vector<128x128xf32>
    %13 = vector.extract_strided_slice %6 {offsets = [0, 1, 0, 0], sizes = [2, 8, 8, 128], strides = [1, 1, 1, 1]} : vector<2x10x8x128xbf16> to vector<2x8x8x128xbf16>
    %14 = vector.shape_cast %13 : vector<2x8x8x128xbf16> to vector<128x128xbf16>
    %c3 = arith.constant 3 : index
    %c0_9 = arith.constant 0 : index
    %c0_10 = arith.constant 0 : index
    %15 = vector.load %arg2[%c3, %c0_9, %c0_10] : memref<9x128x128xbf16, #tpu.memory_space<vmem>>, vector<1x128x128xbf16>
    %16 = vector.shape_cast %15 : vector<1x128x128xbf16> to vector<128x128xbf16>
    %cst_11 = arith.constant dense<0.000000e+00> : vector<128x128xf32>
    %17 = tpu.matmul %14, %16, %cst_11 {dimension_numbers = #tpu.dot_dimension_numbers<[1], [0], [0], [1], [0, 0, 1, 1], [], []>} : vector<128x128xbf16>, vector<128x128xbf16>, vector<128x128xf32> -> vector<128x128xf32>
    %18 = arith.addf %12, %17 : vector<128x128xf32>
    %19 = vector.extract_strided_slice %6 {offsets = [0, 2, 0, 0], sizes = [2, 8, 8, 128], strides = [1, 1, 1, 1]} : vector<2x10x8x128xbf16> to vector<2x8x8x128xbf16>
    %20 = vector.shape_cast %19 : vector<2x8x8x128xbf16> to vector<128x128xbf16>
    %c6 = arith.constant 6 : index
    %c0_12 = arith.constant 0 : index
    %c0_13 = arith.constant 0 : index
    %21 = vector.load %arg2[%c6, %c0_12, %c0_13] : memref<9x128x128xbf16, #tpu.memory_space<vmem>>, vector<1x128x128xbf16>
    %22 = vector.shape_cast %21 : vector<1x128x128xbf16> to vector<128x128xbf16>
    %cst_14 = arith.constant dense<0.000000e+00> : vector<128x128xf32>
    %23 = tpu.matmul %20, %22, %cst_14 {dimension_numbers = #tpu.dot_dimension_numbers<[1], [0], [0], [1], [0, 0, 1, 1], [], []>} : vector<128x128xbf16>, vector<128x128xbf16>, vector<128x128xf32> -> vector<128x128xf32>
    %24 = arith.addf %18, %23 : vector<128x128xf32>
    %25 = vector.extract_strided_slice %4 {offsets = [0, 0, 8, 0], sizes = [2, 10, 8, 128], strides = [1, 1, 1, 1]} : vector<2x10x24x128xbf16> to vector<2x10x8x128xbf16>
    %26 = vector.extract_strided_slice %25 {offsets = [0, 0, 0, 0], sizes = [2, 8, 8, 128], strides = [1, 1, 1, 1]} : vector<2x10x8x128xbf16> to vector<2x8x8x128xbf16>
    %27 = vector.shape_cast %26 : vector<2x8x8x128xbf16> to vector<128x128xbf16>
    %c1 = arith.constant 1 : index
    %c0_15 = arith.constant 0 : index
    %c0_16 = arith.constant 0 : index
    %28 = vector.load %arg2[%c1, %c0_15, %c0_16] : memref<9x128x128xbf16, #tpu.memory_space<vmem>>, vector<1x128x128xbf16>
    %29 = vector.shape_cast %28 : vector<1x128x128xbf16> to vector<128x128xbf16>
    %cst_17 = arith.constant dense<0.000000e+00> : vector<128x128xf32>
    %30 = tpu.matmul %27, %29, %cst_17 {dimension_numbers = #tpu.dot_dimension_numbers<[1], [0], [0], [1], [0, 0, 1, 1], [], []>} : vector<128x128xbf16>, vector<128x128xbf16>, vector<128x128xf32> -> vector<128x128xf32>
    %31 = arith.addf %24, %30 : vector<128x128xf32>
    %32 = vector.extract_strided_slice %25 {offsets = [0, 1, 0, 0], sizes = [2, 8, 8, 128], strides = [1, 1, 1, 1]} : vector<2x10x8x128xbf16> to vector<2x8x8x128xbf16>
    %33 = vector.shape_cast %32 : vector<2x8x8x128xbf16> to vector<128x128xbf16>
    %c4 = arith.constant 4 : index
    %c0_18 = arith.constant 0 : index
    %c0_19 = arith.constant 0 : index
    %34 = vector.load %arg2[%c4, %c0_18, %c0_19] : memref<9x128x128xbf16, #tpu.memory_space<vmem>>, vector<1x128x128xbf16>
    %35 = vector.shape_cast %34 : vector<1x128x128xbf16> to vector<128x128xbf16>
    %cst_20 = arith.constant dense<0.000000e+00> : vector<128x128xf32>
    %36 = tpu.matmul %33, %35, %cst_20 {dimension_numbers = #tpu.dot_dimension_numbers<[1], [0], [0], [1], [0, 0, 1, 1], [], []>} : vector<128x128xbf16>, vector<128x128xbf16>, vector<128x128xf32> -> vector<128x128xf32>
    %37 = arith.addf %31, %36 : vector<128x128xf32>
    %38 = vector.extract_strided_slice %25 {offsets = [0, 2, 0, 0], sizes = [2, 8, 8, 128], strides = [1, 1, 1, 1]} : vector<2x10x8x128xbf16> to vector<2x8x8x128xbf16>
    %39 = vector.shape_cast %38 : vector<2x8x8x128xbf16> to vector<128x128xbf16>
    %c7 = arith.constant 7 : index
    %c0_21 = arith.constant 0 : index
    %c0_22 = arith.constant 0 : index
    %40 = vector.load %arg2[%c7, %c0_21, %c0_22] : memref<9x128x128xbf16, #tpu.memory_space<vmem>>, vector<1x128x128xbf16>
    %41 = vector.shape_cast %40 : vector<1x128x128xbf16> to vector<128x128xbf16>
    %cst_23 = arith.constant dense<0.000000e+00> : vector<128x128xf32>
    %42 = tpu.matmul %39, %41, %cst_23 {dimension_numbers = #tpu.dot_dimension_numbers<[1], [0], [0], [1], [0, 0, 1, 1], [], []>} : vector<128x128xbf16>, vector<128x128xbf16>, vector<128x128xf32> -> vector<128x128xf32>
    %43 = arith.addf %37, %42 : vector<128x128xf32>
    %44 = vector.extract_strided_slice %4 {offsets = [0, 0, 9, 0], sizes = [2, 10, 8, 128], strides = [1, 1, 1, 1]} : vector<2x10x24x128xbf16> to vector<2x10x8x128xbf16>
    %45 = vector.extract_strided_slice %44 {offsets = [0, 0, 0, 0], sizes = [2, 8, 8, 128], strides = [1, 1, 1, 1]} : vector<2x10x8x128xbf16> to vector<2x8x8x128xbf16>
    %46 = vector.shape_cast %45 : vector<2x8x8x128xbf16> to vector<128x128xbf16>
    %c2 = arith.constant 2 : index
    %c0_24 = arith.constant 0 : index
    %c0_25 = arith.constant 0 : index
    %47 = vector.load %arg2[%c2, %c0_24, %c0_25] : memref<9x128x128xbf16, #tpu.memory_space<vmem>>, vector<1x128x128xbf16>
    %48 = vector.shape_cast %47 : vector<1x128x128xbf16> to vector<128x128xbf16>
    %cst_26 = arith.constant dense<0.000000e+00> : vector<128x128xf32>
    %49 = tpu.matmul %46, %48, %cst_26 {dimension_numbers = #tpu.dot_dimension_numbers<[1], [0], [0], [1], [0, 0, 1, 1], [], []>} : vector<128x128xbf16>, vector<128x128xbf16>, vector<128x128xf32> -> vector<128x128xf32>
    %50 = arith.addf %43, %49 : vector<128x128xf32>
    %51 = vector.extract_strided_slice %44 {offsets = [0, 1, 0, 0], sizes = [2, 8, 8, 128], strides = [1, 1, 1, 1]} : vector<2x10x8x128xbf16> to vector<2x8x8x128xbf16>
    %52 = vector.shape_cast %51 : vector<2x8x8x128xbf16> to vector<128x128xbf16>
    %c5 = arith.constant 5 : index
    %c0_27 = arith.constant 0 : index
    %c0_28 = arith.constant 0 : index
    %53 = vector.load %arg2[%c5, %c0_27, %c0_28] : memref<9x128x128xbf16, #tpu.memory_space<vmem>>, vector<1x128x128xbf16>
    %54 = vector.shape_cast %53 : vector<1x128x128xbf16> to vector<128x128xbf16>
    %cst_29 = arith.constant dense<0.000000e+00> : vector<128x128xf32>
    %55 = tpu.matmul %52, %54, %cst_29 {dimension_numbers = #tpu.dot_dimension_numbers<[1], [0], [0], [1], [0, 0, 1, 1], [], []>} : vector<128x128xbf16>, vector<128x128xbf16>, vector<128x128xf32> -> vector<128x128xf32>
    %56 = arith.addf %50, %55 : vector<128x128xf32>
    %57 = vector.extract_strided_slice %44 {offsets = [0, 2, 0, 0], sizes = [2, 8, 8, 128], strides = [1, 1, 1, 1]} : vector<2x10x8x128xbf16> to vector<2x8x8x128xbf16>
    %58 = vector.shape_cast %57 : vector<2x8x8x128xbf16> to vector<128x128xbf16>
    %c8 = arith.constant 8 : index
    %c0_30 = arith.constant 0 : index
    %c0_31 = arith.constant 0 : index
    %59 = vector.load %arg2[%c8, %c0_30, %c0_31] : memref<9x128x128xbf16, #tpu.memory_space<vmem>>, vector<1x128x128xbf16>
    %60 = vector.shape_cast %59 : vector<1x128x128xbf16> to vector<128x128xbf16>
    %cst_32 = arith.constant dense<0.000000e+00> : vector<128x128xf32>
    %61 = tpu.matmul %58, %60, %cst_32 {dimension_numbers = #tpu.dot_dimension_numbers<[1], [0], [0], [1], [0, 0, 1, 1], [], []>} : vector<128x128xbf16>, vector<128x128xbf16>, vector<128x128xf32> -> vector<128x128xf32>
    %62 = arith.addf %56, %61 : vector<128x128xf32>
    %63 = vector.shape_cast %62 : vector<128x128xf32> to vector<2x8x8x128xf32>
    %64 = arith.truncf %63 : vector<2x8x8x128xf32> to vector<2x8x8x128xbf16>
    %c0_33 = arith.constant 0 : index
    %c0_34 = arith.constant 0 : index
    %c0_35 = arith.constant 0 : index
    %c0_36 = arith.constant 0 : index
    %65 = vector.load %arg3[%c0_33, %c0_34, %c0_35, %c0_36] : memref<2x8x8x128xbf16, #tpu.memory_space<vmem>>, vector<2x8x8x128xbf16>
    tpu.vector_store %arg3[%c0_33, %c0_34, %c0_35, %c0_36], %64 {strides = array<i32>} : memref<2x8x8x128xbf16, #tpu.memory_space<vmem>>, vector<2x8x8x128xbf16>,
    %cst_37 = arith.constant dense<0.000000e+00> : vector<128xf32>
    %66 = vector.multi_reduction <add>, %62, %cst_37 [0] : vector<128x128xf32> to vector<128xf32>
    %67 = vector.shape_cast %66 : vector<128xf32> to vector<1x128xf32>
    %68 = vector.shape_cast %67 : vector<1x128xf32> to vector<1x1x128xf32>
    %c0_38 = arith.constant 0 : index
    %c0_39 = arith.constant 0 : index
    %c0_40 = arith.constant 0 : index
    %69 = vector.load %arg4[%c0_38, %c0_39, %c0_40] : memref<1x1x128xf32, #tpu.memory_space<vmem>>, vector<1x1x128xf32>
    tpu.vector_store %arg4[%c0_38, %c0_39, %c0_40], %68 {strides = array<i32>} : memref<1x1x128xf32, #tpu.memory_space<vmem>>, vector<1x1x128xf32>,
    %70 = arith.mulf %62, %62 : vector<128x128xf32>
    %cst_41 = arith.constant dense<0.000000e+00> : vector<128xf32>
    %71 = vector.multi_reduction <add>, %70, %cst_41 [0] : vector<128x128xf32> to vector<128xf32>
    %72 = vector.shape_cast %71 : vector<128xf32> to vector<1x128xf32>
    %73 = vector.shape_cast %72 : vector<1x128xf32> to vector<1x1x128xf32>
    %c0_42 = arith.constant 0 : index
    %c0_43 = arith.constant 0 : index
    %c0_44 = arith.constant 0 : index
    %74 = vector.load %arg5[%c0_42, %c0_43, %c0_44] : memref<1x1x128xf32, #tpu.memory_space<vmem>>, vector<1x1x128xf32>
    tpu.vector_store %arg5[%c0_42, %c0_43, %c0_44], %73 {strides = array<i32>} : memref<1x1x128xf32, #tpu.memory_space<vmem>>, vector<1x1x128xf32>,
    return
  }
  func.func @transform_0(%arg0: i32) -> (i32, i32, i32, i32) {
    %c0_i32 = arith.constant 0 : i32
    %c0_i32_0 = arith.constant 0 : i32
    %c0_i32_1 = arith.constant 0 : i32
    %c0_i32_2 = arith.constant 0 : i32
    return %arg0, %c0_i32, %c0_i32_0, %c0_i32_1 : i32, i32, i32, i32
  }
  func.func @transform_1(%arg0: i32) -> (i32, i32, i32) {
    %c0_i32 = arith.constant 0 : i32
    %c0_i32_0 = arith.constant 0 : i32
    %c0_i32_1 = arith.constant 0 : i32
    %c0_i32_2 = arith.constant 0 : i32
    return %c0_i32, %c0_i32_0, %c0_i32_1 : i32, i32, i32
  }
  func.func @transform_2(%arg0: i32) -> (i32, i32, i32, i32) {
    %c0_i32 = arith.constant 0 : i32
    %c0_i32_0 = arith.constant 0 : i32
    %c0_i32_1 = arith.constant 0 : i32
    %c0_i32_2 = arith.constant 0 : i32
    return %arg0, %c0_i32, %c0_i32_0, %c0_i32_1 : i32, i32, i32, i32
  }
  func.func @transform_3(%arg0: i32) -> (i32, i32, i32) {
    %c0_i32 = arith.constant 0 : i32
    %c0_i32_0 = arith.constant 0 : i32
    %c0_i32_1 = arith.constant 0 : i32
    return %arg0, %c0_i32, %c0_i32_0 : i32, i32, i32
  }
  func.func @transform_4(%arg0: i32) -> (i32, i32, i32) {
    %c0_i32 = arith.constant 0 : i32
    %c0_i32_0 = arith.constant 0 : i32
    %c0_i32_1 = arith.constant 0 : i32
    return %arg0, %c0_i32, %c0_i32_0 : i32, i32, i32
  }
}

module attributes {stable_mosaic.version = 11 : i64} {
  func.func @_bn_relu_kernel(%arg0: i32, %arg1: memref<2x8x8x128xbf16, #tpu.memory_space<vmem>>, %arg2: memref<1x128xf32, #tpu.memory_space<vmem>>, %arg3: memref<1x128xf32, #tpu.memory_space<vmem>>, %arg4: memref<2x8x8x128xf32, #tpu.memory_space<vmem>>) attributes {dimension_semantics = [#tpu.dimension_semantics<parallel>], iteration_bounds = array<i64: 1>, scalar_prefetch = 0 : i64, scratch_operands = 0 : i64, tpu.core_type = #tpu.core_type<tc>, window_params = [{transform_indices = @transform_0, window_bounds = array<i64: 2, 8, 8, 128>}, {pipeline_mode = #tpu.pipeline_mode<synchronous>, transform_indices = @transform_1, window_bounds = array<i64: 1, 128>}, {pipeline_mode = #tpu.pipeline_mode<synchronous>, transform_indices = @transform_2, window_bounds = array<i64: 1, 128>}, {transform_indices = @transform_3, window_bounds = array<i64: 2, 8, 8, 128>}]} {
    %c0 = arith.constant 0 : index
    %c0_0 = arith.constant 0 : index
    %0 = vector.load %arg2[%c0, %c0_0] : memref<1x128xf32, #tpu.memory_space<vmem>>, vector<1x128xf32>
    %1 = vector.shape_cast %0 : vector<1x128xf32> to vector<1x1x1x128xf32>
    %c0_1 = arith.constant 0 : index
    %c0_2 = arith.constant 0 : index
    %2 = vector.load %arg3[%c0_1, %c0_2] : memref<1x128xf32, #tpu.memory_space<vmem>>, vector<1x128xf32>
    %3 = vector.shape_cast %2 : vector<1x128xf32> to vector<1x1x1x128xf32>
    %c0_3 = arith.constant 0 : index
    %c0_4 = arith.constant 0 : index
    %c0_5 = arith.constant 0 : index
    %c0_6 = arith.constant 0 : index
    %4 = vector.load %arg1[%c0_3, %c0_4, %c0_5, %c0_6] : memref<2x8x8x128xbf16, #tpu.memory_space<vmem>>, vector<2x8x8x128xbf16>
    %5 = arith.extf %4 : vector<2x8x8x128xbf16> to vector<2x8x8x128xf32>
    %6 = vector.broadcast %1 : vector<1x1x1x128xf32> to vector<2x8x8x128xf32>
    %7 = arith.mulf %5, %6 : vector<2x8x8x128xf32>
    %8 = vector.broadcast %3 : vector<1x1x1x128xf32> to vector<2x8x8x128xf32>
    %9 = arith.addf %7, %8 : vector<2x8x8x128xf32>
    %cst = arith.constant 0.000000e+00 : f32
    %10 = vector.broadcast %cst : f32 to vector<2x8x8x128xf32>
    %11 = arith.maximumf %9, %10 : vector<2x8x8x128xf32>
    %c0_7 = arith.constant 0 : index
    %c0_8 = arith.constant 0 : index
    %c0_9 = arith.constant 0 : index
    %c0_10 = arith.constant 0 : index
    %12 = vector.load %arg4[%c0_7, %c0_8, %c0_9, %c0_10] : memref<2x8x8x128xf32, #tpu.memory_space<vmem>>, vector<2x8x8x128xf32>
    tpu.vector_store %arg4[%c0_7, %c0_8, %c0_9, %c0_10], %11 {strides = array<i32>} : memref<2x8x8x128xf32, #tpu.memory_space<vmem>>, vector<2x8x8x128xf32>,
    return
  }
  func.func @transform_0(%arg0: i32) -> (i32, i32, i32, i32) {
    %c0_i32 = arith.constant 0 : i32
    %c0_i32_0 = arith.constant 0 : i32
    %c0_i32_1 = arith.constant 0 : i32
    %c0_i32_2 = arith.constant 0 : i32
    return %arg0, %c0_i32, %c0_i32_0, %c0_i32_1 : i32, i32, i32, i32
  }
  func.func @transform_1(%arg0: i32) -> (i32, i32) {
    %c0_i32 = arith.constant 0 : i32
    %c0_i32_0 = arith.constant 0 : i32
    %c0_i32_1 = arith.constant 0 : i32
    return %c0_i32, %c0_i32_0 : i32, i32
  }
  func.func @transform_2(%arg0: i32) -> (i32, i32) {
    %c0_i32 = arith.constant 0 : i32
    %c0_i32_0 = arith.constant 0 : i32
    %c0_i32_1 = arith.constant 0 : i32
    return %c0_i32, %c0_i32_0 : i32, i32
  }
  func.func @transform_3(%arg0: i32) -> (i32, i32, i32, i32) {
    %c0_i32 = arith.constant 0 : i32
    %c0_i32_0 = arith.constant 0 : i32
    %c0_i32_1 = arith.constant 0 : i32
    %c0_i32_2 = arith.constant 0 : i32
    return %arg0, %c0_i32, %c0_i32_0, %c0_i32_1 : i32, i32, i32, i32
  }
}

module attributes {stable_mosaic.version = 11 : i64} {
  func.func @_bn_relu_conv_stats_kernel(%arg0: i32, %arg1: memref<2x8x8x128xbf16, #tpu.memory_space<vmem>>, %arg2: memref<1x128xf32, #tpu.memory_space<vmem>>, %arg3: memref<1x128xf32, #tpu.memory_space<vmem>>, %arg4: memref<9x128x128xbf16, #tpu.memory_space<vmem>>, %arg5: memref<2x8x8x128xbf16, #tpu.memory_space<vmem>>, %arg6: memref<1x1x128xf32, #tpu.memory_space<vmem>>, %arg7: memref<1x1x128xf32, #tpu.memory_space<vmem>>) attributes {dimension_semantics = [#tpu.dimension_semantics<parallel>], iteration_bounds = array<i64: 1>, scalar_prefetch = 0 : i64, scratch_operands = 0 : i64, tpu.core_type = #tpu.core_type<tc>, window_params = [{transform_indices = @transform_0, window_bounds = array<i64: 2, 8, 8, 128>}, {pipeline_mode = #tpu.pipeline_mode<synchronous>, transform_indices = @transform_1, window_bounds = array<i64: 1, 128>}, {pipeline_mode = #tpu.pipeline_mode<synchronous>, transform_indices = @transform_2, window_bounds = array<i64: 1, 128>}, {pipeline_mode = #tpu.pipeline_mode<synchronous>, transform_indices = @transform_3, window_bounds = array<i64: 9, 128, 128>}, {transform_indices = @transform_4, window_bounds = array<i64: 2, 8, 8, 128>}, {transform_indices = @transform_5, window_bounds = array<i64: 1, 1, 128>}, {transform_indices = @transform_6, window_bounds = array<i64: 1, 1, 128>}]} {
    %c0 = arith.constant 0 : index
    %c0_0 = arith.constant 0 : index
    %0 = vector.load %arg2[%c0, %c0_0] : memref<1x128xf32, #tpu.memory_space<vmem>>, vector<1x128xf32>
    %1 = vector.shape_cast %0 : vector<1x128xf32> to vector<1x1x1x128xf32>
    %c0_1 = arith.constant 0 : index
    %c0_2 = arith.constant 0 : index
    %2 = vector.load %arg3[%c0_1, %c0_2] : memref<1x128xf32, #tpu.memory_space<vmem>>, vector<1x128xf32>
    %3 = vector.shape_cast %2 : vector<1x128xf32> to vector<1x1x1x128xf32>
    %c0_3 = arith.constant 0 : index
    %c0_4 = arith.constant 0 : index
    %c0_5 = arith.constant 0 : index
    %c0_6 = arith.constant 0 : index
    %4 = vector.load %arg1[%c0_3, %c0_4, %c0_5, %c0_6] : memref<2x8x8x128xbf16, #tpu.memory_space<vmem>>, vector<2x8x8x128xbf16>
    %5 = arith.extf %4 : vector<2x8x8x128xbf16> to vector<2x8x8x128xf32>
    %6 = vector.broadcast %1 : vector<1x1x1x128xf32> to vector<2x8x8x128xf32>
    %7 = arith.mulf %5, %6 : vector<2x8x8x128xf32>
    %8 = vector.broadcast %3 : vector<1x1x1x128xf32> to vector<2x8x8x128xf32>
    %9 = arith.addf %7, %8 : vector<2x8x8x128xf32>
    %cst = arith.constant 0.000000e+00 : f32
    %10 = vector.broadcast %cst : f32 to vector<2x8x8x128xf32>
    %11 = arith.maximumf %9, %10 : vector<2x8x8x128xf32>
    %12 = arith.truncf %11 : vector<2x8x8x128xf32> to vector<2x8x8x128xbf16>
    %cst_7 = arith.constant 0.000000e+00 : bf16
    %13 = vector.broadcast %cst_7 : bf16 to vector<2x8x8x128xbf16>
    %14 = tpu.concatenate %13, %12, %13 in 2 : vector<2x8x8x128xbf16>, vector<2x8x8x128xbf16>, vector<2x8x8x128xbf16> -> vector<2x8x24x128xbf16>
    %cst_8 = arith.constant 0.000000e+00 : bf16
    %15 = vector.broadcast %cst_8 : bf16 to vector<2x1x24x128xbf16>
    %16 = tpu.concatenate %15, %14, %15 in 1 : vector<2x1x24x128xbf16>, vector<2x8x24x128xbf16>, vector<2x1x24x128xbf16> -> vector<2x10x24x128xbf16>
    %cst_9 = arith.constant 0.000000e+00 : f32
    %17 = vector.broadcast %cst_9 : f32 to vector<128x128xf32>
    %18 = vector.extract_strided_slice %16 {offsets = [0, 0, 7, 0], sizes = [2, 10, 8, 128], strides = [1, 1, 1, 1]} : vector<2x10x24x128xbf16> to vector<2x10x8x128xbf16>
    %19 = vector.extract_strided_slice %18 {offsets = [0, 0, 0, 0], sizes = [2, 8, 8, 128], strides = [1, 1, 1, 1]} : vector<2x10x8x128xbf16> to vector<2x8x8x128xbf16>
    %20 = vector.shape_cast %19 : vector<2x8x8x128xbf16> to vector<128x128xbf16>
    %c0_10 = arith.constant 0 : index
    %c0_11 = arith.constant 0 : index
    %c0_12 = arith.constant 0 : index
    %21 = vector.load %arg4[%c0_10, %c0_11, %c0_12] : memref<9x128x128xbf16, #tpu.memory_space<vmem>>, vector<1x128x128xbf16>
    %22 = vector.shape_cast %21 : vector<1x128x128xbf16> to vector<128x128xbf16>
    %cst_13 = arith.constant dense<0.000000e+00> : vector<128x128xf32>
    %23 = tpu.matmul %20, %22, %cst_13 {dimension_numbers = #tpu.dot_dimension_numbers<[1], [0], [0], [1], [0, 0, 1, 1], [], []>} : vector<128x128xbf16>, vector<128x128xbf16>, vector<128x128xf32> -> vector<128x128xf32>
    %24 = arith.addf %17, %23 : vector<128x128xf32>
    %25 = vector.extract_strided_slice %18 {offsets = [0, 1, 0, 0], sizes = [2, 8, 8, 128], strides = [1, 1, 1, 1]} : vector<2x10x8x128xbf16> to vector<2x8x8x128xbf16>
    %26 = vector.shape_cast %25 : vector<2x8x8x128xbf16> to vector<128x128xbf16>
    %c3 = arith.constant 3 : index
    %c0_14 = arith.constant 0 : index
    %c0_15 = arith.constant 0 : index
    %27 = vector.load %arg4[%c3, %c0_14, %c0_15] : memref<9x128x128xbf16, #tpu.memory_space<vmem>>, vector<1x128x128xbf16>
    %28 = vector.shape_cast %27 : vector<1x128x128xbf16> to vector<128x128xbf16>
    %cst_16 = arith.constant dense<0.000000e+00> : vector<128x128xf32>
    %29 = tpu.matmul %26, %28, %cst_16 {dimension_numbers = #tpu.dot_dimension_numbers<[1], [0], [0], [1], [0, 0, 1, 1], [], []>} : vector<128x128xbf16>, vector<128x128xbf16>, vector<128x128xf32> -> vector<128x128xf32>
    %30 = arith.addf %24, %29 : vector<128x128xf32>
    %31 = vector.extract_strided_slice %18 {offsets = [0, 2, 0, 0], sizes = [2, 8, 8, 128], strides = [1, 1, 1, 1]} : vector<2x10x8x128xbf16> to vector<2x8x8x128xbf16>
    %32 = vector.shape_cast %31 : vector<2x8x8x128xbf16> to vector<128x128xbf16>
    %c6 = arith.constant 6 : index
    %c0_17 = arith.constant 0 : index
    %c0_18 = arith.constant 0 : index
    %33 = vector.load %arg4[%c6, %c0_17, %c0_18] : memref<9x128x128xbf16, #tpu.memory_space<vmem>>, vector<1x128x128xbf16>
    %34 = vector.shape_cast %33 : vector<1x128x128xbf16> to vector<128x128xbf16>
    %cst_19 = arith.constant dense<0.000000e+00> : vector<128x128xf32>
    %35 = tpu.matmul %32, %34, %cst_19 {dimension_numbers = #tpu.dot_dimension_numbers<[1], [0], [0], [1], [0, 0, 1, 1], [], []>} : vector<128x128xbf16>, vector<128x128xbf16>, vector<128x128xf32> -> vector<128x128xf32>
    %36 = arith.addf %30, %35 : vector<128x128xf32>
    %37 = vector.extract_strided_slice %16 {offsets = [0, 0, 8, 0], sizes = [2, 10, 8, 128], strides = [1, 1, 1, 1]} : vector<2x10x24x128xbf16> to vector<2x10x8x128xbf16>
    %38 = vector.extract_strided_slice %37 {offsets = [0, 0, 0, 0], sizes = [2, 8, 8, 128], strides = [1, 1, 1, 1]} : vector<2x10x8x128xbf16> to vector<2x8x8x128xbf16>
    %39 = vector.shape_cast %38 : vector<2x8x8x128xbf16> to vector<128x128xbf16>
    %c1 = arith.constant 1 : index
    %c0_20 = arith.constant 0 : index
    %c0_21 = arith.constant 0 : index
    %40 = vector.load %arg4[%c1, %c0_20, %c0_21] : memref<9x128x128xbf16, #tpu.memory_space<vmem>>, vector<1x128x128xbf16>
    %41 = vector.shape_cast %40 : vector<1x128x128xbf16> to vector<128x128xbf16>
    %cst_22 = arith.constant dense<0.000000e+00> : vector<128x128xf32>
    %42 = tpu.matmul %39, %41, %cst_22 {dimension_numbers = #tpu.dot_dimension_numbers<[1], [0], [0], [1], [0, 0, 1, 1], [], []>} : vector<128x128xbf16>, vector<128x128xbf16>, vector<128x128xf32> -> vector<128x128xf32>
    %43 = arith.addf %36, %42 : vector<128x128xf32>
    %44 = vector.extract_strided_slice %37 {offsets = [0, 1, 0, 0], sizes = [2, 8, 8, 128], strides = [1, 1, 1, 1]} : vector<2x10x8x128xbf16> to vector<2x8x8x128xbf16>
    %45 = vector.shape_cast %44 : vector<2x8x8x128xbf16> to vector<128x128xbf16>
    %c4 = arith.constant 4 : index
    %c0_23 = arith.constant 0 : index
    %c0_24 = arith.constant 0 : index
    %46 = vector.load %arg4[%c4, %c0_23, %c0_24] : memref<9x128x128xbf16, #tpu.memory_space<vmem>>, vector<1x128x128xbf16>
    %47 = vector.shape_cast %46 : vector<1x128x128xbf16> to vector<128x128xbf16>
    %cst_25 = arith.constant dense<0.000000e+00> : vector<128x128xf32>
    %48 = tpu.matmul %45, %47, %cst_25 {dimension_numbers = #tpu.dot_dimension_numbers<[1], [0], [0], [1], [0, 0, 1, 1], [], []>} : vector<128x128xbf16>, vector<128x128xbf16>, vector<128x128xf32> -> vector<128x128xf32>
    %49 = arith.addf %43, %48 : vector<128x128xf32>
    %50 = vector.extract_strided_slice %37 {offsets = [0, 2, 0, 0], sizes = [2, 8, 8, 128], strides = [1, 1, 1, 1]} : vector<2x10x8x128xbf16> to vector<2x8x8x128xbf16>
    %51 = vector.shape_cast %50 : vector<2x8x8x128xbf16> to vector<128x128xbf16>
    %c7 = arith.constant 7 : index
    %c0_26 = arith.constant 0 : index
    %c0_27 = arith.constant 0 : index
    %52 = vector.load %arg4[%c7, %c0_26, %c0_27] : memref<9x128x128xbf16, #tpu.memory_space<vmem>>, vector<1x128x128xbf16>
    %53 = vector.shape_cast %52 : vector<1x128x128xbf16> to vector<128x128xbf16>
    %cst_28 = arith.constant dense<0.000000e+00> : vector<128x128xf32>
    %54 = tpu.matmul %51, %53, %cst_28 {dimension_numbers = #tpu.dot_dimension_numbers<[1], [0], [0], [1], [0, 0, 1, 1], [], []>} : vector<128x128xbf16>, vector<128x128xbf16>, vector<128x128xf32> -> vector<128x128xf32>
    %55 = arith.addf %49, %54 : vector<128x128xf32>
    %56 = vector.extract_strided_slice %16 {offsets = [0, 0, 9, 0], sizes = [2, 10, 8, 128], strides = [1, 1, 1, 1]} : vector<2x10x24x128xbf16> to vector<2x10x8x128xbf16>
    %57 = vector.extract_strided_slice %56 {offsets = [0, 0, 0, 0], sizes = [2, 8, 8, 128], strides = [1, 1, 1, 1]} : vector<2x10x8x128xbf16> to vector<2x8x8x128xbf16>
    %58 = vector.shape_cast %57 : vector<2x8x8x128xbf16> to vector<128x128xbf16>
    %c2 = arith.constant 2 : index
    %c0_29 = arith.constant 0 : index
    %c0_30 = arith.constant 0 : index
    %59 = vector.load %arg4[%c2, %c0_29, %c0_30] : memref<9x128x128xbf16, #tpu.memory_space<vmem>>, vector<1x128x128xbf16>
    %60 = vector.shape_cast %59 : vector<1x128x128xbf16> to vector<128x128xbf16>
    %cst_31 = arith.constant dense<0.000000e+00> : vector<128x128xf32>
    %61 = tpu.matmul %58, %60, %cst_31 {dimension_numbers = #tpu.dot_dimension_numbers<[1], [0], [0], [1], [0, 0, 1, 1], [], []>} : vector<128x128xbf16>, vector<128x128xbf16>, vector<128x128xf32> -> vector<128x128xf32>
    %62 = arith.addf %55, %61 : vector<128x128xf32>
    %63 = vector.extract_strided_slice %56 {offsets = [0, 1, 0, 0], sizes = [2, 8, 8, 128], strides = [1, 1, 1, 1]} : vector<2x10x8x128xbf16> to vector<2x8x8x128xbf16>
    %64 = vector.shape_cast %63 : vector<2x8x8x128xbf16> to vector<128x128xbf16>
    %c5 = arith.constant 5 : index
    %c0_32 = arith.constant 0 : index
    %c0_33 = arith.constant 0 : index
    %65 = vector.load %arg4[%c5, %c0_32, %c0_33] : memref<9x128x128xbf16, #tpu.memory_space<vmem>>, vector<1x128x128xbf16>
    %66 = vector.shape_cast %65 : vector<1x128x128xbf16> to vector<128x128xbf16>
    %cst_34 = arith.constant dense<0.000000e+00> : vector<128x128xf32>
    %67 = tpu.matmul %64, %66, %cst_34 {dimension_numbers = #tpu.dot_dimension_numbers<[1], [0], [0], [1], [0, 0, 1, 1], [], []>} : vector<128x128xbf16>, vector<128x128xbf16>, vector<128x128xf32> -> vector<128x128xf32>
    %68 = arith.addf %62, %67 : vector<128x128xf32>
    %69 = vector.extract_strided_slice %56 {offsets = [0, 2, 0, 0], sizes = [2, 8, 8, 128], strides = [1, 1, 1, 1]} : vector<2x10x8x128xbf16> to vector<2x8x8x128xbf16>
    %70 = vector.shape_cast %69 : vector<2x8x8x128xbf16> to vector<128x128xbf16>
    %c8 = arith.constant 8 : index
    %c0_35 = arith.constant 0 : index
    %c0_36 = arith.constant 0 : index
    %71 = vector.load %arg4[%c8, %c0_35, %c0_36] : memref<9x128x128xbf16, #tpu.memory_space<vmem>>, vector<1x128x128xbf16>
    %72 = vector.shape_cast %71 : vector<1x128x128xbf16> to vector<128x128xbf16>
    %cst_37 = arith.constant dense<0.000000e+00> : vector<128x128xf32>
    %73 = tpu.matmul %70, %72, %cst_37 {dimension_numbers = #tpu.dot_dimension_numbers<[1], [0], [0], [1], [0, 0, 1, 1], [], []>} : vector<128x128xbf16>, vector<128x128xbf16>, vector<128x128xf32> -> vector<128x128xf32>
    %74 = arith.addf %68, %73 : vector<128x128xf32>
    %75 = vector.shape_cast %74 : vector<128x128xf32> to vector<2x8x8x128xf32>
    %76 = arith.truncf %75 : vector<2x8x8x128xf32> to vector<2x8x8x128xbf16>
    %c0_38 = arith.constant 0 : index
    %c0_39 = arith.constant 0 : index
    %c0_40 = arith.constant 0 : index
    %c0_41 = arith.constant 0 : index
    %77 = vector.load %arg5[%c0_38, %c0_39, %c0_40, %c0_41] : memref<2x8x8x128xbf16, #tpu.memory_space<vmem>>, vector<2x8x8x128xbf16>
    tpu.vector_store %arg5[%c0_38, %c0_39, %c0_40, %c0_41], %76 {strides = array<i32>} : memref<2x8x8x128xbf16, #tpu.memory_space<vmem>>, vector<2x8x8x128xbf16>,
    %cst_42 = arith.constant dense<0.000000e+00> : vector<128xf32>
    %78 = vector.multi_reduction <add>, %74, %cst_42 [0] : vector<128x128xf32> to vector<128xf32>
    %79 = vector.shape_cast %78 : vector<128xf32> to vector<1x128xf32>
    %80 = vector.shape_cast %79 : vector<1x128xf32> to vector<1x1x128xf32>
    %c0_43 = arith.constant 0 : index
    %c0_44 = arith.constant 0 : index
    %c0_45 = arith.constant 0 : index
    %81 = vector.load %arg6[%c0_43, %c0_44, %c0_45] : memref<1x1x128xf32, #tpu.memory_space<vmem>>, vector<1x1x128xf32>
    tpu.vector_store %arg6[%c0_43, %c0_44, %c0_45], %80 {strides = array<i32>} : memref<1x1x128xf32, #tpu.memory_space<vmem>>, vector<1x1x128xf32>,
    %82 = arith.mulf %74, %74 : vector<128x128xf32>
    %cst_46 = arith.constant dense<0.000000e+00> : vector<128xf32>
    %83 = vector.multi_reduction <add>, %82, %cst_46 [0] : vector<128x128xf32> to vector<128xf32>
    %84 = vector.shape_cast %83 : vector<128xf32> to vector<1x128xf32>
    %85 = vector.shape_cast %84 : vector<1x128xf32> to vector<1x1x128xf32>
    %c0_47 = arith.constant 0 : index
    %c0_48 = arith.constant 0 : index
    %c0_49 = arith.constant 0 : index
    %86 = vector.load %arg7[%c0_47, %c0_48, %c0_49] : memref<1x1x128xf32, #tpu.memory_space<vmem>>, vector<1x1x128xf32>
    tpu.vector_store %arg7[%c0_47, %c0_48, %c0_49], %85 {strides = array<i32>} : memref<1x1x128xf32, #tpu.memory_space<vmem>>, vector<1x1x128xf32>,
    return
  }
  func.func @transform_0(%arg0: i32) -> (i32, i32, i32, i32) {
    %c0_i32 = arith.constant 0 : i32
    %c0_i32_0 = arith.constant 0 : i32
    %c0_i32_1 = arith.constant 0 : i32
    %c0_i32_2 = arith.constant 0 : i32
    return %arg0, %c0_i32, %c0_i32_0, %c0_i32_1 : i32, i32, i32, i32
  }
  func.func @transform_1(%arg0: i32) -> (i32, i32) {
    %c0_i32 = arith.constant 0 : i32
    %c0_i32_0 = arith.constant 0 : i32
    %c0_i32_1 = arith.constant 0 : i32
    return %c0_i32, %c0_i32_0 : i32, i32
  }
  func.func @transform_2(%arg0: i32) -> (i32, i32) {
    %c0_i32 = arith.constant 0 : i32
    %c0_i32_0 = arith.constant 0 : i32
    %c0_i32_1 = arith.constant 0 : i32
    return %c0_i32, %c0_i32_0 : i32, i32
  }
  func.func @transform_3(%arg0: i32) -> (i32, i32, i32) {
    %c0_i32 = arith.constant 0 : i32
    %c0_i32_0 = arith.constant 0 : i32
    %c0_i32_1 = arith.constant 0 : i32
    %c0_i32_2 = arith.constant 0 : i32
    return %c0_i32, %c0_i32_0, %c0_i32_1 : i32, i32, i32
  }
  func.func @transform_4(%arg0: i32) -> (i32, i32, i32, i32) {
    %c0_i32 = arith.constant 0 : i32
    %c0_i32_0 = arith.constant 0 : i32
    %c0_i32_1 = arith.constant 0 : i32
    %c0_i32_2 = arith.constant 0 : i32
    return %arg0, %c0_i32, %c0_i32_0, %c0_i32_1 : i32, i32, i32, i32
  }
  func.func @transform_5(%arg0: i32) -> (i32, i32, i32) {
    %c0_i32 = arith.constant 0 : i32
    %c0_i32_0 = arith.constant 0 : i32
    %c0_i32_1 = arith.constant 0 : i32
    return %arg0, %c0_i32, %c0_i32_0 : i32, i32, i32
  }
  func.func @transform_6(%arg0: i32) -> (i32, i32, i32) {
    %c0_i32 = arith.constant 0 : i32
    %c0_i32_0 = arith.constant 0 : i32
    %c0_i32_1 = arith.constant 0 : i32
    return %arg0, %c0_i32, %c0_i32_0 : i32, i32, i32
  }
}

</mosaic_0001>

<bundles_post_ra>
// kernel: down_step.5
= control target key start
LH: loop header
LB: loop body
LE: loop exit
PB: predicated region body
PF: predicated region fallthrough
CT: control target
= control target key end

     0   :  { %s297_s0 = inlined_call_operand.vmem [shape: bf16[2,8,8,128], index: 0, kind: input, shape index: {}]   ;;  %s298_s1 = inlined_call_operand.vmem [shape: f32[1,128], index: 1, kind: input, shape index: {}]   ;;  %s299_s2 = inlined_call_operand.vmem [shape: f32[1,128], index: 2, kind: input, shape index: {}]   ;;  %s300_s3 = inlined_call_operand.vmem [shape: f32[2,8,8,128], index: 3, kind: output, shape index: {}]  }
   0x1   :  { %v123_v0 = vld [vmem:[%s297_s0] sm:$0xff]   ;;  %v154_v5 = vld [vmem:[%s297_s0 + $0x8] sm:$0xff]   ;;  %v155_v8 = vld [vmem:[%s297_s0 + $0x10] sm:$0xff]  }
   0x2   :  { %v124_v1 = vunpack.c.l.bf16 %v123_v0  ;;  %v189_v2 = vld [vmem:[%s298_s1] ss:$0 sm:$0xff]  ;;  %v125_v4 = vunpack.c.h.bf16 %v123_v0  ;;  %v128_v6 = vunpack.c.l.bf16 %v154_v5  ;;  %v129_v7 = vunpack.c.h.bf16 %v154_v5  ;;  %v156_v9 = vld [vmem:[%s297_s0 + $0x18] sm:$0xff]   ;;  %v158_v31 = vld [vmem:[%s297_s0 + $0x28] sm:$0xff]  }
   0x3   :  { %v194_v3 = vld [vmem:[%s299_s2] ss:$0 sm:$0xff]  ;;  %v132_v12 = vunpack.c.l.bf16 %v155_v8  ;;  %v133_v13 = vunpack.c.h.bf16 %v155_v8  ;;  %v136_v16 = vunpack.c.l.bf16 %v156_v9  ;;  %v137_v17 = vunpack.c.h.bf16 %v156_v9  ;;  %v159_v36 = vld [vmem:[%s297_s0 + $0x30] sm:$0xff]   ;;  %v160_v41 = vld [vmem:[%s297_s0 + $0x38] sm:$0xff]  }
   0x4   :  { %v51_v10 = vmul.f32 %v189_v2, %v124_v1  ;;  %v52_v11 = vmul.f32 %v189_v2, %v125_v4  ;;  %v53_v14 = vmul.f32 %v189_v2, %v128_v6  ;;  %v54_v15 = vmul.f32 %v189_v2, %v129_v7  ;;  %v157_v26 = vld [vmem:[%s297_s0 + $0x20] sm:$0xff]  }
   0x5   :  { %v55_v20 = vmul.f32 %v189_v2, %v132_v12  ;;  %v56_v21 = vmul.f32 %v189_v2, %v133_v13  ;;  %v57_v24 = vmul.f32 %v189_v2, %v136_v16  ;;  %v58_v25 = vmul.f32 %v189_v2, %v137_v17 }
   0x6   :  { %v70_v18 = vadd.f32 %v194_v3, %v51_v10  ;;  %v71_v19 = vadd.f32 %v194_v3, %v52_v11  ;;  %v72_v22 = vadd.f32 %v194_v3, %v53_v14  ;;  %v73_v23 = vadd.f32 %v194_v3, %v54_v15 }
   0x7   :  { %v74_v29 = vadd.f32 %v194_v3, %v55_v20  ;;  %v75_v30 = vadd.f32 %v194_v3, %v56_v21  ;;  %v76_v34 = vadd.f32 %v194_v3, %v57_v24  ;;  %v77_v35 = vadd.f32 %v194_v3, %v58_v25 }
   0x8   :  { %v86_v27 = vmax.f32 %v70_v18, 0.0  ;;  %v87_v28 = vmax.f32 %v71_v19, 0.0  ;;  %v88_v32 = vmax.f32 %v72_v22, 0.0  ;;  %v89_v33 = vmax.f32 %v73_v23, 0.0 }
   0x9   :  { %v90_v37 = vmax.f32 %v74_v29, 0.0  ;;  %v91_v38 = vmax.f32 %v75_v30, 0.0  ;;  %v140_v39 = vunpack.c.l.bf16 %v157_v26  ;;  %v141_v40 = vunpack.c.h.bf16 %v157_v26 }
   0xa   :  { %102 = vst [vmem:[%s300_s3] sm:$0xff] %v86_v27  ;;  %v92_v42 = vmax.f32 %v76_v34, 0.0  ;;  %v93_v43 = vmax.f32 %v77_v35, 0.0  ;;  %v144_v44 = vunpack.c.l.bf16 %v158_v31  ;;  %v145_v45 = vunpack.c.h.bf16 %v158_v31 }
   0xb   :  { %103 = vst [vmem:[%s300_s3 + $0x8] sm:$0xff] %v87_v28  ;;  %v59_v46 = vmul.f32 %v189_v2, %v140_v39  ;;  %v60_v47 = vmul.f32 %v189_v2, %v141_v40  ;;  %v148_v48 = vunpack.c.l.bf16 %v159_v36  ;;  %v149_v49 = vunpack.c.h.bf16 %v159_v36 }
   0xc   :  { %104 = vst [vmem:[%s300_s3 + $0x10] sm:$0xff] %v88_v32  ;;  %v61_v50 = vmul.f32 %v189_v2, %v144_v44  ;;  %v62_v51 = vmul.f32 %v189_v2, %v145_v45  ;;  %v152_v52 = vunpack.c.l.bf16 %v160_v41  ;;  %v153_v53 = vunpack.c.h.bf16 %v160_v41 }
   0xd   :  { %105 = vst [vmem:[%s300_s3 + $0x18] sm:$0xff] %v89_v33  ;;  %v78_v54 = vadd.f32 %v194_v3, %v59_v46  ;;  %v79_v55 = vadd.f32 %v194_v3, %v60_v47  ;;  %v63_v56 = vmul.f32 %v189_v2, %v148_v48  ;;  %v64_v57 = vmul.f32 %v189_v2, %v149_v49 }
   0xe   :  { %106 = vst [vmem:[%s300_s3 + $0x20] sm:$0xff] %v90_v37  ;;  %v80_v58 = vadd.f32 %v194_v3, %v61_v50  ;;  %v81_v59 = vadd.f32 %v194_v3, %v62_v51  ;;  %v65_v60 = vmul.f32 %v189_v2, %v152_v52  ;;  %v66_v61 = vmul.f32 %v189_v2, %v153_v53 }
   0xf   :  { %107 = vst [vmem:[%s300_s3 + $0x28] sm:$0xff] %v91_v38  ;;  %v94_v62 = vmax.f32 %v78_v54, 0.0  ;;  %v95_v63 = vmax.f32 %v79_v55, 0.0  ;;  %v82_v0 = vadd.f32 %v194_v3, %v63_v56  ;;  %v83_v1 = vadd.f32 %v194_v3, %v64_v57 }
  0x10   :  { %108 = vst [vmem:[%s300_s3 + $0x30] sm:$0xff] %v92_v42  ;;  %v96_v4 = vmax.f32 %v80_v58, 0.0  ;;  %v97_v5 = vmax.f32 %v81_v59, 0.0  ;;  %v84_v6 = vadd.f32 %v194_v3, %v65_v60  ;;  %v85_v2 = vadd.f32 %v194_v3, %v66_v61 }
  0x11   :  { %109 = vst [vmem:[%s300_s3 + $0x38] sm:$0xff] %v93_v43  ;;  %v98_v7 = vmax.f32 %v82_v0, 0.0  ;;  %v99_v8 = vmax.f32 %v83_v1, 0.0 }
  0x12   :  { %110 = vst [vmem:[%s300_s3 + $0x40] sm:$0xff] %v94_v62  ;;  %v100_v9 = vmax.f32 %v84_v6, 0.0  ;;  %v101_v3 = vmax.f32 %v85_v2, 0.0 }
  0x13   :  { %111 = vst [vmem:[%s300_s3 + $0x48] sm:$0xff] %v95_v63 }
  0x14   :  { %112 = vst [vmem:[%s300_s3 + $0x50] sm:$0xff] %v96_v4 }
  0x15   :  { %113 = vst [vmem:[%s300_s3 + $0x58] sm:$0xff] %v97_v5 }
  0x16   :  { %114 = vst [vmem:[%s300_s3 + $0x60] sm:$0xff] %v98_v7 }
  0x17   :  { %115 = vst [vmem:[%s300_s3 + $0x68] sm:$0xff] %v99_v8 }
  0x18   :  { %116 = vst [vmem:[%s300_s3 + $0x70] sm:$0xff] %v100_v9 }
  0x19   :  { %117 = vst [vmem:[%s300_s3 + $0x78] sm:$0xff] %v101_v3 }

// kernel: down_step.3
= control target key start
LH: loop header
LB: loop body
LE: loop exit
PB: predicated region body
PF: predicated region fallthrough
CT: control target
= control target key end

     0   :  { %vm79_vm0 = vcmask 1043456   ;;  %vm188_vm1 = vsmask.f32 256  ;;  %vm189_vm2 = vsmask.f32 4368  ;;  %s3477_s1 = inlined_call_operand.vmem [shape: bf16[9,128,128], index: 1, kind: input, shape index: {}]   ;;  %s3478_s0 = inlined_call_operand.vmem [shape: bf16[2,8,8,128], index: 0, kind: input, shape index: {}]   ;;  %s3479_s2 = inlined_call_operand.vmem [shape: bf16[2,8,8,128], index: 2, kind: output, shape index: {0}]   ;;  %s3480_s3 = inlined_call_operand.vmem [shape: f32[1,1,128], index: 3, kind: output, shape index: {1}]   ;;  %s3481_s4 = inlined_call_operand.vmem [shape: f32[1,1,128], index: 4, kind: output, shape index: {2}]  }
   0x1   :  { %v2344_v0 = vld [vmem:[%s3477_s1 + $0xf8] sm:$0xff]  ;;  %v2343_v1 = vld [vmem:[%s3477_s1 + $0xf0] sm:$0xff]  ;;  %v2476_v5 = vld [vmem:[%s3478_s0 + $0x20] sm:$0xff]   ;;  %vm1258_vm4 = vsmask.f32 3328 }
   0x2   :  { %2487 = vmatpush.bf16.msra.mxu1 %v2344_v0  ;;  %2488 = vmatpush.bf16.msra.mxu2 %v2344_v0  ;;  %v2474_v2 = vld [vmem:[%s3478_s0 + $0x10] sm:$0xff]   ;;  %v2419_v7 = vunpack.c.l.b16 %v2476_v5  ;;  %v2420_v8 = vunpack.c.h.b16 %v2476_v5  ;;  %v2342_v12 = vld [vmem:[%s3477_s1 + $0xe8] sm:$0xff]  ;;  %v2559_v15 = vld [vmem:[%s3478_s0] sm:$0xff]   ;;  %vm1259_vm5 = vsmask.f32 7440 }
   0x3   :  { %2489 = vmatpush.bf16.msra.mxu3 %v2344_v0  ;;  %535 = vmatpush.bf16.msra.mxu0 %v2344_v0  ;;  %v2411_v3 = vunpack.c.l.b16 %v2474_v2  ;;  %v2412_v4 = vunpack.c.h.b16 %v2474_v2  ;;  %v2478_v6 = vld [vmem:[%s3478_s0 + $0x30] sm:$0xff]   ;;  %v2403_v26 = vunpack.c.l.b16 %v2559_v15  ;;  %v2341_v27 = vld [vmem:[%s3477_s1 + $0xe0] sm:$0xff]  ;;  %v2340_v44 = vld [vmem:[%s3477_s1 + $0xd8] sm:$0xff] }
   0x4   :  { %v2427_v11 = vunpack.c.l.b16 %v2478_v6  ;;  %v71_v13 = vpack.c.b16 %v2419_v7, %v2419_v7  ;;  %v72_v14 = vpack.c.b16 %v2420_v8, %v2420_v8  ;;  %v2428_v18 = vunpack.c.h.b16 %v2478_v6  ;;  %vm2606_vm3 = vmor %vm188_vm1, %vm189_vm2  ;;  %v2339_v62 = vld [vmem:[%s3477_s1 + $0xd0] sm:$0xff]  ;;  %v2382_v53 = vld [vmem:[%s3477_s1 + $0xa8] sm:$0xff] }
   0x5   :  { %v67_v9 = vpack.c.b16 %v2411_v3, %v2411_v3  ;;  %v68_v10 = vpack.c.b16 %v2412_v4, %v2412_v4  ;;  %vm3170_vm6 = vmor %vm1258_vm4, %vm1259_vm5 }
   0x6   :  { %2490 = vmatpush.bf16.msra.mxu1 %v2343_v1  ;;  %2491 = vmatpush.bf16.msra.mxu2 %v2343_v1  ;;  %v98_v23 = vsel %vm79_vm0, 0, %v71_v13  ;;  %v100_v24 = vsel %vm79_vm0, 0, %v72_v14  ;;  %v75_v25 = vpack.c.b16 %v2427_v11, %v2427_v11  ;;  %v76_v48 = vpack.c.b16 %v2428_v18, %v2428_v18  ;;  %v2338_v14 = vld [vmem:[%s3477_s1 + $0xc8] sm:$0xff] }
   0x7   :  { %2492 = vmatpush.bf16.msra.mxu3 %v2343_v1  ;;  %536 = vmatpush.bf16.msra.mxu0 %v2343_v1  ;;  %v90_v16 = vsel %vm79_vm0, 0, %v67_v9  ;;  %v92_v17 = vsel %vm79_vm0, 0, %v68_v10  ;;  %v144_v31 = vunpack.c.l.b16 %v98_v23  ;;  %v2581_v33 = vunpack.c.h.b16 %v98_v23 }
   0x8   :  { %v138_v19 = vunpack.c.l.b16 %v90_v16  ;;  %v2563_v20 = vunpack.c.h.b16 %v90_v16  ;;  %v140_v21 = vunpack.c.l.b16 %v92_v17  ;;  %v2565_v22 = vunpack.c.h.b16 %v92_v17 }
   0x9   :  { %v146_v34 = vunpack.c.l.b16 %v100_v24  ;;  %v2583_v35 = vunpack.c.h.b16 %v100_v24  ;;  %v174_v42 = vpack.c.b16 %v144_v31, %v144_v31  ;;  %v2591_v43 = vpack.c.b16 %v2581_v33, %v2581_v33 }
   0xa   :  { %2493 = vmatpush.bf16.msra.mxu1 %v2342_v12  ;;  %2494 = vmatpush.bf16.msra.mxu2 %v2342_v12  ;;  %v168_v28 = vpack.c.b16 %v138_v19, %v138_v19  ;;  %v2575_v29 = vpack.c.b16 %v2563_v20, %v2563_v20  ;;  %v170_v30 = vpack.c.b16 %v140_v21, %v140_v21  ;;  %v106_v61 = vsel %vm79_vm0, 0, %v75_v25  ;;  %v2660_v25 = vld [vmem:[%s3478_s0 + $0x18] sm:$0xff]  }
   0xb   :  { %2495 = vmatpush.bf16.msra.mxu3 %v2342_v12  ;;  %537 = vmatpush.bf16.msra.mxu0 %v2342_v12  ;;  %v2579_v32 = vpack.c.b16 %v2565_v22, %v2565_v22  ;;  %v176_v47 = vpack.c.b16 %v146_v34, %v146_v34  ;;  %v2602_v51 = vpack.c.b16 %v2583_v35, %v2583_v35  ;;  %v296_v52 = vshrl.u32 %v174_v42, 16  ;;  %v2337_v42 = vld [vmem:[%s3477_s1 + $0xc0] sm:$0xff] }
   0xc   :  { %v257_v36 = vshrl.u32 %v168_v28, 16  ;;  %v3492_v37 = vshrl.u32 %v2575_v29, 16  ;;  %v3491_v38 = vshll.u32 %v2575_v29, 16  ;;  %v270_v39 = vshrl.u32 %v170_v30, 16 }
   0xd   :  { %v3499_v40 = vshrl.u32 %v2579_v32, 16  ;;  %v3501_v41 = vshll.u32 %v2579_v32, 16  ;;  %v3487_v55 = vshrl.u32 %v2591_v43, 16  ;;  %v3489_v56 = vshll.u32 %v2591_v43, 16 }
   0xe   :  { %2496 = vmatpush.bf16.msra.mxu1 %v2341_v27  ;;  %2497 = vmatpush.bf16.msra.mxu2 %v2341_v27  ;;  %v1901_v45 = vrot.slane %v257_v36, 11  ;;  %v264_v46 = vrot.slane %v3492_v37, 7  ;;  %v1902_v49 = vrot.slane %v270_v39, 11  ;;  %v309_v57 = vshrl.u32 %v176_v47, 16 }
   0xf   :  { %2498 = vmatpush.bf16.msra.mxu3 %v2341_v27  ;;  %538 = vmatpush.bf16.msra.mxu0 %v2341_v27  ;;  %v277_v50 = vrot.slane %v3499_v40, 7  ;;  %v3486_v59 = vshrl.u32 %v2602_v51, 16  ;;  %v3488_v60 = vshll.u32 %v2602_v51, 16  ;;  %v1904_v63 = vrot.slane %v296_v52, 11 }
  0x10   :  { %v267_v54 = vor.u32 %v3491_v38, %v264_v46  ;;  %v303_v0 = vrot.slane %v3487_v55, 7  ;;  %v108_v1 = vsel %vm79_vm0, 0, %v76_v48  ;;  %v1905_v4 = vrot.slane %v309_v57, 11 }
  0x11   :  { %v280_v58 = vor.u32 %v3501_v41, %v277_v50  ;;  %v316_v5 = vrot.slane %v3486_v59, 7  ;;  %v152_v7 = vunpack.c.l.b16 %v106_v61  ;;  %v2633_v8 = vunpack.c.h.b16 %v106_v61  ;;  %v2352_v61 = vld [vmem:[%s3477_s1 + $0x1b8] sm:$0xff] }
  0x12   :  { %2499 = vmatpush.bf16.msra.mxu1 %v2340_v44  ;;  %2500 = vmatpush.bf16.msra.mxu2 %v2340_v44  ;;  %v268_v2 = vsel %vm2606_vm3, %v1901_v45, %v267_v54  ;;  %v306_v6 = vor.u32 %v3489_v56, %v303_v0  ;;  %v2404_v9 = vunpack.c.h.b16 %v2559_v15  ;;  %v154_v11 = vunpack.c.l.b16 %v108_v1  ;;  %v2687_v54 = vld [vmem:[%s3478_s0 + $0x28] sm:$0xff]  }
  0x13   :  { %2501 = vmatpush.bf16.msra.mxu3 %v2340_v44  ;;  %539 = vmatpush.bf16.msra.mxu0 %v2340_v44  ;;  %v281_v3 = vsel %vm2606_vm3, %v1902_v49, %v280_v58  ;;  %v319_v10 = vor.u32 %v3488_v60, %v316_v5  ;;  %v2638_v12 = vunpack.c.h.b16 %v108_v1  ;;  %v63_v13 = vpack.c.b16 %v2403_v26, %v2403_v26 }
  0x14   :  { %v2643_v16 = vunpack.c.l.b16 %v268_v2  ;;  %v2645_v17 = vunpack.c.l.b16 %v281_v3  ;;  %v307_v15 = vsel %vm2606_vm3, %v1904_v63, %v306_v6  ;;  %v182_v18 = vpack.c.b16 %v152_v7, %v152_v7  ;;  %v2360_v6 = vld [vmem:[%s3477_s1 + $0x78] sm:$0xff] }
  0x15   :  { %v320_v19 = vsel %vm2606_vm3, %v1905_v4, %v319_v10  ;;  %v2651_v21 = vunpack.c.l.b16 %v307_v15  ;;  %v2655_v23 = vpack.c.b16 %v2633_v8, %v2633_v8  ;;  %v184_v24 = vpack.c.b16 %v154_v11, %v154_v11  ;;  %v2368_v10 = vld [vmem:[%s3477_s1 + $0x138] sm:$0xff] }
  0x16   :  { %2502 = vmatpush.bf16.msra.mxu1 %v2339_v62  ;;  %2503 = vmatpush.bf16.msra.mxu2 %v2339_v62  ;;  %v2662_v26 = vunpack.c.l.b16 %v320_v19  ;;  %v2666_v27 = vpack.c.b16 %v2638_v12, %v2638_v12  ;;  %v348_v28 = vshrl.u32 %v182_v18, 16  ;;  %v64_v30 = vpack.c.b16 %v2404_v9, %v2404_v9 }
  0x17   :  { %2504 = vmatpush.bf16.msra.mxu3 %v2339_v62  ;;  %540 = vmatpush.bf16.msra.mxu0 %v2339_v62  ;;  %3517 = vst [vmem:[#allocation2_spill] sm:$0xff] %v2655_v23  ;;  %v3484_v31 = vshrl.u32 %v2655_v23, 16  ;;  %v3485_v34 = vshll.u32 %v2655_v23, 16  ;;  %v361_v36 = vshrl.u32 %v184_v24, 16  ;;  %v82_v39 = vsel %vm79_vm0, 0, %v63_v13  ;;  %v2336_v62 = vld [vmem:[%s3477_s1 + $0x38] sm:$0xff] }
  0x18   :  { %3518 = vst [vmem:[#allocation3_spill] sm:$0xff] %v2666_v27  ;;  %v473_v44 = vpack.c.b16 %v2645_v17, %v2643_v16  ;;  %v3482_v45 = vshrl.u32 %v2666_v27, 16  ;;  %v3483_v46 = vshll.u32 %v2666_v27, 16  ;;  %v2415_v47 = vunpack.c.l.b16 %v2660_v25 }
  0x19   :  { %v475_v48 = vpack.c.b16 %v2662_v26, %v2651_v21  ;;  %v1908_v49 = vrot.slane %v348_v28, 11  ;;  %v355_v50 = vrot.slane %v3484_v31, 7  ;;  %v84_v52 = vsel %vm79_vm0, 0, %v64_v30 }
  0x1a   :  { %2505 = vmatpush.bf16.msra.mxu1 %v2338_v14  ;;  %2506 = vmatpush.bf16.msra.mxu2 %v2338_v14  ;;  %v1909_v57 = vrot.slane %v361_v36, 11  ;;  %v368_v58 = vrot.slane %v3482_v45, 7  ;;  %v130_v63 = vunpack.c.l.b16 %v82_v39  ;;  %v2697_v0 = vunpack.c.h.b16 %v82_v39  ;;  %v2351_v36 = vld [vmem:[%s3477_s1 + $0x1b0] sm:$0xff] }
  0x1b   :  { %2507 = vmatpush.bf16.msra.mxu3 %v2338_v14  ;;  %541 = vmatpush.bf16.msra.mxu0 %v2338_v14  ;;  %v358_v1 = vor.u32 %v3485_v34, %v355_v50  ;;  %v132_v2 = vunpack.c.l.b16 %v84_v52  ;;  %v2701_v3 = vunpack.c.h.b16 %v84_v52  ;;  %v2416_v4 = vunpack.c.h.b16 %v2660_v25  ;;  %v2335_v39 = vld [vmem:[%s3477_s1 + $0x30] sm:$0xff]  ;;  %v2358_v25 = vld [vmem:[%s3477_s1 + $0x68] sm:$0xff] }
  0x1c   :  { %v371_v5 = vor.u32 %v3483_v46, %v368_v58  ;;  %v160_v7 = vpack.c.b16 %v130_v63, %v130_v63  ;;  %v161_v9 = vpack.c.b16 %v2697_v0, %v2697_v0  ;;  %v2423_v11 = vunpack.c.l.b16 %v2687_v54  ;;  %v2364_v46 = vld [vmem:[%s3477_s1 + $0x118] sm:$0xff] }
  0x1d   :  { %v359_v13 = vsel %vm2606_vm3, %v1908_v49, %v358_v1  ;;  %v162_v14 = vpack.c.b16 %v132_v2, %v132_v2  ;;  %v163_v15 = vpack.c.b16 %v2701_v3, %v2701_v3  ;;  %v2424_v18 = vunpack.c.h.b16 %v2687_v54 }
  0x1e   :  { %2508 = vmatpush.bf16.msra.mxu1 %v2337_v42  ;;  %2509 = vmatpush.bf16.msra.mxu2 %v2337_v42  ;;  %v372_v19 = vsel %vm2606_vm3, %v1909_v57, %v371_v5  ;;  %v2722_v24 = vunpack.c.l.b16 %v359_v13  ;;  %v205_v28 = vshrl.u32 %v160_v7, 16  ;;  %v210_v30 = vshrl.u32 %v161_v9, 16 }
  0x1f   :  { %2510 = vmatpush.bf16.msra.mxu3 %v2337_v42  ;;  %542 = vmatpush.bf16.msra.mxu0 %v2337_v42  ;;  %v2730_v42 = vunpack.c.l.b16 %v372_v19  ;;  %v213_v49 = vshll.u32 %v161_v9, 16  ;;  %v218_v50 = vshrl.u32 %v162_v14, 16  ;;  %v223_v52 = vshrl.u32 %v163_v15, 16  ;;  %v2350_v9 = vld [vmem:[%s3477_s1 + $0x1a8] sm:$0xff] }
  0x20   :  { %v1897_v54 = vrot.slane %v205_v28, 11  ;;  %v212_v57 = vrot.slane %v210_v30, 7  ;;  %v226_v58 = vshll.u32 %v163_v15, 16  ;;  %v69_v13 = vpack.c.b16 %v2415_v47, %v2415_v47  ;;  %v2366_v47 = vld [vmem:[%s3477_s1 + $0x128] sm:$0xff] }
  0x21   :  { %553 = vmatmul.bf16.vlgmr.msra.gmra.mxu1 %v473_v44  ;;  %563 = vmatmul.bf16.vlgmr.msra.gmra.mxu2 %v475_v48  ;;  %v2367_v44 = vld [vmem:[%s3477_s1 + $0x130] sm:$0xff]  ;;  %v477_v48 = vpack.c.b16 %v2730_v42, %v2722_v24  ;;  %v1898_v63 = vrot.slane %v218_v50, 11  ;;  %v225_v1 = vrot.slane %v223_v52, 7  ;;  %v2742_v2 = vrot.slane %v213_v49, 5 }
  0x22   :  { %767 = vmatpush.bf16.msrb.mxu2 %v2352_v61  ;;  %649 = vmatpush.bf16.msrb.mxu1 %v2336_v62  ;;  %v2732_v61 = vrot.slane %v210_v30, 4  ;;  %v2359_v62 = vld [vmem:[%s3477_s1 + $0x70] sm:$0xff]  ;;  %v215_v5 = vor.u32 %v213_v49, %v212_v57  ;;  %v2746_v7 = vrot.slane %v226_v58, 5  ;;  %v70_v19 = vpack.c.b16 %v2416_v4, %v2416_v4  ;;  %v2349_v57 = vld [vmem:[%s3477_s1 + $0x1a0] sm:$0xff] }
  0x23   :  { %913 = vmatpush.bf16.msrb.mxu3 %v2360_v6  ;;  %1059 = vmatpush.bf16.msrb.mxu0 %v2368_v10  ;;  %v2744_v6 = vrot.slane %v223_v52, 4  ;;  %v2334_v10 = vld [vmem:[%s3477_s1 + $0x28] sm:$0xff]  ;;  %v228_v14 = vor.u32 %v226_v58, %v225_v1  ;;  %v73_v28 = vpack.c.b16 %v2423_v11, %v2423_v11  ;;  %v74_v4 = vpack.c.b16 %v2424_v18, %v2424_v18 }
  0x24   :  { %573 = vmatmul.bf16.vlgmr.msra.gmra.mxu3 %v477_v48  ;;  %v216_v30 = vsel %vm2606_vm3, %v1897_v54, %v215_v5  ;;  %v96_v50 = vsel %vm79_vm0, 0, %v70_v19 }
  0x25   :  { %v229_v11 = vsel %vm2606_vm3, %v1898_v63, %v228_v14  ;;  %v2772_v49 = vunpack.c.l.b16 %v216_v30  ;;  %v2782_v18 = vunpack.c.h.b16 %v96_v50  ;;  %v102_v63 = vsel %vm79_vm0, 0, %v73_v28 }
  0x26   :  { %768 = vmatpush.bf16.msrb.mxu2 %v2351_v36  ;;  %650 = vmatpush.bf16.msrb.mxu1 %v2335_v39  ;;  %v94_v39 = vsel %vm79_vm0, 0, %v69_v13  ;;  %v2775_v54 = vunpack.c.l.b16 %v229_v11  ;;  %v104_v1 = vsel %vm79_vm0, 0, %v74_v4  ;;  %v148_v19 = vunpack.c.l.b16 %v102_v63 }
  0x27   :  { %914 = vmatpush.bf16.msrb.mxu3 %v2359_v62  ;;  %1060 = vmatpush.bf16.msrb.mxu0 %v2367_v44  ;;  %v142_v52 = vunpack.c.l.b16 %v94_v39  ;;  %v2780_v58 = vunpack.c.h.b16 %v94_v39  ;;  %v404_v62 = vunpack.c.l.b16 %v96_v50  ;;  %v2333_v44 = vld [vmem:[%s3477_s1 + $0x20] sm:$0xff]  ;;  %v2803_v30 = vpack.c.b16 %v2782_v18, %v2782_v18  ;;  %v2810_v39 = vld [vmem:[%s3478_s0 + $0x38] sm:$0xff]  }
  0x28   :  { %v471_v5 = vpack.c.b16 %v2775_v54, %v2772_v49  ;;  %v178_v45 = vpack.c.b16 %v148_v19, %v148_v19  ;;  %v2356_v19 = vld [vmem:[%s3477_s1 + $0x58] sm:$0xff] }
  0x29   :  { %v172_v48 = vpack.c.b16 %v142_v52, %v142_v52  ;;  %v2799_v13 = vpack.c.b16 %v2780_v58, %v2780_v58  ;;  %v408_v14 = vpack.c.b16 %v404_v62, %v404_v62  ;;  %v2814_v52 = vunpack.c.h.b16 %v104_v1  ;;  %v2348_v62 = vld [vmem:[%s3477_s1 + $0x198] sm:$0xff] }
  0x2a   :  { %769 = vmatpush.bf16.msrb.mxu2 %v2350_v9  ;;  %651 = vmatpush.bf16.msrb.mxu1 %v2334_v10  ;;  %v2357_v9 = vld [vmem:[%s3477_s1 + $0x60] sm:$0xff]  ;;  %v322_v59 = vshrl.u32 %v178_v45, 16  ;;  %v2331_v45 = vld [vmem:[%s3477_s1 + $0x10] sm:$0xff] }
  0x2b   :  { %915 = vmatpush.bf16.msrb.mxu3 %v2358_v25  ;;  %1061 = vmatpush.bf16.msrb.mxu0 %v2366_v47  ;;  %v2365_v10 = vld [vmem:[%s3477_s1 + $0x120] sm:$0xff]  ;;  %v283_v28 = vshrl.u32 %v172_v48, 16  ;;  %v2805_v25 = vunpack.c.h.b16 %v102_v63  ;;  %v150_v47 = vunpack.c.l.b16 %v104_v1  ;;  %v3495_v4 = vshrl.u32 %v2799_v13, 16 }
  0x2c   :  { %543 = vmatmul.bf16.vlgmr.msra.gmra.mxu0 %v471_v5  ;;  %v3500_v11 = vshll.u32 %v2799_v13, 16  ;;  %v413_v50 = vshrl.u32 %v408_v14, 16  ;;  %v3490_v48 = vshrl.u32 %v2803_v30, 16  ;;  %v3494_v63 = vshll.u32 %v2803_v30, 16 }
  0x2d   :  { %v1903_v5 = vrot.slane %v283_v28, 11  ;;  %v290_v1 = vrot.slane %v3495_v4, 7  ;;  %v2828_v14 = vpack.c.b16 %v2805_v25, %v2805_v25  ;;  %v180_v28 = vpack.c.b16 %v150_v47, %v150_v47  ;;  %v2346_v4 = vld [vmem:[%s3477_s1 + $0x188] sm:$0xff] }
  0x2e   :  { %770 = vmatpush.bf16.msrb.mxu2 %v2349_v57  ;;  %652 = vmatpush.bf16.msrb.mxu1 %v2333_v44  ;;  %v2332_v57 = vld [vmem:[%s3477_s1 + $0x18] sm:$0xff]  ;;  %v2431_v44 = vunpack.c.l.b16 %v2810_v39  ;;  %v2841_v31 = vpack.c.b16 %v2814_v52, %v2814_v52 }
  0x2f   :  { %916 = vmatpush.bf16.msrb.mxu3 %v2357_v9  ;;  %1062 = vmatpush.bf16.msrb.mxu0 %v2365_v10  ;;  %v1911_v9 = vrot.slane %v413_v50, 11  ;;  %v420_v10 = vrot.slane %v3490_v48, 7  ;;  %v293_v34 = vor.u32 %v3500_v11, %v290_v1  ;;  %v3493_v55 = vshrl.u32 %v2828_v14, 16  ;;  %v2347_v50 = vld [vmem:[%s3477_s1 + $0x190] sm:$0xff] }
  0x30   :  { %3519 = vst [vmem:[#allocation4_spill] sm:$0xff] %v2841_v31  ;;  %v3498_v60 = vshll.u32 %v2828_v14, 16  ;;  %v335_v56 = vshrl.u32 %v180_v28, 16  ;;  %v3496_v48 = vshrl.u32 %v2841_v31, 16  ;;  %v3497_v38 = vshll.u32 %v2841_v31, 16  ;;  %v2363_v28 = vld [vmem:[%s3477_s1 + $0x110] sm:$0xff] }
  0x31   :  { %v423_v47 = vor.u32 %v3494_v63, %v420_v10  ;;  %v1906_v1 = vrot.slane %v322_v59, 11  ;;  %v329_v37 = vrot.slane %v3493_v55, 7  ;;  %v2473_v10 = vld [vmem:[%s3478_s0 + $0x8] sm:$0xff]   ;;  %v2432_v63 = vunpack.c.h.b16 %v2810_v39 }
  0x32   :  { %771 = vmatpush.bf16.msrb.mxu2 %v2348_v62  ;;  %653 = vmatpush.bf16.msrb.mxu1 %v2332_v57  ;;  %v294_v62 = vsel %vm2606_vm3, %v1903_v5, %v293_v34  ;;  %v2355_v57 = vld [vmem:[%s3477_s1 + $0x50] sm:$0xff]  ;;  %v1907_v5 = vrot.slane %v335_v56, 11  ;;  %v2407_v56 = vunpack.c.l.b16 %v2473_v10 }
  0x33   :  { %917 = vmatpush.bf16.msrb.mxu3 %v2356_v19  ;;  %1063 = vmatpush.bf16.msrb.mxu0 %v2364_v46  ;;  %v424_v59 = vsel %vm2606_vm3, %v1911_v9, %v423_v47  ;;  %v2872_v34 = vunpack.c.l.b16 %v294_v62  ;;  %v342_v19 = vrot.slane %v3496_v48, 7  ;;  %v332_v46 = vor.u32 %v3498_v60, %v329_v37 }
  0x34   :  { %v2876_v55 = vunpack.c.l.b16 %v424_v59  ;;  %v77_v47 = vpack.c.b16 %v2431_v44, %v2431_v44  ;;  %v2408_v62 = vunpack.c.h.b16 %v2473_v10  ;;  %v2330_v59 = vld [vmem:[%s3477_s1 + $0x8] sm:$0xff] }
  0x35   :  { %v345_v9 = vor.u32 %v3497_v38, %v342_v19  ;;  %v333_v39 = vsel %vm2606_vm3, %v1906_v1, %v332_v46  ;;  %v2354_v44 = vld [vmem:[%s3477_s1 + $0x48] sm:$0xff]  ;;  %v65_v38 = vpack.c.b16 %v2407_v56, %v2407_v56 }
  0x36   :  { %772 = vmatpush.bf16.msrb.mxu2 %v2347_v50  ;;  %654 = vmatpush.bf16.msrb.mxu1 %v2331_v45  ;;  %v474_v37 = vpack.c.b16 %v2876_v55, %v2872_v34  ;;  %v78_v50 = vpack.c.b16 %v2432_v63, %v2432_v63  ;;  %v2362_v45 = vld [vmem:[%s3477_s1 + $0x108] sm:$0xff]  ;;  %v2901_v19 = vunpack.c.l.b16 %v333_v39  ;;  %v110_v48 = vsel %vm79_vm0, 0, %v77_v47  ;;  %v2329_v47 = vld [vmem:[%s3477_s1] sm:$0xff] }
  0x37   :  { %918 = vmatpush.bf16.msrb.mxu3 %v2355_v57  ;;  %1064 = vmatpush.bf16.msrb.mxu0 %v2363_v28  ;;  %v346_v10 = vsel %vm2606_vm3, %v1907_v5, %v345_v9  ;;  %v156_v57 = vunpack.c.l.b16 %v110_v48  ;;  %v2907_v28 = vunpack.c.h.b16 %v110_v48  ;;  %v66_v40 = vpack.c.b16 %v2408_v62, %v2408_v62  ;;  %v2345_v9 = vld [vmem:[%s3477_s1 + $0x180] sm:$0xff] }
  0x38   :  { %558 = vmatmul.bf16.gmra.mxu1 %v474_v37  ;;  %v2904_v63 = vunpack.c.l.b16 %v346_v10  ;;  %v112_v1 = vsel %vm79_vm0, 0, %v78_v50  ;;  %v86_v5 = vsel %vm79_vm0, 0, %v65_v38  ;;  %v2353_v38 = vld [vmem:[%s3477_s1 + $0x40] sm:$0xff] }
  0x39   :  { %v406_v46 = vunpack.c.l.b16 %v112_v1  ;;  %v2909_v60 = vunpack.c.h.b16 %v112_v1  ;;  %v186_v56 = vpack.c.b16 %v156_v57, %v156_v57  ;;  %v134_v62 = vunpack.c.l.b16 %v86_v5 }
  0x3a   :  { %773 = vmatpush.bf16.msrb.mxu2 %v2346_v4  ;;  %655 = vmatpush.bf16.msrb.mxu1 %v2330_v59  ;;  %v476_v48 = vpack.c.b16 %v2904_v63, %v2901_v19  ;;  %v2922_v4 = vpack.c.b16 %v2907_v28, %v2907_v28  ;;  %v2361_v59 = vld [vmem:[%s3477_s1 + $0x100] sm:$0xff]  ;;  %v88_v50 = vsel %vm79_vm0, 0, %v66_v40  ;;  %v2935_v10 = vunpack.c.h.b16 %v86_v5  ;;  %v2392_v40 = vld [vmem:[%s3477_s1 + $0x178] sm:$0xff] }
  0x3b   :  { %919 = vmatpush.bf16.msrb.mxu3 %v2354_v44  ;;  %1065 = vmatpush.bf16.msrb.mxu0 %v2362_v45  ;;  %v410_v37 = vpack.c.b16 %v406_v46, %v406_v46  ;;  %v2932_v39 = vpack.c.b16 %v2909_v60, %v2909_v60  ;;  %v2384_v44 = vld [vmem:[%s3477_s1 + $0xb8] sm:$0xff]  ;;  %v374_v45 = vshrl.u32 %v186_v56, 16  ;;  %v136_v11 = vunpack.c.l.b16 %v88_v50 }
  0x3c   :  { %568 = vmatmul.bf16.gmra.mxu2 %v476_v48  ;;  %v3507_v1 = vshrl.u32 %v2922_v4, 16  ;;  %v3510_v57 = vshll.u32 %v2922_v4, 16  ;;  %v2944_v15 = vunpack.c.h.b16 %v88_v50  ;;  %v2376_v5 = vld [vmem:[%s3477_s1 + $0x1f8] sm:$0xff]  ;;  %v164_v50 = vpack.c.b16 %v134_v62, %v134_v62 }
  0x3d   :  { %3520 = vst [vmem:[#allocation5_spill] sm:$0xff] %v2932_v39  ;;  %v426_v46 = vshrl.u32 %v410_v37, 16  ;;  %v3506_v41 = vshrl.u32 %v2932_v39, 16  ;;  %v2400_v48 = vld [vmem:[%s3477_s1 + $0x238] sm:$0xff]  ;;  %v1910_v56 = vrot.slane %v374_v45, 11  ;;  %v165_v36 = vpack.c.b16 %v2935_v10, %v2935_v10 }
  0x3e   :  { %774 = vmatpush.bf16.msrb.mxu2 %v2345_v9  ;;  %656 = vmatpush.bf16.msrb.mxu1 %v2329_v47  ;;  %v381_v37 = vrot.slane %v3507_v1, 7  ;;  %v166_v23 = vpack.c.b16 %v136_v11, %v136_v11  ;;  %v2965_v45 = vpack.c.b16 %v2944_v15, %v2944_v15  ;;  %v231_v62 = vshrl.u32 %v164_v50, 16 }
  0x3f   :  { %920 = vmatpush.bf16.msrb.mxu3 %v2353_v38  ;;  %1066 = vmatpush.bf16.msrb.mxu0 %v2361_v59  ;;  %v1912_v9 = vrot.slane %v426_v46, 11  ;;  %v433_v47 = vrot.slane %v3506_v41, 7  ;;  %v3521_v38 = vshll.u32 %v2932_v39, 16  ;;  %v236_v46 = vshrl.u32 %v165_v36, 16 }
  0x40   :  { %v384_v27 = vor.u32 %v3510_v57, %v381_v37  ;;  %v239_v41 = vshll.u32 %v165_v36, 16  ;;  %v2512_v1 = vmov 0   ;;  %v244_v37 = vshrl.u32 %v166_v23, 16 }
  0x41   :  { %v436_v59 = vor.u32 %v3521_v38, %v433_v47  ;;  %v128_v31 = vunpack.c.l.b16 %v2512_v1  ;;  %v3514_v11 = vshrl.u32 %v2965_v45, 16  ;;  %v2981_v39 = vrot.slane %v236_v46, 4 }
  0x42   :  { %1435 = vmatpush.bf16.msra.mxu2 %v2384_v44  ;;  %1193 = vmatpush.bf16.msra.mxu1 %v2376_v5  ;;  %v385_v44 = vsel %vm2606_vm3, %v1910_v56, %v384_v27  ;;  %v238_v5 = vrot.slane %v236_v46, 7  ;;  %v1900_v36 = vrot.slane %v244_v37, 11  ;;  %v2983_v23 = vrot.slane %v239_v41, 5  ;;  %v2383_v37 = vld [vmem:[%s3477_s1 + $0xb0] sm:$0xff] }
  0x43   :  { %1593 = vmatpush.bf16.msra.mxu3 %v2392_v40  ;;  %1727 = vmatpush.bf16.msra.mxu0 %v2400_v48  ;;  %v1899_v40 = vrot.slane %v231_v62, 11  ;;  %v437_v57 = vsel %vm2606_vm3, %v1912_v9, %v436_v59  ;;  %v2974_v50 = vunpack.c.l.b16 %v385_v44  ;;  %v3513_v48 = vshll.u32 %v2965_v45, 16 }
  0x44   :  { %v2977_v47 = vunpack.c.l.b16 %v437_v57  ;;  %v251_v38 = vrot.slane %v3514_v11, 7  ;;  %v241_v27 = vor.u32 %v239_v41, %v238_v5  ;;  %v2985_v56 = vunpack.c.h.b16 %v2512_v1 }
  0x45   :  { %v2987_v62 = vpack.c.b16 %v128_v31, %v128_v31  ;;  %v1281_v46 = vor.u32 %v2983_v23, %v2981_v39  ;;  %v1001_v39 = vpack.c.b16 %v2638_v12, %v2633_v8 }
  0x46   :  { %v478_v9 = vpack.c.b16 %v2977_v47, %v2974_v50  ;;  %v254_v57 = vor.u32 %v3513_v48, %v251_v38  ;;  %v242_v59 = vsel %vm2606_vm3, %v1899_v40, %v241_v27  ;;  %v2999_v41 = vpack.c.b16 %v2985_v56, %v2985_v56  ;;  %1436 = vmatpush.bf16.msra.mxu2 %v2383_v37 }
  0x47   :  { %v192_v1 = vshrl.u32 %v2987_v62, 16  ;;  %v457_v44 = vunpack.c.l.b16 %v242_v59  ;;  %v2375_v59 = vld [vmem:[%s3477_s1 + $0x1f0] sm:$0xff] }
  0x48   :  { %578 = vmatmul.bf16.gmra.mxu3 %v478_v9  ;;  %v255_v31 = vsel %vm2606_vm3, %v1900_v36, %v254_v57  ;;  %v197_v40 = vshrl.u32 %v2999_v41, 16  ;;  %v200_v38 = vshll.u32 %v2999_v41, 16  ;;  %v2391_v57 = vld [vmem:[%s3477_s1 + $0x170] sm:$0xff]  ;;  %1194 = vmatpush.bf16.msra.mxu1 %v2375_v59  ;;  %v2380_v59 = vld [vmem:[%s3477_s1 + $0x98] sm:$0xff] }
  0x49   :  { %v458_v5 = vunpack.c.l.b16 %v255_v31  ;;  %v586_v27 = vpack.c.b16 %v457_v44, %v2775_v54  ;;  %v1896_v11 = vrot.slane %v192_v1, 11  ;;  %v2399_v54 = vld [vmem:[%s3477_s1 + $0x230] sm:$0xff]  ;;  %1594 = vmatpush.bf16.msra.mxu3 %v2391_v57  ;;  %v996_v57 = vpack.c.b16 %v2944_v15, %v2935_v10 }
  0x4a   :  { %v199_v9 = vrot.slane %v197_v40, 7  ;;  %1728 = vmatpush.bf16.msra.mxu0 %v2399_v54  ;;  %1437 = vmatpush.bf16.msra.mxu2 %v2382_v53  ;;  %v997_v54 = vpack.c.b16 %v2565_v22, %v2563_v20  ;;  %v2371_v53 = vld [vmem:[%s3477_s1 + $0x1d0] sm:$0xff] }
  0x4b   :  { %v472_v48 = vpack.c.b16 %v458_v5, %v457_v44  ;;  %v849_v44 = vpack.c.b16 %v2697_v0, %v2985_v56  ;;  %v587_v37 = vpack.c.b16 %v2643_v16, %v458_v5  ;;  %v2398_v16 = vld [vmem:[%s3477_s1 + $0x228] sm:$0xff]  ;;  %v588_v5 = vpack.c.b16 %v2872_v34, %v2645_v17  ;;  %v2397_v17 = vld [vmem:[%s3477_s1 + $0x220] sm:$0xff] }
  0x4c   :  { %775 = vmatmul.bf16.vlgmr.msrb.gmra.mxu2 %v586_v27  ;;  %v202_v36 = vor.u32 %v200_v38, %v199_v9  ;;  %v2374_v9 = vld [vmem:[%s3477_s1 + $0x1e8] sm:$0xff]  ;;  %v3069_v34 = vpack.c.b16 %v2563_v20, %v2944_v15  ;;  %v2388_v15 = vld [vmem:[%s3477_s1 + $0x158] sm:$0xff]  ;;  %v3090_v20 = vpack.c.b16 %v2780_v58, %v2565_v22  ;;  %v2387_v22 = vld [vmem:[%s3477_s1 + $0x150] sm:$0xff] }
  0x4d   :  { %548 = vmatmul.bf16.gmra.mxu0 %v472_v48  ;;  %1195 = vmatpush.bf16.msra.mxu1 %v2374_v9  ;;  %v999_v9 = vpack.c.b16 %v2583_v35, %v2581_v33 }
  0x4e   :  { %v203_v1 = vsel %vm2606_vm3, %v1896_v11, %v202_v36  ;;  %v995_v11 = vpack.c.b16 %v2701_v3, %v2697_v0  ;;  %1729 = vmatpush.bf16.msra.mxu0 %v2398_v16  ;;  %v3048_v0 = vpack.c.b16 %v2935_v10, %v2701_v3  ;;  %v2381_v36 = vld [vmem:[%s3477_s1 + $0xa0] sm:$0xff]  ;;  %v2370_v16 = vld [vmem:[%s3477_s1 + $0x1c8] sm:$0xff] }
  0x4f   :  { %v3025_v48 = vunpack.c.l.b16 %v203_v1  ;;  %1438 = vmatpush.bf16.msra.mxu2 %v2381_v36  ;;  %v2389_v3 = vld [vmem:[%s3477_s1 + $0x160] sm:$0xff]  ;;  %v2372_v1 = vld [vmem:[%s3477_s1 + $0x1d8] sm:$0xff] }
  0x51   :  { %v585_v31 = vpack.c.b16 %v2772_v49, %v3025_v48  ;;  %v2390_v49 = vld [vmem:[%s3477_s1 + $0x168] sm:$0xff]  ;;  %v715_v10 = vpack.c.b16 %v3025_v48, %v2876_v55  ;;  %v2396_v55 = vld [vmem:[%s3477_s1 + $0x218] sm:$0xff] }
  0x52   :  { %1595 = vmatpush.bf16.msra.mxu3 %v2390_v49  ;;  %1730 = vmatpush.bf16.msra.mxu0 %v2397_v17  ;;  %v2378_v49 = vld [vmem:[%s3477_s1 + $0x88] sm:$0xff] }
  0x53   :  { %657 = vmatmul.bf16.vlgmr.msrb.gmra.mxu1 %v585_v31  ;;  %1439 = vmatpush.bf16.msra.mxu2 %v2380_v59  ;;  %v590_v31 = vpack.c.b16 %v2901_v19, %v2662_v26  ;;  %v2395_v26 = vld [vmem:[%s3477_s1 + $0x210] sm:$0xff]  ;;  %v853_v19 = vpack.c.b16 %v2581_v33, %v2985_v56  ;;  %v3131_v33 = vpack.c.b16 %v2805_v25, %v2583_v35  ;;  %v2385_v35 = vld [vmem:[%s3477_s1 + $0x140] sm:$0xff] }
  0x56   :  { %1596 = vmatpush.bf16.msra.mxu3 %v2389_v3  ;;  %1731 = vmatpush.bf16.msra.mxu0 %v2396_v55  ;;  %v3525_v55 = vor.u32 %v2746_v7, %v2744_v6  ;;  %v716_v6 = vpack.c.b16 %v3025_v48, %v2977_v47 }
  0x58   :  { %921 = vmatmul.bf16.vlgmr.msrb.gmra.mxu3 %v849_v44  ;;  %v2379_v44 = vld [vmem:[%s3477_s1 + $0x90] sm:$0xff] }
  0x59   :  { %1440 = vmatpush.bf16.msra.mxu2 %v2379_v44 }
  0x5a   :  { %1597 = vmatpush.bf16.msra.mxu3 %v2388_v15  ;;  %1732 = vmatpush.bf16.msra.mxu0 %v2395_v26 }
  0x5c   :  { %780 = vmatmul.bf16.gmra.mxu2 %v587_v37 }
  0x5d   :  { %1067 = vmatmul.bf16.vlgmr.msrb.gmra.mxu0 %v995_v11  ;;  %v591_v11 = vpack.c.b16 %v2722_v24, %v2904_v63  ;;  %1441 = vmatpush.bf16.msra.mxu2 %v2378_v49  ;;  %v2394_v24 = vld [vmem:[%s3477_s1 + $0x208] sm:$0xff]  ;;  %v592_v63 = vpack.c.b16 %v2974_v50, %v2730_v42  ;;  %v2369_v42 = vld [vmem:[%s3477_s1 + $0x1c0] sm:$0xff] }
  0x5e   :  { %1598 = vmatpush.bf16.msra.mxu3 %v2387_v22  ;;  %1733 = vmatpush.bf16.msra.mxu0 %v2394_v24  ;;  %v1002_v24 = vpack.c.b16 %v2909_v60, %v2907_v28 }
  0x63   :  { %662 = vmatmul.bf16.gmra.mxu1 %v586_v27  ;;  %v2373_v27 = vld [vmem:[%s3477_s1 + $0x1e0] sm:$0xff] }
  0x64   :  { %1196 = vmatpush.bf16.msra.mxu1 %v2373_v27  ;;  %v2393_v27 = vld [vmem:[%s3477_s1 + $0x200] sm:$0xff] }
  0x65   :  { %1734 = vmatpush.bf16.msra.mxu0 %v2393_v27  ;;  %v3528_v27 = vshrl.u32 %v2579_v32, 16 }
  0x68   :  { %926 = vmatmul.bf16.gmra.mxu3 %v3048_v0  ;;  %1197 = vmatpush.bf16.msra.mxu1 %v2372_v1 }
  0x6c   :  { %785 = vmatmul.bf16.gmra.mxu2 %v588_v5  ;;  %1198 = vmatpush.bf16.msra.mxu1 %v2371_v53 }
  0x6d   :  { %1072 = vmatmul.bf16.gmra.mxu0 %v996_v57  ;;  %v2377_v57 = vld [vmem:[%s3477_s1 + $0x80] sm:$0xff] }
  0x6e   :  { %1442 = vmatpush.bf16.msra.mxu2 %v2377_v57 }
  0x70   :  { %1199 = vmatpush.bf16.msra.mxu1 %v2370_v16 }
  0x73   :  { %667 = vmatmul.bf16.gmra.mxu1 %v587_v37  ;;  %v998_v37 = vpack.c.b16 %v2782_v18, %v2780_v58  ;;  %v589_v58 = vpack.c.b16 %v2651_v21, %v3025_v48  ;;  %v2386_v21 = vld [vmem:[%s3477_s1 + $0x148] sm:$0xff] }
  0x74   :  { %1599 = vmatpush.bf16.msra.mxu3 %v2386_v21  ;;  %1200 = vmatpush.bf16.msra.mxu1 %v2369_v42  ;;  %v3527_v42 = vshll.u32 %v2799_v13, 16 }
  0x78   :  { %931 = vmatmul.bf16.gmra.mxu3 %v3069_v34 }
  0x79   :  { %1600 = vmatpush.bf16.msra.mxu3 %v2385_v35 }
  0x7c   :  { %790 = vmatmul.bf16.gmra.mxu2 %v715_v10  ;;  %v3161_v10 = vpack.c.b16 %v2633_v8, %v2814_v52 }
  0x7d   :  { %1077 = vmatmul.bf16.gmra.mxu0 %v997_v54  ;;  %v1262_v54 = vrot.slane %v200_v38, 5 }
  0x83   :  { %672 = vmatmul.bf16.gmra.mxu1 %v588_v5  ;;  %v1000_v5 = vpack.c.b16 %v2814_v52, %v2805_v25  ;;  %v1265_v25 = vshll.u32 %v2987_v62, 16  ;;  %v3522_v62 = vor.u32 %v2742_v2, %v2732_v61  ;;  %v1261_v52 = vrot.slane %v197_v40, 4 }
  0x84   :  { %v1282_v2 = vrot.slane %v1281_v46, 4 }
  0x85   :  { %v3152_v50 = vrot.slane %v1265_v25, 5  ;;  %v1272_v59 = vrot.slane %v3522_v62, 4  ;;  %v1263_v23 = vor.u32 %v1262_v54, %v1261_v52  ;;  %v1300_v25 = vrot.slane %v3527_v42, 5 }
  0x86   :  { %v1294_v62 = vrot.slane %v3528_v27, 4  ;;  %v3529_v54 = vshrl.u32 %v2965_v45, 16 }
  0x87   :  { %v1273_v61 = vsel %vm3170_vm6, %v1272_v59, %v3152_v50  ;;  %v1283_v40 = vsel %vm3170_vm6, %v1282_v2, %v3152_v50 }
  0x88   :  { %936 = vmatmul.bf16.gmra.mxu3 %v3090_v20  ;;  %v3198_v46 = vunpack.c.l.b16 %v1283_v40  ;;  %v1284_v52 = vrot.slane %v3529_v54, 4 }
  0x8c   :  { %795 = vmatmul.bf16.gmra.mxu2 %v590_v31 }
  0x8d   :  { %1082 = vmatmul.bf16.gmra.mxu0 %v998_v37  ;;  %v1357_v37 = vunpack.c.l.b16 %v1273_v61 }
  0x93   :  { %677 = vmatmul.bf16.gmra.mxu1 %v589_v58  ;;  %v1264_v58 = vrot.slane %v1263_v23, 4  ;;  %v3532_v23 = vshrl.u32 %v2575_v29, 16 }
  0x95   :  { %v1268_v8 = vsel %vm3170_vm6, %v1264_v58, %v3152_v50  ;;  %v1289_v58 = vrot.slane %v3532_v23, 4 }
  0x96   :  { %v3214_v49 = vunpack.c.l.b16 %v1268_v8 }
  0x98   :  { %941 = vmatmul.bf16.gmra.mxu3 %v853_v19  ;;  %v1371_v16 = vpack.c.b16 %v1357_v37, %v3214_v49 }
  0x9c   :  { %800 = vmatmul.bf16.gmra.mxu2 %v591_v11 }
  0x9d   :  { %1087 = vmatmul.bf16.gmra.mxu0 %v999_v9 }
  0x9e   :  { %v3138_v36 = vpop.f32.mrf.mxu1 }
  0xa3   :  { %682 = vmatmul.bf16.gmra.mxu1 %v590_v31  ;;  %v1277_v31 = vrot.slane %v3525_v55, 4 }
  0xa4   :  { %v3143_v3 = vpop.f32.mrf.mxu2 }
  0xa5   :  { %v1278_v41 = vsel %vm3170_vm6, %v1277_v31, %v3152_v50 }
  0xa6   :  { %v3157_v17 = vpop.f32.mrf.mxu1  ;;  %v1358_v7 = vunpack.c.l.b16 %v1278_v41 }
  0xa7   :  { %v3185_v38 = vpop.f32.mrf.mxu3 }
  0xa8   :  { %946 = vmatmul.bf16.gmra.mxu3 %v3131_v33  ;;  %v1529_v22 = vpack.c.b16 %v1358_v7, %v1357_v37  ;;  %v1372_v53 = vpack.c.b16 %v3198_v46, %v1358_v7  ;;  %v3531_v37 = vshrl.u32 %v2799_v13, 16 }
  0xa9   :  { %v544_v44 = vpop.f32.mrf.mxu0 }
  0xaa   :  { %v1299_v41 = vrot.slane %v3531_v37, 4  ;;  %v3535_v37 = vshrl.u32 %v2803_v30, 16 }
  0xac   :  { %805 = vmatmul.bf16.gmra.mxu2 %v592_v63  ;;  %v3168_v15 = vpop.f32.mrf.mxu2  ;;  %v1301_v40 = vor.u32 %v1300_v25, %v1299_v41  ;;  %v1500_v41 = vrot.slane %v3535_v37, 4  ;;  %v3539_v37 = vshrl.u32 %v2602_v51, 16 }
  0xad   :  { %1092 = vmatmul.bf16.gmra.mxu0 %v1000_v5 }
  0xae   :  { %v1302_v13 = vrot.slane %v1301_v40, 4 }
  0xaf   :  { %v3205_v19 = vpop.f32.mrf.mxu3 }
  0xb1   :  { %v546_v48 = vpop.f32.mrf.mxu0 }
  0xb3   :  { %687 = vmatmul.bf16.gmra.mxu1 %v591_v11  ;;  %v3212_v11 = vpack.c.b16 %v2907_v28, %v2638_v12  ;;  %v3526_v12 = vshll.u32 %v2579_v32, 16  ;;  %v3530_v28 = vshll.u32 %v2965_v45, 16  ;;  %v3533_v45 = vshll.u32 %v2575_v29, 16 }
  0xb5   :  { %v3201_v26 = vpop.f32.mrf.mxu1  ;;  %v1285_v55 = vrot.slane %v3530_v28, 5  ;;  %v1290_v8 = vrot.slane %v3533_v45, 5 }
  0xb7   :  { %v1291_v25 = vor.u32 %v1290_v8, %v1289_v58 }
  0xb8   :  { %951 = vmatmul.bf16.gmra.mxu3 %v3161_v10 }
  0xbc   :  { %810 = vmatmul.bf16.gmra.mxu2 %v716_v6 }
  0xbd   :  { %1097 = vmatmul.bf16.gmra.mxu0 %v1001_v39  ;;  %v3216_v9 = vpop.f32.mrf.mxu1  ;;  %v1286_v39 = vor.u32 %v1285_v55, %v1284_v52  ;;  %v3534_v52 = vshll.u32 %v2803_v30, 16  ;;  %v1292_v55 = vrot.slane %v1291_v25, 4 }
  0xbf   :  { %v3203_v47 = vpop.f32.mrf.mxu2  ;;  %v1501_v28 = vrot.slane %v3534_v52, 5 }
  0xc3   :  { %692 = vmatmul.bf16.gmra.mxu1 %v592_v63  ;;  %v1295_v63 = vrot.slane %v3526_v12, 5  ;;  %v1287_v12 = vrot.slane %v1286_v39, 4  ;;  %v1502_v39 = vor.u32 %v1501_v28, %v1500_v41  ;;  %v3540_v41 = vshll.u32 %v2828_v14, 16 }
  0xc5   :  { %v1296_v2 = vor.u32 %v1295_v63, %v1294_v62  ;;  %v1288_v54 = vsel %vm3170_vm6, %v1287_v12, %v3152_v50 }
  0xc7   :  { %v3218_v21 = vpop.f32.mrf.mxu2  ;;  %v1297_v32 = vrot.slane %v1296_v2, 4  ;;  %v1360_v2 = vunpack.c.l.b16 %v1288_v54  ;;  %v3537_v54 = vshll.u32 %v2602_v51, 16 }
  0xc8   :  { %956 = vmatmul.bf16.gmra.mxu3 %v3212_v11 }
  0xc9   :  { %v1530_v45 = vpack.c.b16 %v1360_v2, %v3198_v46  ;;  %v1310_v52 = vrot.slane %v3537_v54, 5 }
  0xca   :  { %v549_v5 = vpop.f32.mrf.mxu0 }
  0xcb   :  { %v3224_v57 = vpop.f32.mrf.mxu3 }
  0xcc   :  { %1443 = vmatmul.bf16.vlgmr.msra.gmra.mxu2 %v1371_v16 }
  0xcd   :  { %1102 = vmatmul.bf16.gmra.mxu0 %v1002_v24 }
  0xcf   :  { %v776_v35 = vpop.f32.mrf.mxu2 }
  0xd0   :  { %v658_v59 = vpop.f32.mrf.mxu1 }
  0xd1   :  { %v659_v61 = vadd.f32 %v658_v59, %v544_v44  ;;  %v1298_v44 = vsel %vm3170_vm6, %v1297_v32, %v3152_v50 }
  0xd2   :  { %v551_v31 = vpop.f32.mrf.mxu0  ;;  %v3251_v63 = vunpack.c.l.b16 %v1298_v44  ;;  %v1503_v44 = vrot.slane %v1502_v39, 4 }
  0xd3   :  { %v3238_v6 = vpop.f32.mrf.mxu3  ;;  %1201 = vmatmul.bf16.vlgmr.msra.gmra.mxu1 %v3048_v0  ;;  %v816_v7 = vadd.f32 %v776_v35, %v659_v61  ;;  %v1303_v0 = vsel %vm3170_vm6, %v1302_v13, %v3152_v50 }
  0xd4   :  { %v3253_v35 = vunpack.c.l.b16 %v1303_v0  ;;  %v1504_v30 = vsel %vm3170_vm6, %v1503_v44, %v3152_v50 }
  0xd5   :  { %v3278_v0 = vunpack.c.l.b16 %v1504_v30 }
  0xd6   :  { %v3257_v62 = vpack.c.b16 %v3253_v35, %v3251_v63 }
  0xd7   :  { %v778_v16 = vpop.f32.mrf.mxu2 }
  0xd8   :  { %1601 = vmatmul.bf16.vlgmr.msra.gmra.mxu3 %v1529_v22  ;;  %v660_v24 = vpop.f32.mrf.mxu1 }
  0xd9   :  { %v661_v29 = vadd.f32 %v660_v24, %v546_v48 }
  0xda   :  { %v1068_v42 = vpop.f32.mrf.mxu0 }
  0xdb   :  { %v922_v27 = vpop.f32.mrf.mxu3  ;;  %v817_v22 = vadd.f32 %v778_v16, %v661_v29 }
  0xdc   :  { %v962_v59 = vadd.f32 %v922_v27, %v816_v7  ;;  %1448 = vmatmul.bf16.gmra.mxu2 %v1372_v53 }
  0xdd   :  { %1735 = vmatmul.bf16.vlgmr.msra.gmra.mxu0 %v1372_v53  ;;  %v1293_v53 = vsel %vm3170_vm6, %v1292_v55, %v3152_v50 }
  0xde   :  { %v3264_v61 = vadd.f32 %v1068_v42, %v962_v59  ;;  %v1361_v13 = vunpack.c.l.b16 %v1293_v53  ;;  %v3536_v59 = vshll.u32 %v2591_v43, 16 }
  0xdf   :  { %v781_v48 = vpop.f32.mrf.mxu2 }
  0xe0   :  { %v663_v32 = vpop.f32.mrf.mxu1  ;;  %v1373_v24 = vpack.c.b16 %v1361_v13, %v1360_v2  ;;  %v1531_v44 = vpack.c.b16 %v3251_v63, %v1361_v13 }
  0xe1   :  { %v664_v40 = vadd.f32 %v663_v32, %v549_v5  ;;  %v1315_v32 = vrot.slane %v3540_v41, 5 }
  0xe2   :  { %v1070_v7 = vpop.f32.mrf.mxu0 }
  0xe3   :  { %v924_v23 = vpop.f32.mrf.mxu3  ;;  %1206 = vmatmul.bf16.gmra.mxu1 %v3069_v34  ;;  %v818_v8 = vadd.f32 %v781_v48, %v664_v40  ;;  %v1532_v34 = vpack.c.b16 %v3278_v0, %v3253_v35  ;;  %v3538_v48 = vshrl.u32 %v2591_v43, 16 }
  0xe4   :  { %v963_v58 = vadd.f32 %v924_v23, %v817_v22  ;;  %v1305_v22 = vrot.slane %v3536_v59, 5 }
  0xe5   :  { %v1304_v2 = vrot.slane %v3538_v48, 4 }
  0xe6   :  { %v3276_v16 = vadd.f32 %v1070_v7, %v963_v58  ;;  %v3541_v58 = vshrl.u32 %v2828_v14, 16 }
  0xe7   :  { %v783_v5 = vpop.f32.mrf.mxu2  ;;  %v1306_v39 = vor.u32 %v1305_v22, %v1304_v2  ;;  %v3542_v2 = vld [vmem:[#allocation4_spill] sm:$0xff] }
  0xe8   :  { %1606 = vmatmul.bf16.gmra.mxu3 %v1530_v45  ;;  %v665_v12 = vpop.f32.mrf.mxu1  ;;  %v1314_v45 = vrot.slane %v3541_v58, 4 }
  0xe9   :  { %v666_v46 = vadd.f32 %v665_v12, %v551_v31  ;;  %v1309_v31 = vrot.slane %v3539_v37, 4  ;;  %v1307_v30 = vrot.slane %v1306_v39, 4  ;;  %v3543_v37 = vshll.u32 %v3542_v2, 16 }
  0xea   :  { %v1073_v42 = vpop.f32.mrf.mxu0  ;;  %v3546_v39 = vshrl.u32 %v3542_v2, 16 }
  0xeb   :  { %v927_v29 = vpop.f32.mrf.mxu3  ;;  %v819_v27 = vadd.f32 %v783_v5, %v666_v46  ;;  %v1311_v23 = vor.u32 %v1310_v52, %v1309_v31  ;;  %v1308_v12 = vsel %vm3170_vm6, %v1307_v30, %v3152_v50  ;;  %v1320_v31 = vrot.slane %v3543_v37, 5 }
  0xec   :  { %v964_v25 = vadd.f32 %v927_v29, %v818_v8  ;;  %1453 = vmatmul.bf16.gmra.mxu2 %v1373_v24  ;;  %v3307_v46 = vunpack.c.l.b16 %v1308_v12 }
  0xed   :  { %1740 = vmatmul.bf16.gmra.mxu0 %v1373_v24  ;;  %v1312_v5 = vrot.slane %v1311_v23, 4  ;;  %v1316_v24 = vor.u32 %v1315_v32, %v1314_v45  ;;  %v1319_v23 = vrot.slane %v3546_v39, 4 }
  0xee   :  { %v3286_v28 = vadd.f32 %v1073_v42, %v964_v25 }
  0xef   :  { %v786_v55 = vpop.f32.mrf.mxu2 }
  0xf0   :  { %v668_v7 = vpop.f32.mrf.mxu1 }
  0xf1   :  { %v669_v53 = vadd.f32 %v668_v7, %v3138_v36  ;;  %v1313_v36 = vsel %vm3170_vm6, %v1312_v5, %v3152_v50 }
  0xf2   :  { %v1075_v40 = vpop.f32.mrf.mxu0  ;;  %v3309_v63 = vunpack.c.l.b16 %v1313_v36 }
  0xf3   :  { %v929_v8 = vpop.f32.mrf.mxu3  ;;  %1211 = vmatmul.bf16.gmra.mxu1 %v3090_v20  ;;  %v820_v51 = vadd.f32 %v786_v55, %v669_v53  ;;  %v1317_v20 = vrot.slane %v1316_v24, 4  ;;  %v1141_v53 = vpack.c.b16 %v2985_v56, %v2782_v18 }
  0xf4   :  { %v965_v43 = vadd.f32 %v929_v8, %v819_v27  ;;  %v1533_v29 = vpack.c.b16 %v3309_v63, %v3307_v46 }
  0xf5   :  { %v1318_v25 = vsel %vm3170_vm6, %v1317_v20, %v3152_v50 }
  0xf6   :  { %v3305_v14 = vadd.f32 %v1075_v40, %v965_v43  ;;  %v3317_v22 = vunpack.c.l.b16 %v1318_v25 }
  0xf7   :  { %v788_v42 = vpop.f32.mrf.mxu2 }
  0xf8   :  { %1611 = vmatmul.bf16.gmra.mxu3 %v1531_v44  ;;  %v670_v13 = vpop.f32.mrf.mxu1  ;;  %v3322_v48 = vpack.c.b16 %v3317_v22, %v3309_v63 }
  0xf9   :  { %v671_v59 = vadd.f32 %v670_v13, %v3157_v17  ;;  %v3544_v17 = vld [vmem:[#allocation2_spill] sm:$0xff] }
  0xfa   :  { %v1078_v27 = vpop.f32.mrf.mxu0  ;;  %v3545_v7 = vshll.u32 %v3544_v17, 16  ;;  %v3547_v44 = vshrl.u32 %v3544_v17, 16 }
  0xfb   :  { %v932_v54 = vpop.f32.mrf.mxu3  ;;  %v821_v55 = vadd.f32 %v788_v42, %v671_v59 }
  0xfc   :  { %v966_v52 = vadd.f32 %v932_v54, %v820_v51  ;;  %1458 = vmatmul.bf16.gmra.mxu2 %v3257_v62  ;;  %v1325_v40 = vrot.slane %v3545_v7, 5  ;;  %v1324_v43 = vrot.slane %v3547_v44, 4 }
  0xfd   :  { %1745 = vmatmul.bf16.gmra.mxu0 %v3257_v62  ;;  %v1321_v62 = vor.u32 %v1320_v31, %v1319_v23 }
  0xfe   :  { %v3327_v41 = vadd.f32 %v1078_v27, %v966_v52  ;;  %v1326_v12 = vor.u32 %v1325_v40, %v1324_v43  ;;  %v1675_v27 = vpack.c.b16 %v3214_v49, %v3278_v0  ;;  %v3550_v40 = vshll.u32 %v2922_v4, 16 }
  0xff   :  { %v791_v32 = vpop.f32.mrf.mxu2  ;;  %v1322_v24 = vrot.slane %v1321_v62, 4  ;;  %v3552_v62 = vshrl.u32 %v2922_v4, 16 }
 0x100   :  { %v673_v58 = vpop.f32.mrf.mxu1  ;;  %v1327_v36 = vrot.slane %v1326_v12, 4 }
 0x101   :  { %v674_v8 = vadd.f32 %v673_v58, %v3201_v26  ;;  %v1323_v18 = vsel %vm3170_vm6, %v1322_v24, %v3152_v50  ;;  %v1375_v26 = vpack.c.b16 %v3307_v46, %v3214_v49  ;;  %v1334_v44 = vrot.slane %v3552_v62, 4  ;;  %v3553_v46 = vld [vmem:[#allocation5_spill] sm:$0xff] }
 0x102   :  { %v1080_v45 = vpop.f32.mrf.mxu0  ;;  %v3343_v13 = vunpack.c.l.b16 %v1323_v18  ;;  %v1328_v25 = vsel %vm3170_vm6, %v1327_v36, %v3152_v50  ;;  %v3554_v63 = vshll.u32 %v3553_v46, 16 }
 0x103   :  { %v934_v51 = vpop.f32.mrf.mxu3  ;;  %1216 = vmatmul.bf16.gmra.mxu1 %v1141_v53  ;;  %v822_v5 = vadd.f32 %v791_v32, %v674_v8  ;;  %v3357_v52 = vunpack.c.l.b16 %v1328_v25  ;;  %v3548_v32 = vld [vmem:[#allocation3_spill] sm:$0xff]  ;;  %v1335_v53 = vrot.slane %v3550_v40, 5 }
 0x104   :  { %v967_v30 = vadd.f32 %v934_v51, %v821_v55  ;;  %v1534_v54 = vpack.c.b16 %v3343_v13, %v3317_v22  ;;  %v3549_v0 = vshll.u32 %v3548_v32, 16 }
 0x105   :  { %v3362_v2 = vpack.c.b16 %v3357_v52, %v3343_v13  ;;  %v1336_v24 = vor.u32 %v1335_v53, %v1334_v44 }
 0x106   :  { %v3341_v42 = vadd.f32 %v1080_v45, %v967_v30  ;;  %v1330_v17 = vrot.slane %v3549_v0, 5 }
 0x107   :  { %v793_v20 = vpop.f32.mrf.mxu2  ;;  %v1337_v18 = vrot.slane %v1336_v24, 4 }
 0x108   :  { %1616 = vmatmul.bf16.gmra.mxu3 %v1532_v34  ;;  %v675_v59 = vpop.f32.mrf.mxu1 }
 0x109   :  { %v676_v35 = vadd.f32 %v675_v59, %v3216_v9  ;;  %v3551_v9 = vshrl.u32 %v3548_v32, 16  ;;  %v1338_v4 = vsel %vm3170_vm6, %v1337_v18, %v3152_v50 }
 0x10a   :  { %v1083_v55 = vpop.f32.mrf.mxu0 }
 0x10b   :  { %v937_v34 = vpop.f32.mrf.mxu3  ;;  %v823_v31 = vadd.f32 %v793_v20, %v676_v35  ;;  %v1329_v39 = vrot.slane %v3551_v9, 4 }
 0x10c   :  { %v968_v37 = vadd.f32 %v937_v34, %v822_v5  ;;  %1463 = vmatmul.bf16.gmra.mxu2 %v1375_v26  ;;  %v3388_v26 = vunpack.c.l.b16 %v1338_v4 }
 0x10d   :  { %1750 = vmatmul.bf16.gmra.mxu0 %v1675_v27  ;;  %v1331_v8 = vor.u32 %v1330_v17, %v1329_v39 }
 0x10e   :  { %v3366_v7 = vadd.f32 %v1083_v55, %v968_v37 }
 0x10f   :  { %v796_v22 = vpop.f32.mrf.mxu2  ;;  %v1332_v5 = vrot.slane %v1331_v8, 4 }
 0x110   :  { %v678_v23 = vpop.f32.mrf.mxu1 }
 0x111   :  { %v679_v45 = vadd.f32 %v678_v23, %v3143_v3  ;;  %v1333_v12 = vsel %vm3170_vm6, %v1332_v5, %v3152_v50 }
 0x112   :  { %v1085_v58 = vpop.f32.mrf.mxu0  ;;  %v1369_v3 = vunpack.c.l.b16 %v1333_v12 }
 0x113   :  { %v939_v43 = vpop.f32.mrf.mxu3  ;;  %1221 = vmatmul.bf16.gmra.mxu1 %v3131_v33  ;;  %v824_v30 = vadd.f32 %v796_v22, %v679_v45 }
 0x114   :  { %v969_v51 = vadd.f32 %v939_v43, %v823_v31  ;;  %v1535_v13 = vpack.c.b16 %v1369_v3, %v3357_v52  ;;  %v1378_v55 = vpack.c.b16 %v3388_v26, %v1369_v3  ;;  %v3555_v31 = vshrl.u32 %v3553_v46, 16 }
 0x116   :  { %v3379_v36 = vadd.f32 %v1085_v58, %v969_v51  ;;  %v1505_v32 = vrot.slane %v3555_v31, 4 }
 0x117   :  { %v798_v20 = vpop.f32.mrf.mxu2 }
 0x118   :  { %1621 = vmatmul.bf16.gmra.mxu3 %v1533_v29  ;;  %v680_v33 = vpop.f32.mrf.mxu1  ;;  %v1506_v29 = vrot.slane %v3554_v63, 5 }
 0x119   :  { %v681_v27 = vadd.f32 %v680_v33, %v3168_v15 }
 0x11a   :  { %v1088_v25 = vpop.f32.mrf.mxu0  ;;  %v1507_v22 = vor.u32 %v1506_v29, %v1505_v32 }
 0x11b   :  { %v942_v59 = vpop.f32.mrf.mxu3  ;;  %v825_v34 = vadd.f32 %v798_v20, %v681_v27 }
 0x11c   :  { %v970_v35 = vadd.f32 %v942_v59, %v824_v30  ;;  %1468 = vmatmul.bf16.gmra.mxu2 %v3322_v48 }
 0x11d   :  { %1755 = vmatmul.bf16.gmra.mxu0 %v3322_v48  ;;  %v1508_v48 = vrot.slane %v1507_v22, 4 }
 0x11e   :  { %v3396_v37 = vadd.f32 %v1088_v25, %v970_v35 }
 0x11f   :  { %v801_v52 = vpop.f32.mrf.mxu2  ;;  %v1509_v39 = vsel %vm3170_vm6, %v1508_v48, %v3152_v50 }
 0x120   :  { %v683_v0 = vpop.f32.mrf.mxu1  ;;  %v1528_v45 = vunpack.c.l.b16 %v1509_v39 }
 0x121   :  { %v684_v17 = vadd.f32 %v683_v0, %v3203_v47 }
 0x122   :  { %v1090_v15 = vpop.f32.mrf.mxu0  ;;  %v1536_v62 = vpack.c.b16 %v1528_v45, %v3388_v26 }
 0x123   :  { %v944_v40 = vpop.f32.mrf.mxu3  ;;  %1226 = vmatmul.bf16.gmra.mxu1 %v3161_v10  ;;  %v826_v9 = vadd.f32 %v801_v52, %v684_v17 }
 0x124   :  { %v971_v53 = vadd.f32 %v944_v40, %v825_v34 }
 0x126   :  { %v3405_v23 = vadd.f32 %v1090_v15, %v971_v53 }
 0x127   :  { %v803_v58 = vpop.f32.mrf.mxu2 }
 0x128   :  { %1626 = vmatmul.bf16.gmra.mxu3 %v1534_v54  ;;  %v685_v8 = vpop.f32.mrf.mxu1 }
 0x129   :  { %v686_v44 = vadd.f32 %v685_v8, %v3218_v21 }
 0x12a   :  { %v1093_v47 = vpop.f32.mrf.mxu0 }
 0x12b   :  { %v947_v43 = vpop.f32.mrf.mxu3  ;;  %v827_v10 = vadd.f32 %v803_v58, %v686_v44 }
 0x12c   :  { %v972_v51 = vadd.f32 %v947_v43, %v826_v9  ;;  %1473 = vmatmul.bf16.gmra.mxu2 %v3362_v2 }
 0x12d   :  { %1760 = vmatmul.bf16.gmra.mxu0 %v3362_v2 }
 0x12e   :  { %v3411_v1 = vadd.f32 %v1093_v47, %v972_v51 }
 0x12f   :  { %v806_v50 = vpop.f32.mrf.mxu2 }
 0x130   :  { %v688_v30 = vpop.f32.mrf.mxu1 }
 0x131   :  { %v689_v54 = vadd.f32 %v688_v30, %v3185_v38 }
 0x132   :  { %v1095_v5 = vpop.f32.mrf.mxu0 }
 0x133   :  { %v949_v24 = vpop.f32.mrf.mxu3  ;;  %1231 = vmatmul.bf16.gmra.mxu1 %v3212_v11  ;;  %v828_v18 = vadd.f32 %v806_v50, %v689_v54  ;;  %v1142_v11 = vpack.c.b16 %v2985_v56, %v2909_v60 }
 0x134   :  { %v973_v12 = vadd.f32 %v949_v24, %v827_v10 }
 0x136   :  { %v3415_v21 = vadd.f32 %v1095_v5, %v973_v12 }
 0x137   :  { %v808_v20 = vpop.f32.mrf.mxu2 }
 0x138   :  { %1631 = vmatmul.bf16.gmra.mxu3 %v1535_v13  ;;  %v690_v3 = vpop.f32.mrf.mxu1 }
 0x139   :  { %v691_v2 = vadd.f32 %v690_v3, %v3205_v19 }
 0x13a   :  { %v1098_v4 = vpop.f32.mrf.mxu0 }
 0x13b   :  { %v952_v33 = vpop.f32.mrf.mxu3  ;;  %v829_v25 = vadd.f32 %v808_v20, %v691_v2 }
 0x13c   :  { %v974_v26 = vadd.f32 %v952_v33, %v828_v18  ;;  %1478 = vmatmul.bf16.gmra.mxu2 %v1378_v55 }
 0x13d   :  { %1765 = vmatmul.bf16.gmra.mxu0 %v1378_v55  ;;  %v1676_v55 = vpack.c.b16 %v3214_v49, %v1528_v45 }
 0x13e   :  { %v3418_v27 = vadd.f32 %v1098_v4, %v974_v26 }
 0x13f   :  { %v811_v38 = vpop.f32.mrf.mxu2 }
 0x140   :  { %v693_v59 = vpop.f32.mrf.mxu1 }
 0x141   :  { %v694_v34 = vadd.f32 %v693_v59, %v3224_v57 }
 0x142   :  { %v1100_v35 = vpop.f32.mrf.mxu0 }
 0x143   :  { %v954_v13 = vpop.f32.mrf.mxu3  ;;  %1236 = vmatmul.bf16.gmra.mxu1 %v1142_v11  ;;  %v830_v63 = vadd.f32 %v811_v38, %v694_v34 }
 0x144   :  { %v975_v46 = vadd.f32 %v954_v13, %v829_v25 }
 0x146   :  { %v3423_v19 = vadd.f32 %v1100_v35, %v975_v46 }
 0x147   :  { %v813_v29 = vpop.f32.mrf.mxu2 }
 0x148   :  { %1636 = vmatmul.bf16.gmra.mxu3 %v1536_v62  ;;  %v695_v52 = vpop.f32.mrf.mxu1 }
 0x149   :  { %v696_v32 = vadd.f32 %v695_v52, %v3238_v6 }
 0x14a   :  { %v1103_v31 = vpop.f32.mrf.mxu0 }
 0x14b   :  { %v957_v0 = vpop.f32.mrf.mxu3  ;;  %v831_v56 = vadd.f32 %v813_v29, %v696_v32 }
 0x14c   :  { %v976_v60 = vadd.f32 %v957_v0, %v830_v63 }
 0x14d   :  { %1770 = vmatmul.bf16.gmra.mxu0 %v1676_v55 }
 0x14e   :  { %v3427_v15 = vadd.f32 %v1103_v31, %v976_v60 }
 0x14f   :  { %v1444_v57 = vpop.f32.mrf.mxu2 }
 0x150   :  { %v1202_v17 = vpop.f32.mrf.mxu1 }
 0x151   :  { %v1242_v49 = vadd.f32 %v1202_v17, %v3264_v61 }
 0x152   :  { %v1105_v22 = vpop.f32.mrf.mxu0 }
 0x153   :  { %v959_v40 = vpop.f32.mrf.mxu3  ;;  %v1484_v45 = vadd.f32 %v1444_v57, %v1242_v49 }
 0x154   :  { %v977_v53 = vadd.f32 %v959_v40, %v831_v56 }
 0x156   :  { %v3429_v9 = vadd.f32 %v1105_v22, %v977_v53 }
 0x157   :  { %v1446_v48 = vpop.f32.mrf.mxu2 }
 0x158   :  { %v1204_v39 = vpop.f32.mrf.mxu1 }
 0x159   :  { %v1243_v8 = vadd.f32 %v1204_v39, %v3276_v16 }
 0x15a   :  { %v1736_v58 = vpop.f32.mrf.mxu0 }
 0x15b   :  { %v1602_v6 = vpop.f32.mrf.mxu3  ;;  %v1485_v44 = vadd.f32 %v1446_v48, %v1243_v8 }
 0x15c   :  { %v1642_v62 = vadd.f32 %v1602_v6, %v1484_v45 }
 0x15e   :  { %v1776_v10 = vadd.f32 %v1736_v58, %v1642_v62 }
 0x15f   :  { %v1449_v47 = vpop.f32.mrf.mxu2 }
 0x160   :  { %v1207_v43 = vpop.f32.mrf.mxu1  ;;  %v1846_v24 = vmul.f32 %v1776_v10, %v1776_v10 }
 0x161   :  { %v1244_v54 = vadd.f32 %v1207_v43, %v3286_v28 }
 0x162   :  { %v1738_v51 = vpop.f32.mrf.mxu0 }
 0x163   :  { %v1604_v50 = vpop.f32.mrf.mxu3  ;;  %v1486_v3 = vadd.f32 %v1449_v47, %v1244_v54 }
 0x164   :  { %v1643_v30 = vadd.f32 %v1604_v50, %v1485_v44 }
 0x166   :  { %v1777_v5 = vadd.f32 %v1738_v51, %v1643_v30 }
 0x167   :  { %v1451_v12 = vpop.f32.mrf.mxu2 }
 0x168   :  { %v2436_v61 = vpack.c.bf16 %v1777_v5, %v1776_v10  ;;  %v1824_v18 = vadd.f32 %v1777_v5, %v1776_v10  ;;  %v1847_v20 = vmul.f32 %v1777_v5, %v1777_v5  ;;  %v1209_v4 = vpop.f32.mrf.mxu1 }
 0x169   :  { %v1245_v38 = vadd.f32 %v1209_v4, %v3305_v14 }
 0x16a   :  { %2437 = vst [vmem:[%s3479_s2] sm:$0xff] %v2436_v61   ;;  %v1862_v16 = vadd.f32 %v1847_v20, %v1846_v24  ;;  %v1741_v2 = vpop.f32.mrf.mxu0 }
 0x16b   :  { %v1607_v33 = vpop.f32.mrf.mxu3  ;;  %v1487_v35 = vadd.f32 %v1451_v12, %v1245_v38 }
 0x16c   :  { %v1644_v26 = vadd.f32 %v1607_v33, %v1486_v3 }
 0x16e   :  { %v1778_v25 = vadd.f32 %v1741_v2, %v1644_v26 }
 0x16f   :  { %v1454_v11 = vpop.f32.mrf.mxu2 }
 0x170   :  { %v1825_v28 = vadd.f32 %v1824_v18, %v1778_v25  ;;  %v1848_v59 = vmul.f32 %v1778_v25, %v1778_v25  ;;  %v1212_v34 = vpop.f32.mrf.mxu1 }
 0x171   :  { %v1246_v52 = vadd.f32 %v1212_v34, %v3327_v41 }
 0x172   :  { %v1863_v13 = vadd.f32 %v1862_v16, %v1848_v59  ;;  %v1743_v46 = vpop.f32.mrf.mxu0 }
 0x173   :  { %v1609_v63 = vpop.f32.mrf.mxu3  ;;  %v1488_v56 = vadd.f32 %v1454_v11, %v1246_v52 }
 0x174   :  { %v1645_v29 = vadd.f32 %v1609_v63, %v1487_v35 }
 0x176   :  { %v1779_v55 = vadd.f32 %v1743_v46, %v1645_v29 }
 0x177   :  { %v1456_v31 = vpop.f32.mrf.mxu2 }
 0x178   :  { %v2441_v32 = vpack.c.bf16 %v1779_v55, %v1778_v25  ;;  %v1826_v0 = vadd.f32 %v1825_v28, %v1779_v55  ;;  %v1849_v60 = vmul.f32 %v1779_v55, %v1779_v55  ;;  %v1214_v57 = vpop.f32.mrf.mxu1 }
 0x179   :  { %v1247_v48 = vadd.f32 %v1214_v57, %v3341_v42 }
 0x17a   :  { %2480 = vst [vmem:[%s3479_s2 + $0x8] sm:$0xff] %v2441_v32   ;;  %v1864_v14 = vadd.f32 %v1863_v13, %v1849_v60  ;;  %v1746_v17 = vpop.f32.mrf.mxu0 }
 0x17b   :  { %v1612_v22 = vpop.f32.mrf.mxu3  ;;  %v1489_v58 = vadd.f32 %v1456_v31, %v1247_v48 }
 0x17c   :  { %v1646_v40 = vadd.f32 %v1612_v22, %v1488_v56 }
 0x17e   :  { %v1780_v53 = vadd.f32 %v1746_v17, %v1646_v40 }
 0x17f   :  { %v1459_v49 = vpop.f32.mrf.mxu2 }
 0x180   :  { %v1827_v39 = vadd.f32 %v1826_v0, %v1780_v53  ;;  %v1850_v41 = vmul.f32 %v1780_v53, %v1780_v53  ;;  %v1217_v45 = vpop.f32.mrf.mxu1 }
 0x181   :  { %v1248_v43 = vadd.f32 %v1217_v45, %v3366_v7 }
 0x182   :  { %v1865_v6 = vadd.f32 %v1864_v14, %v1850_v41  ;;  %v1748_v8 = vpop.f32.mrf.mxu0 }
 0x183   :  { %v1614_v62 = vpop.f32.mrf.mxu3  ;;  %v1490_v5 = vadd.f32 %v1459_v49, %v1248_v43 }
 0x184   :  { %v1647_v47 = vadd.f32 %v1614_v62, %v1489_v58 }
 0x186   :  { %v1781_v44 = vadd.f32 %v1748_v8, %v1647_v47 }
 0x187   :  { %v1461_v51 = vpop.f32.mrf.mxu2 }
 0x188   :  { %v2446_v10 = vpack.c.bf16 %v1781_v44, %v1780_v53  ;;  %v1828_v50 = vadd.f32 %v1827_v39, %v1781_v44  ;;  %v1851_v30 = vmul.f32 %v1781_v44, %v1781_v44  ;;  %v1219_v54 = vpop.f32.mrf.mxu1 }
 0x189   :  { %v1249_v20 = vadd.f32 %v1219_v54, %v3379_v36 }
 0x18a   :  { %2481 = vst [vmem:[%s3479_s2 + $0x10] sm:$0xff] %v2446_v10   ;;  %v1866_v42 = vadd.f32 %v1865_v6, %v1851_v30  ;;  %v1751_v24 = vpop.f32.mrf.mxu0 }
 0x18b   :  { %v1617_v12 = vpop.f32.mrf.mxu3  ;;  %v1491_v16 = vadd.f32 %v1461_v51, %v1249_v20 }
 0x18c   :  { %v1648_v61 = vadd.f32 %v1617_v12, %v1490_v5 }
 0x18e   :  { %v1782_v18 = vadd.f32 %v1751_v24, %v1648_v61 }
 0x18f   :  { %v1464_v3 = vpop.f32.mrf.mxu2 }
 0x190   :  { %v1829_v4 = vadd.f32 %v1828_v50, %v1782_v18  ;;  %v1852_v7 = vmul.f32 %v1782_v18, %v1782_v18  ;;  %v1222_v2 = vpop.f32.mrf.mxu1 }
 0x191   :  { %v1250_v28 = vadd.f32 %v1222_v2, %v3396_v37 }
 0x192   :  { %v1867_v33 = vadd.f32 %v1866_v42, %v1852_v7  ;;  %v1753_v26 = vpop.f32.mrf.mxu0 }
 0x193   :  { %v1619_v25 = vpop.f32.mrf.mxu3  ;;  %v1492_v46 = vadd.f32 %v1464_v3, %v1250_v28 }
 0x194   :  { %v1649_v38 = vadd.f32 %v1619_v25, %v1491_v16 }
 0x196   :  { %v1783_v11 = vadd.f32 %v1753_v26, %v1649_v38 }
 0x197   :  { %v1466_v59 = vpop.f32.mrf.mxu2 }
 0x198   :  { %v2451_v35 = vpack.c.bf16 %v1783_v11, %v1782_v18  ;;  %v1830_v34 = vadd.f32 %v1829_v4, %v1783_v11  ;;  %v1853_v13 = vmul.f32 %v1783_v11, %v1783_v11  ;;  %v1224_v63 = vpop.f32.mrf.mxu1 }
 0x199   :  { %v1251_v32 = vadd.f32 %v1224_v63, %v3405_v23 }
 0x19a   :  { %2482 = vst [vmem:[%s3479_s2 + $0x18] sm:$0xff] %v2451_v35   ;;  %v1868_v36 = vadd.f32 %v1867_v33, %v1853_v13  ;;  %v1756_v29 = vpop.f32.mrf.mxu0 }
 0x19b   :  { %v1622_v55 = vpop.f32.mrf.mxu3  ;;  %v1493_v56 = vadd.f32 %v1466_v59, %v1251_v32 }
 0x19c   :  { %v1650_v52 = vadd.f32 %v1622_v55, %v1492_v46 }
 0x19e   :  { %v1784_v31 = vadd.f32 %v1756_v29, %v1650_v52 }
 0x19f   :  { %v1469_v0 = vpop.f32.mrf.mxu2 }
 0x1a0   :  { %v1831_v60 = vadd.f32 %v1830_v34, %v1784_v31  ;;  %v1854_v37 = vmul.f32 %v1784_v31, %v1784_v31  ;;  %v1227_v57 = vpop.f32.mrf.mxu1 }
 0x1a1   :  { %v1252_v48 = vadd.f32 %v1227_v57, %v3411_v1 }
 0x1a2   :  { %v1869_v14 = vadd.f32 %v1868_v36, %v1854_v37  ;;  %v1758_v17 = vpop.f32.mrf.mxu0 }
 0x1a3   :  { %v1624_v22 = vpop.f32.mrf.mxu3  ;;  %v1494_v45 = vadd.f32 %v1469_v0, %v1252_v48 }
 0x1a4   :  { %v1651_v40 = vadd.f32 %v1624_v22, %v1493_v56 }
 0x1a6   :  { %v1785_v53 = vadd.f32 %v1758_v17, %v1651_v40 }
 0x1a7   :  { %v1471_v49 = vpop.f32.mrf.mxu2 }
 0x1a8   :  { %v2456_v39 = vpack.c.bf16 %v1785_v53, %v1784_v31  ;;  %v1832_v41 = vadd.f32 %v1831_v60, %v1785_v53  ;;  %v1855_v58 = vmul.f32 %v1785_v53, %v1785_v53  ;;  %v1229_v6 = vpop.f32.mrf.mxu1 }
 0x1a9   :  { %v1253_v43 = vadd.f32 %v1229_v6, %v3415_v21 }
 0x1aa   :  { %2483 = vst [vmem:[%s3479_s2 + $0x20] sm:$0xff] %v2456_v39   ;;  %v1870_v23 = vadd.f32 %v1869_v14, %v1855_v58  ;;  %v1761_v8 = vpop.f32.mrf.mxu0 }
 0x1ab   :  { %v1627_v62 = vpop.f32.mrf.mxu3  ;;  %v1495_v50 = vadd.f32 %v1471_v49, %v1253_v43 }
 0x1ac   :  { %v1652_v47 = vadd.f32 %v1627_v62, %v1494_v45 }
 0x1ae   :  { %v1786_v44 = vadd.f32 %v1761_v8, %v1652_v47 }
 0x1af   :  { %v1474_v51 = vpop.f32.mrf.mxu2 }
 0x1b0   :  { %v1833_v10 = vadd.f32 %v1832_v41, %v1786_v44  ;;  %v1856_v1 = vmul.f32 %v1786_v44, %v1786_v44  ;;  %v1232_v30 = vpop.f32.mrf.mxu1 }
 0x1b1   :  { %v1254_v61 = vadd.f32 %v1232_v30, %v3418_v27 }
 0x1b2   :  { %v1871_v5 = vadd.f32 %v1870_v23, %v1856_v1  ;;  %v1763_v54 = vpop.f32.mrf.mxu0 }
 0x1b3   :  { %v1629_v42 = vpop.f32.mrf.mxu3  ;;  %v1496_v4 = vadd.f32 %v1474_v51, %v1254_v61 }
 0x1b4   :  { %v1653_v24 = vadd.f32 %v1629_v42, %v1495_v50 }
 0x1b6   :  { %v1787_v12 = vadd.f32 %v1763_v54, %v1653_v24 }
 0x1b7   :  { %v1476_v16 = vpop.f32.mrf.mxu2 }
 0x1b8   :  { %v2461_v18 = vpack.c.bf16 %v1787_v12, %v1786_v44  ;;  %v1834_v20 = vadd.f32 %v1833_v10, %v1787_v12  ;;  %v1857_v3 = vmul.f32 %v1787_v12, %v1787_v12  ;;  %v1234_v7 = vpop.f32.mrf.mxu1 }
 0x1b9   :  { %v1255_v38 = vadd.f32 %v1234_v7, %v3423_v19 }
 0x1ba   :  { %2484 = vst [vmem:[%s3479_s2 + $0x28] sm:$0xff] %v2461_v18   ;;  %v1872_v21 = vadd.f32 %v1871_v5, %v1857_v3  ;;  %v1766_v2 = vpop.f32.mrf.mxu0 }
 0x1bb   :  { %v1632_v33 = vpop.f32.mrf.mxu3  ;;  %v1497_v27 = vadd.f32 %v1476_v16, %v1255_v38 }
 0x1bc   :  { %v1654_v26 = vadd.f32 %v1632_v33, %v1496_v4 }
 0x1be   :  { %v1788_v25 = vadd.f32 %v1766_v2, %v1654_v26 }
 0x1bf   :  { %v1479_v46 = vpop.f32.mrf.mxu2 }
 0x1c0   :  { %v1835_v11 = vadd.f32 %v1834_v20, %v1788_v25  ;;  %v1858_v28 = vmul.f32 %v1788_v25, %v1788_v25  ;;  %v1237_v59 = vpop.f32.mrf.mxu1 }
 0x1c1   :  { %v1256_v29 = vadd.f32 %v1237_v59, %v3427_v15 }
 0x1c2   :  { %v1873_v35 = vadd.f32 %v1872_v21, %v1858_v28  ;;  %v1768_v34 = vpop.f32.mrf.mxu0 }
 0x1c3   :  { %v1634_v13 = vpop.f32.mrf.mxu3  ;;  %v1498_v32 = vadd.f32 %v1479_v46, %v1256_v29 }
 0x1c4   :  { %v1655_v63 = vadd.f32 %v1634_v13, %v1497_v27 }
 0x1c6   :  { %v1789_v36 = vadd.f32 %v1768_v34, %v1655_v63 }
 0x1c7   :  { %v1481_v57 = vpop.f32.mrf.mxu2 }
 0x1c8   :  { %v2466_v55 = vpack.c.bf16 %v1789_v36, %v1788_v25  ;;  %v1836_v52 = vadd.f32 %v1835_v11, %v1789_v36  ;;  %v1859_v31 = vmul.f32 %v1789_v36, %v1789_v36  ;;  %v1239_v0 = vpop.f32.mrf.mxu1 }
 0x1c9   :  { %v1257_v17 = vadd.f32 %v1239_v0, %v3429_v9 }
 0x1ca   :  { %2485 = vst [vmem:[%s3479_s2 + $0x30] sm:$0xff] %v2466_v55   ;;  %v1874_v19 = vadd.f32 %v1873_v35, %v1859_v31  ;;  %v1771_v60 = vpop.f32.mrf.mxu0 }
 0x1cb   :  { %v1637_v37 = vpop.f32.mrf.mxu3  ;;  %v1499_v15 = vadd.f32 %v1481_v57, %v1257_v17 }
 0x1cc   :  { %v1656_v56 = vadd.f32 %v1637_v37, %v1498_v32 }
 0x1ce   :  { %v1790_v14 = vadd.f32 %v1771_v60, %v1656_v56 }
 0x1d0   :  { %v1837_v22 = vadd.f32 %v1836_v52, %v1790_v14  ;;  %v1860_v40 = vmul.f32 %v1790_v14, %v1790_v14 }
 0x1d2   :  { %v1875_v53 = vadd.f32 %v1874_v19, %v1860_v40  ;;  %v1773_v39 = vpop.f32.mrf.mxu0 }
 0x1d3   :  { %v1639_v48 = vpop.f32.mrf.mxu3 }
 0x1d4   :  { %v1657_v49 = vadd.f32 %v1639_v48, %v1499_v15 }
 0x1d6   :  { %v1791_v41 = vadd.f32 %v1773_v39, %v1657_v49 }
 0x1d8   :  { %v2471_v58 = vpack.c.bf16 %v1791_v41, %v1790_v14  ;;  %v1838_v45 = vadd.f32 %v1837_v22, %v1791_v41  ;;  %v1861_v6 = vmul.f32 %v1791_v41, %v1791_v41 }
 0x1da   :  { %2486 = vst [vmem:[%s3479_s2 + $0x38] sm:$0xff] %v2471_v58   ;;  %v1839_v23 = vrot.slane %v1838_v45, 4  ;;  %v1876_v8 = vadd.f32 %v1875_v53, %v1861_v6 }
 0x1dc   :  { %v1840_v62 = vadd.f32 %v1839_v23, %v1838_v45  ;;  %v1877_v47 = vrot.slane %v1876_v8, 4 }
 0x1de   :  { %v1841_v9 = vrot.slane %v1840_v62, 2  ;;  %v1878_v44 = vadd.f32 %v1877_v47, %v1876_v8 }
 0x1e0   :  { %v1842_v43 = vadd.f32 %v1841_v9, %v1840_v62  ;;  %v1879_v51 = vrot.slane %v1878_v44, 2 }
 0x1e2   :  { %v1843_v10 = vrot.slane %v1842_v43, 1  ;;  %v1880_v1 = vadd.f32 %v1879_v51, %v1878_v44 }
 0x1e4   :  { %v1844_v50 = vadd.f32 %v1843_v10, %v1842_v43  ;;  %v1881_v30 = vrot.slane %v1880_v1, 1 }
 0x1e6   :  { %1845 = vst [vmem:[%s3480_s3] sm:$0x1] %v1844_v50  ;;  %v1882_v5 = vadd.f32 %v1881_v30, %v1880_v1 }
 0x1e8   :  { %1883 = vst [vmem:[%s3481_s4] sm:$0x1] %v1882_v5 }

// kernel: down_step.4
= control target key start
LH: loop header
LB: loop body
LE: loop exit
PB: predicated region body
PF: predicated region fallthrough
CT: control target
= control target key end

     0   :  { %12 = vsyncpa [#allocation3], 0  ;;  %s2526_s24 = smov [#allocation2]   ;;  %s2527_s26 = smov 64   ;;  %s3306_s0 = inlined_call_operand.vmem [shape: bf16[2,8,8,128], index: 0, kind: input, shape index: {}]   ;;  %s3307_s1 = inlined_call_operand.vmem [shape: f32[1,128], index: 1, kind: input, shape index: {}]   ;;  %s3308_s2 = inlined_call_operand.vmem [shape: f32[1,128], index: 2, kind: input, shape index: {}]   ;;  %s3309_s3 = inlined_call_operand.hbm [shape: bf16[9,128,128], index: 3, kind: input, shape index: {}]   ;;  %s3310_s4 = inlined_call_operand.vmem [shape: bf16[2,8,8,128], index: 4, kind: output, shape index: {0}]   ;;  %s3311_s5 = inlined_call_operand.vmem [shape: f32[1,1,128], index: 5, kind: output, shape index: {1}]   ;;  %s3312_s6 = inlined_call_operand.vmem [shape: f32[1,1,128], index: 6, kind: output, shape index: {2}]  }
   0x1   :  { %s23_s23 = sshll.u32 %s3309_s3, 4  ;;  %s25_s25 = sshll.u32 %s2526_s24, 4  ;;  %s24_s23 = int_to_ptr.hbm [resolvable:$true] %s23_s23  ;;  %s26_s25 = int_to_ptr.vmem [resolvable:$true] %s25_s25 }
   0x2   :  { %s2528_s27 = smov 4  }
   0x3   :  { %31 = dma.hbm_to_vmem [thread:$0]  %s24_s23, 9216, %s26_s25, [#allocation3], %s2527_s26, %s2527_s26, %s2528_s27  }
   0x4   :  { %2524 = dma.done.wait [#allocation3], 9216  }
   0x5   :  { %2525 = vsyncadd [#allocation3], 4294958080  ;;  %v2327_v0 = vld [vmem:[#allocation2 + $0xf8] sm:$0xff]  ;;  %v2326_v1 = vld [vmem:[#allocation2 + $0xf0] sm:$0xff]  ;;  %vm189_vm0 = vcmask 1043456  }
   0x6   :  { %2470 = vmatpush.bf16.msra.mxu1 %v2327_v0  ;;  %2471 = vmatpush.bf16.msra.mxu2 %v2327_v0  ;;  %v2457_v2 = vld [vmem:[%s3306_s0 + $0x10] sm:$0xff]   ;;  %v2574_v3 = vld [vmem:[%s3307_s1] ss:$0 sm:$0xff]  ;;  %v2325_v14 = vld [vmem:[#allocation2 + $0xe8] sm:$0xff]  ;;  %vm298_vm1 = vsmask.f32 256 }
   0x7   :  { %2472 = vmatpush.bf16.msra.mxu3 %v2327_v0  ;;  %645 = vmatpush.bf16.msra.mxu0 %v2327_v0  ;;  %v2394_v4 = vunpack.c.l.bf16 %v2457_v2  ;;  %v2395_v5 = vunpack.c.h.bf16 %v2457_v2  ;;  %v2579_v6 = vld [vmem:[%s3308_s2] ss:$0 sm:$0xff]  ;;  %v2461_v8 = vld [vmem:[%s3306_s0 + $0x30] sm:$0xff]   ;;  %v2323_v47 = vld [vmem:[#allocation2 + $0xd8] sm:$0xff]  ;;  %vm299_vm2 = vsmask.f32 4368 }
   0x8   :  { %v2459_v7 = vld [vmem:[%s3306_s0 + $0x20] sm:$0xff]   ;;  %v2410_v11 = vunpack.c.l.bf16 %v2461_v8  ;;  %v2411_v12 = vunpack.c.h.bf16 %v2461_v8  ;;  %v2609_v52 = vld [vmem:[%s3306_s0 + $0x18] sm:$0xff]   ;;  %v2322_v63 = vld [vmem:[#allocation2 + $0xd0] sm:$0xff]  ;;  %vm1368_vm4 = vsmask.f32 3328 }
   0x9   :  { %v2402_v9 = vunpack.c.l.bf16 %v2459_v7  ;;  %v2403_v10 = vunpack.c.h.bf16 %v2459_v7  ;;  %v2385_v13 = vld [vmem:[%s3306_s0] sm:$0xff]   ;;  %v78_v15 = vmul.f32 %v2574_v3, %v2394_v4  ;;  %v79_v16 = vmul.f32 %v2574_v3, %v2395_v5  ;;  %vm2649_vm3 = vmor %vm298_vm1, %vm299_vm2 }
   0xa   :  { %2473 = vmatpush.bf16.msra.mxu1 %v2326_v1  ;;  %2474 = vmatpush.bf16.msra.mxu2 %v2326_v1  ;;  %v2386_v17 = vunpack.c.l.bf16 %v2385_v13  ;;  %v2387_v18 = vunpack.c.h.bf16 %v2385_v13  ;;  %v86_v21 = vmul.f32 %v2574_v3, %v2410_v11  ;;  %v87_v24 = vmul.f32 %v2574_v3, %v2411_v12  ;;  %v2324_v30 = vld [vmem:[#allocation2 + $0xe0] sm:$0xff] }
   0xb   :  { %2475 = vmatpush.bf16.msra.mxu3 %v2326_v1  ;;  %646 = vmatpush.bf16.msra.mxu0 %v2326_v1  ;;  %v82_v19 = vmul.f32 %v2574_v3, %v2402_v9  ;;  %v83_v20 = vmul.f32 %v2574_v3, %v2403_v10  ;;  %v97_v22 = vadd.f32 %v2579_v6, %v78_v15  ;;  %v2398_v62 = vunpack.c.l.bf16 %v2609_v52 }
   0xc   :  { %v98_v23 = vadd.f32 %v2579_v6, %v79_v16  ;;  %v74_v25 = vmul.f32 %v2574_v3, %v2386_v17  ;;  %v105_v28 = vadd.f32 %v2579_v6, %v86_v21  ;;  %v75_v29 = vmul.f32 %v2574_v3, %v2387_v18  ;;  %v2321_v18 = vld [vmem:[#allocation2 + $0xc8] sm:$0xff] }
   0xd   :  { %v101_v26 = vadd.f32 %v2579_v6, %v82_v19  ;;  %v102_v27 = vadd.f32 %v2579_v6, %v83_v20  ;;  %v113_v31 = vmax.f32 %v97_v22, 0.0  ;;  %v106_v33 = vadd.f32 %v2579_v6, %v87_v24 }
   0xe   :  { %2476 = vmatpush.bf16.msra.mxu1 %v2325_v14  ;;  %2477 = vmatpush.bf16.msra.mxu2 %v2325_v14  ;;  %v114_v32 = vmax.f32 %v98_v23, 0.0  ;;  %v93_v34 = vadd.f32 %v2579_v6, %v74_v25  ;;  %v121_v37 = vmax.f32 %v105_v28, 0.0  ;;  %v94_v38 = vadd.f32 %v2579_v6, %v75_v29 }
   0xf   :  { %2478 = vmatpush.bf16.msra.mxu3 %v2325_v14  ;;  %647 = vmatpush.bf16.msra.mxu0 %v2325_v14  ;;  %v117_v35 = vmax.f32 %v101_v26, 0.0  ;;  %v118_v36 = vmax.f32 %v102_v27, 0.0  ;;  %v129_v39 = vpack.c.bf16 %v113_v31, %v113_v31  ;;  %v122_v41 = vmax.f32 %v106_v33, 0.0 }
  0x10   :  { %v130_v40 = vpack.c.bf16 %v114_v32, %v114_v32  ;;  %v109_v42 = vmax.f32 %v93_v34, 0.0  ;;  %v137_v45 = vpack.c.bf16 %v121_v37, %v121_v37  ;;  %v110_v46 = vmax.f32 %v94_v38, 0.0 }
  0x11   :  { %v133_v43 = vpack.c.bf16 %v117_v35, %v117_v35  ;;  %v134_v44 = vpack.c.bf16 %v118_v36, %v118_v36  ;;  %v161_v48 = vunpack.c.l.b16 %v129_v39  ;;  %v138_v50 = vpack.c.bf16 %v122_v41, %v122_v41  ;;  %v2320_v35 = vld [vmem:[#allocation2 + $0xc0] sm:$0xff]  ;;  %v2365_v36 = vld [vmem:[#allocation2 + $0xa8] sm:$0xff] }
  0x12   :  { %2479 = vmatpush.bf16.msra.mxu1 %v2324_v30  ;;  %2480 = vmatpush.bf16.msra.mxu2 %v2324_v30  ;;  %v162_v49 = vunpack.c.l.b16 %v130_v40  ;;  %v125_v51 = vpack.c.bf16 %v109_v42, %v109_v42  ;;  %v169_v55 = vunpack.c.l.b16 %v137_v45  ;;  %v2611_v59 = vpack.c.bf16 %v110_v46, %v110_v46 }
  0x13   :  { %2481 = vmatpush.bf16.msra.mxu3 %v2324_v30  ;;  %648 = vmatpush.bf16.msra.mxu0 %v2324_v30  ;;  %v165_v53 = vunpack.c.l.b16 %v133_v43  ;;  %v166_v54 = vunpack.c.l.b16 %v134_v44  ;;  %v177_v56 = vpack.c.b16 %v161_v48, %v161_v48  ;;  %v170_v58 = vunpack.c.l.b16 %v138_v50  ;;  %v2319_v50 = vld [vmem:[#allocation2 + $0x38] sm:$0xff] }
  0x14   :  { %v178_v57 = vpack.c.b16 %v162_v49, %v162_v49  ;;  %v185_v2 = vpack.c.b16 %v169_v55, %v169_v55  ;;  %v157_v4 = vunpack.c.l.b16 %v125_v51  ;;  %v158_v13 = vunpack.c.l.b16 %v2611_v59  ;;  %v2335_v49 = vld [vmem:[#allocation2 + $0x1b8] sm:$0xff] }
  0x15   :  { %v181_v60 = vpack.c.b16 %v165_v53, %v165_v53  ;;  %v182_v61 = vpack.c.b16 %v166_v54, %v166_v54  ;;  %v200_v0 = vsel %vm189_vm0, 0, %v177_v56  ;;  %v186_v12 = vpack.c.b16 %v170_v58, %v170_v58  ;;  %v2343_v56 = vld [vmem:[#allocation2 + $0x78] sm:$0xff] }
  0x16   :  { %2482 = vmatpush.bf16.msra.mxu1 %v2323_v47  ;;  %2483 = vmatpush.bf16.msra.mxu2 %v2323_v47  ;;  %v202_v1 = vsel %vm189_vm0, 0, %v178_v57  ;;  %v248_v5 = vunpack.c.l.b16 %v200_v0  ;;  %v2616_v7 = vunpack.c.h.b16 %v200_v0  ;;  %v2645_v34 = vpack.c.b16 %v157_v4, %v157_v4 }
  0x17   :  { %2484 = vmatpush.bf16.msra.mxu3 %v2323_v47  ;;  %649 = vmatpush.bf16.msra.mxu0 %v2323_v47  ;;  %v250_v8 = vunpack.c.l.b16 %v202_v1  ;;  %v2618_v9 = vunpack.c.h.b16 %v202_v1  ;;  %v208_v10 = vsel %vm189_vm0, 0, %v181_v60  ;;  %v210_v11 = vsel %vm189_vm0, 0, %v182_v61 }
  0x18   :  { %v278_v14 = vpack.c.b16 %v248_v5, %v248_v5  ;;  %v2625_v15 = vpack.c.b16 %v2616_v7, %v2616_v7  ;;  %v254_v19 = vunpack.c.l.b16 %v208_v10  ;;  %v2631_v20 = vunpack.c.h.b16 %v208_v10 }
  0x19   :  { %v280_v16 = vpack.c.b16 %v250_v8, %v250_v8  ;;  %v2629_v17 = vpack.c.b16 %v2618_v9, %v2618_v9  ;;  %v256_v21 = vunpack.c.l.b16 %v210_v11  ;;  %v2633_v22 = vunpack.c.h.b16 %v210_v11 }
  0x1a   :  { %2485 = vmatpush.bf16.msra.mxu1 %v2322_v63  ;;  %2486 = vmatpush.bf16.msra.mxu2 %v2322_v63  ;;  %v367_v23 = vshrl.u32 %v278_v14, 16  ;;  %v3324_v24 = vshrl.u32 %v2625_v15, 16  ;;  %v3323_v25 = vshll.u32 %v2625_v15, 16  ;;  %v284_v29 = vpack.c.b16 %v254_v19, %v254_v19  ;;  %v2318_v14 = vld [vmem:[#allocation2 + $0x30] sm:$0xff] }
  0x1b   :  { %2487 = vmatpush.bf16.msra.mxu3 %v2322_v63  ;;  %650 = vmatpush.bf16.msra.mxu0 %v2322_v63  ;;  %v380_v26 = vshrl.u32 %v280_v16, 16  ;;  %v3326_v27 = vshrl.u32 %v2629_v17, 16  ;;  %v3329_v28 = vshll.u32 %v2629_v17, 16  ;;  %v2641_v30 = vpack.c.b16 %v2631_v20, %v2631_v20  ;;  %v2351_v63 = vld [vmem:[#allocation2 + $0x138] sm:$0xff] }
  0x1c   :  { %v2012_v31 = vrot.slane %v367_v23, 11  ;;  %v374_v32 = vrot.slane %v3324_v24, 7  ;;  %v286_v33 = vpack.c.b16 %v256_v21, %v256_v21  ;;  %v2657_v39 = vpack.c.b16 %v2633_v22, %v2633_v22  ;;  %v2342_v23 = vld [vmem:[#allocation2 + $0x70] sm:$0xff] }
  0x1d   :  { %3352 = vst [vmem:[#allocation5_spill] sm:$0xff] %v2641_v30  ;;  %v2013_v37 = vrot.slane %v380_v26, 11  ;;  %v387_v38 = vrot.slane %v3326_v27, 7  ;;  %v406_v40 = vshrl.u32 %v284_v29, 16  ;;  %v3318_v42 = vshrl.u32 %v2641_v30, 16  ;;  %v2314_v24 = vld [vmem:[#allocation2 + $0x10] sm:$0xff] }
  0x1e   :  { %2488 = vmatpush.bf16.msra.mxu1 %v2321_v18  ;;  %2489 = vmatpush.bf16.msra.mxu2 %v2321_v18  ;;  %3355 = vst [vmem:[#allocation6_spill] sm:$0xff] %v2657_v39  ;;  %v377_v41 = vor.u32 %v3323_v25, %v374_v32  ;;  %v3320_v43 = vshll.u32 %v2641_v30, 16  ;;  %v419_v44 = vshrl.u32 %v286_v33, 16  ;;  %v3317_v46 = vshrl.u32 %v2657_v39, 16  ;;  %v2330_v25 = vld [vmem:[#allocation2 + $0x190] sm:$0xff] }
  0x1f   :  { %2490 = vmatpush.bf16.msra.mxu3 %v2321_v18  ;;  %651 = vmatpush.bf16.msra.mxu0 %v2321_v18  ;;  %v390_v45 = vor.u32 %v3329_v28, %v387_v38  ;;  %v3319_v47 = vshll.u32 %v2657_v39, 16  ;;  %v216_v48 = vsel %vm189_vm0, 0, %v185_v2  ;;  %v2015_v53 = vrot.slane %v406_v40, 11 }
  0x20   :  { %v378_v51 = vsel %vm2649_vm3, %v2012_v31, %v377_v41  ;;  %v413_v54 = vrot.slane %v3318_v42, 7  ;;  %v218_v55 = vsel %vm189_vm0, 0, %v186_v12  ;;  %v2016_v60 = vrot.slane %v419_v44, 11  ;;  %v2334_v12 = vld [vmem:[#allocation2 + $0x1b0] sm:$0xff] }
  0x21   :  { %v391_v57 = vsel %vm2649_vm3, %v2013_v37, %v390_v45  ;;  %v2675_v58 = vunpack.c.l.b16 %v378_v51  ;;  %v426_v61 = vrot.slane %v3317_v46, 7  ;;  %v262_v2 = vunpack.c.l.b16 %v216_v48  ;;  %v2350_v31 = vld [vmem:[#allocation2 + $0x130] sm:$0xff]  ;;  %v2333_v45 = vld [vmem:[#allocation2 + $0x1a8] sm:$0xff] }
  0x22   :  { %2491 = vmatpush.bf16.msra.mxu1 %v2320_v35  ;;  %2492 = vmatpush.bf16.msra.mxu2 %v2320_v35  ;;  %v2679_v0 = vunpack.c.l.b16 %v391_v57  ;;  %v416_v1 = vor.u32 %v3320_v43, %v413_v54  ;;  %v2683_v4 = vunpack.c.h.b16 %v216_v48  ;;  %v264_v8 = vunpack.c.l.b16 %v218_v55  ;;  %v2317_v48 = vld [vmem:[#allocation2 + $0x28] sm:$0xff] }
  0x23   :  { %2493 = vmatpush.bf16.msra.mxu3 %v2320_v35  ;;  %652 = vmatpush.bf16.msra.mxu0 %v2320_v35  ;;  %v429_v5 = vor.u32 %v3319_v47, %v426_v61  ;;  %v2687_v10 = vunpack.c.h.b16 %v218_v55  ;;  %v174_v11 = vpack.c.b16 %v158_v13, %v158_v13  ;;  %v292_v19 = vpack.c.b16 %v262_v2, %v262_v2 }
  0x24   :  { %v583_v16 = vpack.c.b16 %v2679_v0, %v2675_v58  ;;  %v417_v18 = vsel %vm2649_vm3, %v2015_v53, %v416_v1  ;;  %v2698_v21 = vpack.c.b16 %v2683_v4, %v2683_v4  ;;  %v294_v13 = vpack.c.b16 %v264_v8, %v264_v8  ;;  %v2341_v53 = vld [vmem:[#allocation2 + $0x68] sm:$0xff]  ;;  %v2316_v8 = vld [vmem:[#allocation2 + $0x20] sm:$0xff] }
  0x25   :  { %v430_v59 = vsel %vm2649_vm3, %v2016_v60, %v429_v5  ;;  %v2702_v26 = vunpack.c.l.b16 %v417_v18  ;;  %v2706_v29 = vpack.c.b16 %v2687_v10, %v2687_v10  ;;  %v458_v33 = vshrl.u32 %v292_v19, 16  ;;  %v2332_v5 = vld [vmem:[#allocation2 + $0x1a0] sm:$0xff] }
  0x26   :  { %877 = vmatpush.bf16.msrb.mxu2 %v2335_v49  ;;  %759 = vmatpush.bf16.msrb.mxu1 %v2319_v50  ;;  %3356 = vst [vmem:[#allocation7_spill] sm:$0xff] %v2698_v21  ;;  %v2708_v32 = vunpack.c.l.b16 %v430_v59  ;;  %v3315_v35 = vshrl.u32 %v2698_v21, 16  ;;  %v3316_v37 = vshll.u32 %v2698_v21, 16  ;;  %v471_v38 = vshrl.u32 %v294_v13, 16 }
  0x27   :  { %1023 = vmatpush.bf16.msrb.mxu3 %v2343_v56  ;;  %3357 = vst [vmem:[#allocation8_spill] sm:$0xff] %v2706_v29  ;;  %1169 = vmatpush.bf16.msrb.mxu0 %v2351_v63  ;;  %v3313_v40 = vshrl.u32 %v2706_v29, 16  ;;  %v3314_v41 = vshll.u32 %v2706_v29, 16  ;;  %v192_v44 = vsel %vm189_vm0, 0, %v2645_v34  ;;  %v2019_v50 = vrot.slane %v458_v33, 11  ;;  %v2349_v34 = vld [vmem:[#allocation2 + $0x128] sm:$0xff] }
  0x28   :  { %663 = vmatmul.bf16.vlgmr.msra.gmra.mxu1 %v583_v16  ;;  %v585_v49 = vpack.c.b16 %v2708_v32, %v2702_v26  ;;  %v465_v51 = vrot.slane %v3315_v35, 7  ;;  %v2020_v54 = vrot.slane %v471_v38, 11  ;;  %v194_v56 = vsel %vm189_vm0, 0, %v174_v11 }
  0x29   :  { %v478_v55 = vrot.slane %v3313_v40, 7  ;;  %v240_v60 = vunpack.c.l.b16 %v192_v44  ;;  %v2725_v61 = vunpack.c.h.b16 %v192_v44  ;;  %v242_v63 = vunpack.c.l.b16 %v194_v56 }
  0x2a   :  { %878 = vmatpush.bf16.msrb.mxu2 %v2334_v12  ;;  %760 = vmatpush.bf16.msrb.mxu1 %v2318_v14  ;;  %v468_v57 = vor.u32 %v3316_v37, %v465_v51  ;;  %v2729_v2 = vunpack.c.h.b16 %v194_v56  ;;  %v2399_v11 = vunpack.c.h.bf16 %v2609_v52  ;;  %v80_v12 = vmul.f32 %v2574_v3, %v2398_v62  ;;  %v2348_v62 = vld [vmem:[#allocation2 + $0x120] sm:$0xff] }
  0x2b   :  { %1024 = vmatpush.bf16.msrb.mxu3 %v2342_v23  ;;  %1170 = vmatpush.bf16.msrb.mxu0 %v2350_v31  ;;  %v481_v1 = vor.u32 %v3314_v41, %v478_v55  ;;  %v270_v16 = vpack.c.b16 %v240_v60, %v240_v60  ;;  %v271_v18 = vpack.c.b16 %v2725_v61, %v2725_v61  ;;  %v2340_v23 = vld [vmem:[#allocation2 + $0x60] sm:$0xff]  ;;  %vm1369_vm5 = vsmask.f32 7440 }
  0x2c   :  { %673 = vmatmul.bf16.vlgmr.msra.gmra.mxu2 %v585_v49  ;;  %v469_v14 = vsel %vm2649_vm3, %v2019_v50, %v468_v57  ;;  %v272_v19 = vpack.c.b16 %v242_v63, %v242_v63  ;;  %v273_v52 = vpack.c.b16 %v2729_v2, %v2729_v2  ;;  %v81_v31 = vmul.f32 %v2574_v3, %v2399_v11  ;;  %vm3030_vm6 = vmor %vm1368_vm4, %vm1369_vm5 }
  0x2d   :  { %v482_v59 = vsel %vm2649_vm3, %v2020_v54, %v481_v1  ;;  %v2741_v13 = vunpack.c.l.b16 %v469_v14  ;;  %v315_v38 = vshrl.u32 %v270_v16, 16  ;;  %v320_v44 = vshrl.u32 %v271_v18, 16 }
  0x2e   :  { %879 = vmatpush.bf16.msrb.mxu2 %v2333_v45  ;;  %761 = vmatpush.bf16.msrb.mxu1 %v2317_v48  ;;  %v2746_v33 = vunpack.c.l.b16 %v482_v59  ;;  %v323_v45 = vshll.u32 %v271_v18, 16  ;;  %v328_v48 = vshrl.u32 %v272_v19, 16  ;;  %v333_v49 = vshrl.u32 %v273_v52, 16 }
  0x2f   :  { %1025 = vmatpush.bf16.msrb.mxu3 %v2341_v53  ;;  %1171 = vmatpush.bf16.msrb.mxu0 %v2349_v34  ;;  %v336_v50 = vshll.u32 %v273_v52, 16  ;;  %v99_v51 = vadd.f32 %v2579_v6, %v80_v12  ;;  %v2008_v54 = vrot.slane %v315_v38, 11  ;;  %v322_v55 = vrot.slane %v320_v44, 7  ;;  %v2460_v34 = vld [vmem:[%s3306_s0 + $0x28] sm:$0xff]  }
  0x30   :  { %v587_v53 = vpack.c.b16 %v2746_v33, %v2741_v13  ;;  %v2751_v56 = vrot.slane %v320_v44, 4  ;;  %v2009_v57 = vrot.slane %v328_v48, 11  ;;  %v335_v60 = vrot.slane %v333_v49, 7 }
  0x31   :  { %v2756_v63 = vrot.slane %v323_v45, 5  ;;  %v2758_v1 = vrot.slane %v333_v49, 4  ;;  %v100_v11 = vadd.f32 %v2579_v6, %v81_v31  ;;  %v115_v12 = vmax.f32 %v99_v51, 0.0 }
  0x32   :  { %880 = vmatpush.bf16.msrb.mxu2 %v2332_v5  ;;  %762 = vmatpush.bf16.msrb.mxu1 %v2316_v8  ;;  %v325_v5 = vor.u32 %v323_v45, %v322_v55  ;;  %v2760_v8 = vrot.slane %v336_v50, 5  ;;  %v338_v14 = vor.u32 %v336_v50, %v335_v60  ;;  %v2406_v18 = vunpack.c.l.bf16 %v2460_v34 }
  0x33   :  { %1026 = vmatpush.bf16.msrb.mxu3 %v2340_v23  ;;  %1172 = vmatpush.bf16.msrb.mxu0 %v2348_v62  ;;  %v2407_v19 = vunpack.c.h.bf16 %v2460_v34  ;;  %v2462_v23 = vld [vmem:[%s3306_s0 + $0x38] sm:$0xff]   ;;  %v116_v62 = vmax.f32 %v100_v11, 0.0  ;;  %v131_v38 = vpack.c.bf16 %v115_v12, %v115_v12 }
  0x34   :  { %683 = vmatmul.bf16.vlgmr.msra.gmra.mxu3 %v587_v53  ;;  %v326_v59 = vsel %vm2649_vm3, %v2008_v54, %v325_v5  ;;  %v339_v31 = vsel %vm2649_vm3, %v2009_v57, %v338_v14  ;;  %v84_v45 = vmul.f32 %v2574_v3, %v2406_v18  ;;  %v2414_v53 = vunpack.c.l.bf16 %v2462_v23  ;;  %v2456_v57 = vld [vmem:[%s3306_s0 + $0x8] sm:$0xff]  }
  0x35   :  { %v2774_v44 = vunpack.c.l.b16 %v326_v59  ;;  %v85_v48 = vmul.f32 %v2574_v3, %v2407_v19  ;;  %v2778_v49 = vunpack.c.l.b16 %v339_v31  ;;  %v132_v50 = vpack.c.bf16 %v116_v62, %v116_v62 }
  0x36   :  { %v163_v51 = vunpack.c.l.b16 %v131_v38  ;;  %v103_v54 = vadd.f32 %v2579_v6, %v84_v45  ;;  %v2415_v34 = vunpack.c.h.bf16 %v2462_v23  ;;  %v88_v12 = vmul.f32 %v2574_v3, %v2414_v53 }
  0x37   :  { %v104_v55 = vadd.f32 %v2579_v6, %v85_v48  ;;  %v581_v60 = vpack.c.b16 %v2778_v49, %v2774_v44  ;;  %v164_v5 = vunpack.c.l.b16 %v132_v50  ;;  %v2390_v38 = vunpack.c.l.bf16 %v2456_v57 }
  0x38   :  { %v179_v11 = vpack.c.b16 %v163_v51, %v163_v51  ;;  %v119_v14 = vmax.f32 %v103_v54, 0.0  ;;  %v89_v19 = vmul.f32 %v2574_v3, %v2415_v34  ;;  %v107_v23 = vadd.f32 %v2579_v6, %v88_v12  ;;  %v2331_v54 = vld [vmem:[#allocation2 + $0x198] sm:$0xff] }
  0x39   :  { %v120_v18 = vmax.f32 %v104_v55, 0.0  ;;  %653 = vmatmul.bf16.vlgmr.msra.gmra.mxu0 %v581_v60  ;;  %v180_v59 = vpack.c.b16 %v164_v5, %v164_v5  ;;  %v2315_v55 = vld [vmem:[#allocation2 + $0x18] sm:$0xff]  ;;  %v2391_v60 = vunpack.c.h.bf16 %v2456_v57  ;;  %881 = vmatpush.bf16.msrb.mxu2 %v2331_v54 }
  0x3a   :  { %v204_v62 = vsel %vm189_vm0, 0, %v179_v11  ;;  %v135_v48 = vpack.c.bf16 %v119_v14, %v119_v14  ;;  %v108_v51 = vadd.f32 %v2579_v6, %v89_v19  ;;  %v123_v53 = vmax.f32 %v107_v23, 0.0  ;;  %v2339_v34 = vld [vmem:[#allocation2 + $0x58] sm:$0xff]  ;;  %763 = vmatpush.bf16.msrb.mxu1 %v2315_v55 }
  0x3b   :  { %v252_v31 = vunpack.c.l.b16 %v204_v62  ;;  %v2791_v45 = vunpack.c.h.b16 %v204_v62  ;;  %v136_v40 = vpack.c.bf16 %v120_v18, %v120_v18  ;;  %v206_v50 = vsel %vm189_vm0, 0, %v180_v59  ;;  %1027 = vmatpush.bf16.msrb.mxu3 %v2339_v34 }
  0x3c   :  { %v514_v12 = vunpack.c.l.b16 %v206_v50  ;;  %v2799_v41 = vunpack.c.h.b16 %v206_v50  ;;  %v167_v62 = vunpack.c.l.b16 %v135_v48  ;;  %v124_v18 = vmax.f32 %v108_v51, 0.0 }
  0x3d   :  { %v282_v5 = vpack.c.b16 %v252_v31, %v252_v31  ;;  %v2797_v11 = vpack.c.b16 %v2791_v45, %v2791_v45  ;;  %v168_v14 = vunpack.c.l.b16 %v136_v40  ;;  %v76_v19 = vmul.f32 %v2574_v3, %v2390_v38  ;;  %882 = vmatpush.bf16.msrb.mxu2 %v2330_v25 }
  0x3e   :  { %v518_v31 = vpack.c.b16 %v514_v12, %v514_v12  ;;  %v2806_v35 = vpack.c.b16 %v2799_v41, %v2799_v41  ;;  %v183_v50 = vpack.c.b16 %v167_v62, %v167_v62  ;;  %v77_v40 = vmul.f32 %v2574_v3, %v2391_v60  ;;  %764 = vmatpush.bf16.msrb.mxu1 %v2314_v24  ;;  %v2345_v24 = vld [vmem:[#allocation2 + $0x108] sm:$0xff] }
  0x3f   :  { %v393_v59 = vshrl.u32 %v282_v5, 16  ;;  %v3325_v23 = vshrl.u32 %v2797_v11, 16  ;;  %v3327_v57 = vshll.u32 %v2797_v11, 16  ;;  %v184_v37 = vpack.c.b16 %v168_v14, %v168_v14 }
  0x40   :  { %v523_v38 = vshrl.u32 %v518_v31, 16  ;;  %v139_v54 = vpack.c.bf16 %v123_v53, %v123_v53  ;;  %v3321_v55 = vshrl.u32 %v2806_v35, 16  ;;  %v3322_v5 = vshll.u32 %v2806_v35, 16 }
  0x41   :  { %v2014_v48 = vrot.slane %v393_v59, 11  ;;  %v400_v51 = vrot.slane %v3325_v23, 7  ;;  %v212_v34 = vsel %vm189_vm0, 0, %v183_v50  ;;  %v214_v12 = vsel %vm189_vm0, 0, %v184_v37  ;;  %v2338_v23 = vld [vmem:[#allocation2 + $0x50] sm:$0xff] }
  0x42   :  { %v258_v14 = vunpack.c.l.b16 %v212_v34  ;;  %v2817_v46 = vunpack.c.h.b16 %v212_v34  ;;  %v140_v3 = vpack.c.bf16 %v124_v18, %v124_v18  ;;  %v2022_v60 = vrot.slane %v523_v38, 11  ;;  %1028 = vmatpush.bf16.msrb.mxu3 %v2338_v23 }
  0x43   :  { %v403_v62 = vor.u32 %v3327_v57, %v400_v51  ;;  %v530_v59 = vrot.slane %v3321_v55, 7  ;;  %v260_v53 = vunpack.c.l.b16 %v214_v12  ;;  %v2821_v31 = vunpack.c.h.b16 %v214_v12 }
  0x44   :  { %v288_v50 = vpack.c.b16 %v258_v14, %v258_v14  ;;  %v2827_v37 = vpack.c.b16 %v2817_v46, %v2817_v46  ;;  %v171_v51 = vunpack.c.l.b16 %v139_v54  ;;  %v95_v57 = vadd.f32 %v2579_v6, %v76_v19 }
  0x45   :  { %v404_v42 = vsel %vm2649_vm3, %v2014_v48, %v403_v62  ;;  %v533_v34 = vor.u32 %v3322_v5, %v530_v59  ;;  %v290_v38 = vpack.c.b16 %v260_v53, %v260_v53  ;;  %v2835_v47 = vpack.c.b16 %v2821_v31, %v2821_v31  ;;  %v2347_v59 = vld [vmem:[#allocation2 + $0x118] sm:$0xff] }
  0x46   :  { %3358 = vst [vmem:[#allocation9_spill] sm:$0xff] %v2827_v37  ;;  %v2831_v18 = vunpack.c.l.b16 %v404_v42  ;;  %v432_v12 = vshrl.u32 %v288_v50, 16  ;;  %v3328_v43 = vshrl.u32 %v2827_v37, 16  ;;  %v3332_v48 = vshll.u32 %v2827_v37, 16  ;;  %1173 = vmatpush.bf16.msrb.mxu0 %v2347_v59  ;;  %v2313_v59 = vld [vmem:[#allocation2 + $0x8] sm:$0xff] }
  0x47   :  { %3359 = vst [vmem:[#allocation10_spill] sm:$0xff] %v2835_v47  ;;  %v172_v62 = vunpack.c.l.b16 %v140_v3  ;;  %v534_v14 = vsel %vm2649_vm3, %v2022_v60, %v533_v34  ;;  %v445_v54 = vshrl.u32 %v290_v38, 16  ;;  %v3330_v55 = vshrl.u32 %v2835_v47, 16  ;;  %v2346_v34 = vld [vmem:[#allocation2 + $0x110] sm:$0xff]  ;;  %765 = vmatpush.bf16.msrb.mxu1 %v2313_v59  ;;  %v2344_v59 = vld [vmem:[#allocation2 + $0x100] sm:$0xff] }
  0x48   :  { %v3331_v42 = vshll.u32 %v2835_v47, 16  ;;  %v2843_v53 = vunpack.c.l.b16 %v534_v14  ;;  %v2017_v5 = vrot.slane %v432_v12, 11  ;;  %v439_v50 = vrot.slane %v3328_v43, 7  ;;  %v2329_v43 = vld [vmem:[#allocation2 + $0x188] sm:$0xff] }
  0x49   :  { %v2018_v27 = vrot.slane %v445_v54, 11  ;;  %v452_v3 = vrot.slane %v3330_v55, 7  ;;  %v187_v60 = vpack.c.b16 %v171_v51, %v171_v51  ;;  %v188_v12 = vpack.c.b16 %v172_v62, %v172_v62  ;;  %v2337_v55 = vld [vmem:[#allocation2 + $0x48] sm:$0xff]  ;;  %883 = vmatpush.bf16.msrb.mxu2 %v2329_v43 }
  0x4a   :  { %v584_v38 = vpack.c.b16 %v2843_v53, %v2831_v18  ;;  %v442_v14 = vor.u32 %v3332_v48, %v439_v50  ;;  %v96_v51 = vadd.f32 %v2579_v6, %v77_v40  ;;  %1174 = vmatpush.bf16.msrb.mxu0 %v2346_v34  ;;  %1029 = vmatpush.bf16.msrb.mxu3 %v2337_v55  ;;  %v2312_v34 = vld [vmem:[#allocation2] sm:$0xff] }
  0x4b   :  { %v455_v54 = vor.u32 %v3331_v42, %v452_v3  ;;  %v220_v28 = vsel %vm189_vm0, 0, %v187_v60  ;;  %v222_v62 = vsel %vm189_vm0, 0, %v188_v12  ;;  %v2328_v12 = vld [vmem:[#allocation2 + $0x180] sm:$0xff]  ;;  %766 = vmatpush.bf16.msrb.mxu1 %v2312_v34 }
  0x4c   :  { %668 = vmatmul.bf16.gmra.mxu1 %v584_v38  ;;  %v443_v50 = vsel %vm2649_vm3, %v2017_v5, %v442_v14  ;;  %v266_v19 = vunpack.c.l.b16 %v220_v28  ;;  %v2861_v25 = vunpack.c.h.b16 %v220_v28  ;;  %v516_v60 = vunpack.c.l.b16 %v222_v62 }
  0x4d   :  { %v456_v3 = vsel %vm2649_vm3, %v2018_v27, %v455_v54  ;;  %v2865_v42 = vunpack.c.l.b16 %v443_v50  ;;  %v2867_v6 = vunpack.c.h.b16 %v222_v62  ;;  %v111_v38 = vmax.f32 %v95_v57, 0.0  ;;  %v2336_v57 = vld [vmem:[#allocation2 + $0x40] sm:$0xff]  ;;  %884 = vmatpush.bf16.msrb.mxu2 %v2328_v12 }
  0x4e   :  { %v2869_v23 = vunpack.c.l.b16 %v456_v3  ;;  %v296_v40 = vpack.c.b16 %v266_v19, %v266_v19  ;;  %v2873_v5 = vpack.c.b16 %v2861_v25, %v2861_v25  ;;  %v520_v28 = vpack.c.b16 %v516_v60, %v516_v60  ;;  %v2367_v60 = vld [vmem:[#allocation2 + $0xb8] sm:$0xff]  ;;  %1175 = vmatpush.bf16.msrb.mxu0 %v2345_v24  ;;  %1030 = vmatpush.bf16.msrb.mxu3 %v2336_v57 }
  0x4f   :  { %v2877_v27 = vpack.c.b16 %v2867_v6, %v2867_v6  ;;  %v112_v14 = vmax.f32 %v96_v51, 0.0  ;;  %v2529_v54 = vmov 0   ;;  %v127_v55 = vpack.c.bf16 %v111_v38, %v111_v38 }
  0x50   :  { %3360 = vst [vmem:[#allocation11_spill] sm:$0xff] %v2873_v5  ;;  %v238_v50 = vunpack.c.l.b16 %v2529_v54  ;;  %v586_v62 = vpack.c.b16 %v2869_v23, %v2865_v42  ;;  %v484_v19 = vshrl.u32 %v296_v40, 16  ;;  %v3342_v3 = vshrl.u32 %v2873_v5, 16 }
  0x51   :  { %3361 = vst [vmem:[#allocation12_spill] sm:$0xff] %v2877_v27  ;;  %v536_v48 = vshrl.u32 %v520_v28, 16  ;;  %v3341_v52 = vshrl.u32 %v2877_v27, 16  ;;  %v128_v40 = vpack.c.bf16 %v112_v14, %v112_v14  ;;  %v159_v47 = vunpack.c.l.b16 %v127_v55  ;;  %1545 = vmatpush.bf16.msra.mxu2 %v2367_v60 }
  0x52   :  { %678 = vmatmul.bf16.gmra.mxu2 %v586_v62  ;;  %v2021_v16 = vrot.slane %v484_v19, 11  ;;  %v491_v29 = vrot.slane %v3342_v3, 7  ;;  %v3362_v28 = vshll.u32 %v2873_v5, 16  ;;  %v2891_v24 = vunpack.c.h.b16 %v2529_v54  ;;  %1176 = vmatpush.bf16.msrb.mxu0 %v2344_v59  ;;  %v2383_v59 = vld [vmem:[#allocation2 + $0x238] sm:$0xff]  ;;  %v2366_v19 = vld [vmem:[#allocation2 + $0xb0] sm:$0xff] }
  0x53   :  { %v2023_v21 = vrot.slane %v536_v48, 11  ;;  %v543_v43 = vrot.slane %v3341_v52, 7  ;;  %v160_v51 = vunpack.c.l.b16 %v128_v40  ;;  %v2893_v38 = vpack.c.b16 %v238_v50, %v238_v50 }
  0x54   :  { %v494_v37 = vor.u32 %v3362_v28, %v491_v29  ;;  %v3363_v62 = vshll.u32 %v2877_v27, 16  ;;  %v175_v48 = vpack.c.b16 %v159_v47, %v159_v47  ;;  %v2903_v29 = vpack.c.b16 %v2891_v24, %v2891_v24 }
  0x55   :  { %v176_v34 = vpack.c.b16 %v160_v51, %v160_v51  ;;  %v302_v47 = vshrl.u32 %v2893_v38, 16  ;;  %v2359_v51 = vld [vmem:[#allocation2 + $0x1f8] sm:$0xff]  ;;  %1546 = vmatpush.bf16.msra.mxu2 %v2366_v19 }
  0x56   :  { %v546_v14 = vor.u32 %v3363_v62, %v543_v43  ;;  %v495_v12 = vsel %vm2649_vm3, %v2021_v16, %v494_v37  ;;  %v196_v43 = vsel %vm189_vm0, 0, %v175_v48  ;;  %v2375_v37 = vld [vmem:[#allocation2 + $0x178] sm:$0xff]  ;;  %1303 = vmatpush.bf16.msra.mxu1 %v2359_v51  ;;  %1837 = vmatpush.bf16.msra.mxu0 %v2383_v59  ;;  %v3364_v51 = vshll.u32 %v2903_v29, 16 }
  0x57   :  { %v2907_v50 = vunpack.c.l.b16 %v495_v12  ;;  %v198_v60 = vsel %vm189_vm0, 0, %v176_v34  ;;  %v244_v55 = vunpack.c.l.b16 %v196_v43  ;;  %v2914_v16 = vunpack.c.h.b16 %v196_v43  ;;  %1703 = vmatpush.bf16.msra.mxu3 %v2375_v37 }
  0x58   :  { %v547_v54 = vsel %vm2649_vm3, %v2023_v21, %v546_v14  ;;  %v246_v40 = vunpack.c.l.b16 %v198_v60  ;;  %v2916_v28 = vunpack.c.h.b16 %v198_v60  ;;  %v3351_v21 = vshrl.u32 %v2903_v29, 16 }
  0x59   :  { %v2911_v57 = vunpack.c.l.b16 %v547_v54  ;;  %v274_v14 = vpack.c.b16 %v244_v55, %v244_v55  ;;  %v275_v48 = vpack.c.b16 %v2914_v16, %v2914_v16  ;;  %v2007_v43 = vrot.slane %v302_v47, 11  ;;  %1547 = vmatpush.bf16.msra.mxu2 %v2365_v36  ;;  %v2378_v36 = vld [vmem:[#allocation2 + $0x210] sm:$0xff] }
  0x5a   :  { %v276_v34 = vpack.c.b16 %v246_v40, %v246_v40  ;;  %v2926_v54 = vpack.c.b16 %v2916_v28, %v2916_v28  ;;  %v309_v60 = vrot.slane %v3351_v21, 7 }
  0x5b   :  { %v588_v62 = vpack.c.b16 %v2911_v57, %v2907_v50  ;;  %v341_v52 = vshrl.u32 %v274_v14, 16  ;;  %v346_v55 = vshrl.u32 %v275_v48, 16  ;;  %v349_v3 = vshll.u32 %v275_v48, 16 }
  0x5c   :  { %v354_v27 = vshrl.u32 %v276_v34, 16  ;;  %v359_v12 = vshrl.u32 %v2926_v54, 16  ;;  %v362_v37 = vshll.u32 %v2926_v54, 16  ;;  %v312_v40 = vor.u32 %v3364_v51, %v309_v60 }
  0x5d   :  { %688 = vmatmul.bf16.gmra.mxu3 %v588_v62  ;;  %v2010_v5 = vrot.slane %v341_v52, 11  ;;  %v348_v39 = vrot.slane %v346_v55, 7  ;;  %v2934_v47 = vrot.slane %v346_v55, 4  ;;  %v2936_v30 = vrot.slane %v349_v3, 5 }
  0x5e   :  { %v2011_v59 = vrot.slane %v354_v27, 11  ;;  %v361_v62 = vrot.slane %v359_v12, 7  ;;  %v313_v14 = vsel %vm2649_vm3, %v2007_v43, %v312_v40  ;;  %v2948_v52 = vpack.c.b16 %v2914_v16, %v2729_v2 }
  0x5f   :  { %v351_v48 = vor.u32 %v349_v3, %v348_v39  ;;  %v1391_v34 = vor.u32 %v2936_v30, %v2934_v47  ;;  %v2944_v21 = vunpack.c.l.b16 %v313_v14  ;;  %v959_v40 = vpack.c.b16 %v2725_v61, %v2891_v24  ;;  %v2358_v14 = vld [vmem:[#allocation2 + $0x1f0] sm:$0xff] }
  0x60   :  { %v364_v19 = vor.u32 %v362_v37, %v361_v62  ;;  %v2374_v62 = vld [vmem:[#allocation2 + $0x170] sm:$0xff]  ;;  %1304 = vmatpush.bf16.msra.mxu1 %v2358_v14 }
  0x61   :  { %v352_v27 = vsel %vm2649_vm3, %v2010_v5, %v351_v48  ;;  %v695_v60 = vpack.c.b16 %v2774_v44, %v2944_v21  ;;  %v2382_v5 = vld [vmem:[#allocation2 + $0x230] sm:$0xff]  ;;  %1704 = vmatpush.bf16.msra.mxu3 %v2374_v62  ;;  %v2357_v48 = vld [vmem:[#allocation2 + $0x1e8] sm:$0xff]  ;;  %v963_v62 = vpack.c.b16 %v2631_v20, %v2891_v24 }
  0x62   :  { %v365_v39 = vsel %vm2649_vm3, %v2011_v59, %v364_v19  ;;  %v567_v3 = vunpack.c.l.b16 %v352_v27  ;;  %1838 = vmatpush.bf16.msra.mxu0 %v2382_v5  ;;  %v2373_v59 = vld [vmem:[#allocation2 + $0x168] sm:$0xff]  ;;  %v2364_v27 = vld [vmem:[#allocation2 + $0xa0] sm:$0xff]  ;;  %v2370_v14 = vld [vmem:[#allocation2 + $0x150] sm:$0xff] }
  0x63   :  { %v568_v43 = vunpack.c.l.b16 %v365_v39  ;;  %767 = vmatmul.bf16.vlgmr.msrb.gmra.mxu1 %v695_v60  ;;  %v2381_v19 = vld [vmem:[#allocation2 + $0x228] sm:$0xff]  ;;  %1548 = vmatpush.bf16.msra.mxu2 %v2364_v27  ;;  %v698_v60 = vpack.c.b16 %v2831_v18, %v2679_v0  ;;  %v2356_v39 = vld [vmem:[#allocation2 + $0x1e0] sm:$0xff]  ;;  %v825_v0 = vpack.c.b16 %v2944_v21, %v2843_v53  ;;  %v1107_v18 = vpack.c.b16 %v2618_v9, %v2616_v7  ;;  %v2354_v5 = vld [vmem:[#allocation2 + $0x1d0] sm:$0xff] }
  0x64   :  { %v696_v55 = vpack.c.b16 %v567_v3, %v2778_v49  ;;  %v3365_v49 = vpack.c.b16 %v2729_v2, %v2725_v61  ;;  %1305 = vmatpush.bf16.msra.mxu1 %v2357_v48  ;;  %v2972_v61 = vpack.c.b16 %v2616_v7, %v2916_v28  ;;  %v2372_v2 = vld [vmem:[#allocation2 + $0x160] sm:$0xff]  ;;  %v699_v7 = vpack.c.b16 %v2702_v26, %v2944_v21  ;;  %v2361_v26 = vld [vmem:[#allocation2 + $0x88] sm:$0xff] }
  0x65   :  { %v582_v51 = vpack.c.b16 %v568_v43, %v567_v3  ;;  %v697_v44 = vpack.c.b16 %v2675_v58, %v568_v43  ;;  %1705 = vmatpush.bf16.msra.mxu3 %v2373_v59  ;;  %v1106_v58 = vpack.c.b16 %v2916_v28, %v2914_v16  ;;  %v2380_v3 = vld [vmem:[#allocation2 + $0x220] sm:$0xff]  ;;  %v2363_v43 = vld [vmem:[#allocation2 + $0x98] sm:$0xff]  ;;  %v2981_v16 = vpack.c.b16 %v2791_v45, %v2618_v9  ;;  %v2377_v59 = vld [vmem:[#allocation2 + $0x208] sm:$0xff] }
  0x66   :  { %885 = vmatmul.bf16.vlgmr.msrb.gmra.mxu2 %v696_v55  ;;  %1839 = vmatpush.bf16.msra.mxu0 %v2381_v19  ;;  %v2371_v28 = vld [vmem:[#allocation2 + $0x158] sm:$0xff]  ;;  %v700_v53 = vpack.c.b16 %v2865_v42, %v2708_v32  ;;  %v1108_v9 = vpack.c.b16 %v2799_v41, %v2791_v45  ;;  %v701_v32 = vpack.c.b16 %v2741_v13, %v2869_v23  ;;  %v2360_v19 = vld [vmem:[#allocation2 + $0x80] sm:$0xff] }
  0x67   :  { %658 = vmatmul.bf16.gmra.mxu0 %v582_v51  ;;  %1549 = vmatpush.bf16.msra.mxu2 %v2363_v43  ;;  %v2379_v51 = vld [vmem:[#allocation2 + $0x218] sm:$0xff]  ;;  %v1109_v45 = vpack.c.b16 %v2633_v22, %v2631_v20  ;;  %v2998_v42 = vpack.c.b16 %v2817_v46, %v2633_v22  ;;  %v702_v20 = vpack.c.b16 %v2907_v50, %v2746_v33  ;;  %v3367_v43 = vshll.u32 %v2903_v29, 16 }
  0x68   :  { %1306 = vmatpush.bf16.msra.mxu1 %v2356_v39  ;;  %v1110_v22 = vpack.c.b16 %v2821_v31, %v2817_v46  ;;  %v3013_v27 = vpack.c.b16 %v2683_v4, %v2821_v31  ;;  %v3366_v31 = vor.u32 %v2756_v63, %v2751_v56  ;;  %v1392_v63 = vrot.slane %v1391_v34, 4 }
  0x69   :  { %1706 = vmatpush.bf16.msra.mxu3 %v2372_v2  ;;  %v1375_v2 = vshll.u32 %v2893_v38, 16 }
  0x6a   :  { %1840 = vmatpush.bf16.msra.mxu0 %v2380_v3  ;;  %v2376_v3 = vld [vmem:[#allocation2 + $0x200] sm:$0xff]  ;;  %v1382_v38 = vrot.slane %v3366_v31, 4 }
  0x6b   :  { %v3021_v50 = vrot.slane %v1375_v2, 5 }
  0x6d   :  { %1031 = vmatmul.bf16.vlgmr.msrb.gmra.mxu3 %v959_v40  ;;  %v2362_v40 = vld [vmem:[#allocation2 + $0x90] sm:$0xff]  ;;  %v1383_v56 = vsel %vm3030_vm6, %v1382_v38, %v3021_v50 }
  0x6e   :  { %1707 = vmatpush.bf16.msra.mxu3 %v2371_v28  ;;  %1841 = vmatpush.bf16.msra.mxu0 %v2379_v51  ;;  %v3370_v28 = vshrl.u32 %v2903_v29, 16  ;;  %v3371_v51 = vor.u32 %v2760_v8, %v2758_v1  ;;  %v826_v29 = vpack.c.b16 %v2944_v21, %v2911_v57  ;;  %v1393_v1 = vsel %vm3030_vm6, %v1392_v63, %v3021_v50 }
  0x6f   :  { %1550 = vmatpush.bf16.msra.mxu2 %v2362_v40  ;;  %v1111_v8 = vpack.c.b16 %v2687_v10, %v2683_v4  ;;  %v3055_v30 = vunpack.c.l.b16 %v1393_v1  ;;  %v3066_v21 = vpack.c.b16 %v2861_v25, %v2687_v10  ;;  %v1112_v10 = vpack.c.b16 %v2867_v6, %v2861_v25 }
  0x70   :  { %v1387_v40 = vrot.slane %v3371_v51, 4 }
  0x72   :  { %1708 = vmatpush.bf16.msra.mxu3 %v2370_v14  ;;  %1842 = vmatpush.bf16.msra.mxu0 %v2378_v36 }
  0x73   :  { %772 = vmatmul.bf16.gmra.mxu1 %v696_v55  ;;  %v2355_v55 = vld [vmem:[#allocation2 + $0x1d8] sm:$0xff]  ;;  %1551 = vmatpush.bf16.msra.mxu2 %v2361_v26 }
  0x74   :  { %1307 = vmatpush.bf16.msra.mxu1 %v2355_v55  ;;  %v1371_v55 = vrot.slane %v3370_v28, 4 }
  0x76   :  { %890 = vmatmul.bf16.gmra.mxu2 %v697_v44  ;;  %1843 = vmatpush.bf16.msra.mxu0 %v2377_v59 }
  0x77   :  { %1177 = vmatmul.bf16.vlgmr.msrb.gmra.mxu0 %v3365_v49  ;;  %v2353_v49 = vld [vmem:[#allocation2 + $0x1c8] sm:$0xff]  ;;  %1552 = vmatpush.bf16.msra.mxu2 %v2360_v19 }
  0x78   :  { %1308 = vmatpush.bf16.msra.mxu1 %v2354_v5 }
  0x7a   :  { %1844 = vmatpush.bf16.msra.mxu0 %v2376_v3  ;;  %v3372_v3 = vshll.u32 %v2629_v17, 16 }
  0x7c   :  { %1309 = vmatpush.bf16.msra.mxu1 %v2353_v49  ;;  %v1405_v31 = vrot.slane %v3372_v3, 5 }
  0x7d   :  { %1036 = vmatmul.bf16.gmra.mxu3 %v2948_v52 }
  0x83   :  { %777 = vmatmul.bf16.gmra.mxu1 %v697_v44  ;;  %v2369_v44 = vld [vmem:[#allocation2 + $0x148] sm:$0xff] }
  0x84   :  { %1709 = vmatpush.bf16.msra.mxu3 %v2369_v44 }
  0x86   :  { %895 = vmatmul.bf16.gmra.mxu2 %v698_v60 }
  0x87   :  { %1182 = vmatmul.bf16.gmra.mxu0 %v1106_v58  ;;  %v2352_v58 = vld [vmem:[#allocation2 + $0x1c0] sm:$0xff] }
  0x88   :  { %1310 = vmatpush.bf16.msra.mxu1 %v2352_v58  ;;  %v1395_v58 = vrot.slane %v362_v37, 5 }
  0x8d   :  { %1041 = vmatmul.bf16.gmra.mxu3 %v2972_v61 }
  0x93   :  { %782 = vmatmul.bf16.gmra.mxu1 %v698_v60  ;;  %v2368_v60 = vld [vmem:[#allocation2 + $0x140] sm:$0xff] }
  0x94   :  { %1710 = vmatpush.bf16.msra.mxu3 %v2368_v60  ;;  %v1394_v60 = vrot.slane %v359_v12, 4  ;;  %v3374_v12 = vshrl.u32 %v2629_v17, 16 }
  0x96   :  { %900 = vmatmul.bf16.gmra.mxu2 %v825_v0  ;;  %v1372_v0 = vrot.slane %v3367_v43, 5  ;;  %v1396_v43 = vor.u32 %v1395_v58, %v1394_v60  ;;  %v1404_v51 = vrot.slane %v3374_v12, 4 }
  0x97   :  { %1187 = vmatmul.bf16.gmra.mxu0 %v1107_v18 }
  0x98   :  { %v1373_v14 = vor.u32 %v1372_v0, %v1371_v55  ;;  %v1397_v37 = vrot.slane %v1396_v43, 4 }
  0x9a   :  { %v1374_v4 = vrot.slane %v1373_v14, 4  ;;  %v1398_v17 = vsel %vm3030_vm6, %v1397_v37, %v3021_v50  ;;  %v3377_v14 = vshll.u32 %v2625_v15, 16 }
  0x9d   :  { %1046 = vmatmul.bf16.gmra.mxu3 %v2981_v16 }
  0xa3   :  { %787 = vmatmul.bf16.gmra.mxu1 %v699_v7 }
  0xa5   :  { %v3000_v48 = vpop.f32.mrf.mxu1 }
  0xa6   :  { %905 = vmatmul.bf16.gmra.mxu2 %v700_v53 }
  0xa7   :  { %1192 = vmatmul.bf16.gmra.mxu0 %v1108_v9  ;;  %v1388_v9 = vsel %vm3030_vm6, %v1387_v40, %v3021_v50  ;;  %v1406_v40 = vor.u32 %v1405_v31, %v1404_v51  ;;  %v3379_v51 = vshrl.u32 %v2806_v35, 16 }
  0xa9   :  { %v1610_v37 = vrot.slane %v3379_v51, 4 }
  0xad   :  { %1051 = vmatmul.bf16.gmra.mxu3 %v963_v62  ;;  %v3007_v23 = vpop.f32.mrf.mxu1  ;;  %v1468_v62 = vunpack.c.l.b16 %v1388_v9 }
  0xaf   :  { %v3003_v13 = vpop.f32.mrf.mxu2  ;;  %v1482_v36 = vpack.c.b16 %v3055_v30, %v1468_v62 }
  0xb3   :  { %792 = vmatmul.bf16.gmra.mxu1 %v700_v53  ;;  %v1467_v53 = vunpack.c.l.b16 %v1383_v56 }
  0xb5   :  { %v1639_v34 = vpack.c.b16 %v1468_v62, %v1467_v53  ;;  %v3376_v62 = vshrl.u32 %v2625_v15, 16 }
  0xb6   :  { %910 = vmatmul.bf16.gmra.mxu2 %v701_v32  ;;  %v654_v7 = vpop.f32.mrf.mxu0 }
  0xb7   :  { %1197 = vmatmul.bf16.gmra.mxu0 %v1109_v45  ;;  %v3016_v33 = vpop.f32.mrf.mxu3  ;;  %v3019_v46 = vpop.f32.mrf.mxu2  ;;  %v1399_v1 = vrot.slane %v3376_v62, 4 }
  0xbd   :  { %1056 = vmatmul.bf16.gmra.mxu3 %v2998_v42 }
  0xbe   :  { %v656_v26 = vpop.f32.mrf.mxu0 }
  0xbf   :  { %v3057_v47 = vpop.f32.mrf.mxu3 }
  0xc3   :  { %797 = vmatmul.bf16.gmra.mxu1 %v701_v32  ;;  %v1378_v32 = vsel %vm3030_vm6, %v1374_v4, %v3021_v50 }
  0xc4   :  { %v3074_v44 = vunpack.c.l.b16 %v1378_v32 }
  0xc6   :  { %915 = vmatmul.bf16.gmra.mxu2 %v702_v20 }
  0xc7   :  { %1202 = vmatmul.bf16.gmra.mxu0 %v1110_v22  ;;  %v1481_v22 = vpack.c.b16 %v1467_v53, %v3074_v44  ;;  %v1407_v53 = vrot.slane %v1406_v40, 4 }
  0xc9   :  { %v3023_v39 = vpop.f32.mrf.mxu1 }
  0xcd   :  { %1061 = vmatmul.bf16.gmra.mxu3 %v3013_v27 }
  0xd1   :  { %v3062_v57 = vpop.f32.mrf.mxu1 }
  0xd3   :  { %802 = vmatmul.bf16.gmra.mxu1 %v702_v20 }
  0xd5   :  { %v3059_v5 = vpop.f32.mrf.mxu2 }
  0xd6   :  { %920 = vmatmul.bf16.gmra.mxu2 %v826_v29 }
  0xd7   :  { %1207 = vmatmul.bf16.gmra.mxu0 %v1111_v8 }
  0xdd   :  { %1066 = vmatmul.bf16.gmra.mxu3 %v3066_v21  ;;  %v3076_v49 = vpop.f32.mrf.mxu2 }
  0xe0   :  { %v3072_v45 = vpop.f32.mrf.mxu3  ;;  %v768_v59 = vpop.f32.mrf.mxu1 }
  0xe1   :  { %v769_v20 = vadd.f32 %v768_v59, %v654_v7  ;;  %v3375_v7 = vshrl.u32 %v2797_v11, 16 }
  0xe3   :  { %1311 = vmatmul.bf16.vlgmr.msra.gmra.mxu1 %v2948_v52  ;;  %v3373_v52 = vshll.u32 %v2797_v11, 16  ;;  %v1409_v56 = vrot.slane %v3375_v7, 4  ;;  %v1408_v11 = vsel %vm3030_vm6, %v1407_v53, %v3021_v50 }
  0xe4   :  { %v659_v19 = vpop.f32.mrf.mxu0 }
  0xe5   :  { %v1410_v28 = vrot.slane %v3373_v52, 5 }
  0xe6   :  { %1553 = vmatmul.bf16.vlgmr.msra.gmra.mxu2 %v1481_v22  ;;  %v1470_v22 = vunpack.c.l.b16 %v1398_v17 }
  0xe7   :  { %1212 = vmatmul.bf16.gmra.mxu0 %v1112_v10  ;;  %v1411_v9 = vor.u32 %v1410_v28, %v1409_v56  ;;  %v1472_v10 = vunpack.c.l.b16 %v1408_v11 }
  0xe8   :  { %v3086_v2 = vpop.f32.mrf.mxu3  ;;  %v770_v38 = vpop.f32.mrf.mxu1  ;;  %v1640_v43 = vpack.c.b16 %v1470_v22, %v3055_v30 }
  0xe9   :  { %v886_v0 = vpop.f32.mrf.mxu2  ;;  %v771_v25 = vadd.f32 %v770_v38, %v656_v26  ;;  %v1412_v4 = vrot.slane %v1411_v9, 4 }
  0xea   :  { %v926_v55 = vadd.f32 %v886_v0, %v769_v20  ;;  %v3378_v0 = vshll.u32 %v2806_v35, 16 }
  0xeb   :  { %v1413_v20 = vsel %vm3030_vm6, %v1412_v4, %v3021_v50 }
  0xec   :  { %v661_v54 = vpop.f32.mrf.mxu0  ;;  %v3110_v60 = vunpack.c.l.b16 %v1413_v20 }
  0xed   :  { %1711 = vmatmul.bf16.vlgmr.msra.gmra.mxu3 %v1639_v34  ;;  %v1400_v34 = vrot.slane %v3377_v14, 5 }
  0xee   :  { %v3113_v3 = vpack.c.b16 %v3110_v60, %v1472_v10 }
  0xef   :  { %v1401_v58 = vor.u32 %v1400_v34, %v1399_v1 }
  0xf0   :  { %v1032_v63 = vpop.f32.mrf.mxu3  ;;  %v773_v8 = vpop.f32.mrf.mxu1 }
  0xf1   :  { %v1072_v29 = vadd.f32 %v1032_v63, %v926_v55  ;;  %v888_v26 = vpop.f32.mrf.mxu2  ;;  %v774_v32 = vadd.f32 %v773_v8, %v659_v19 }
  0xf2   :  { %v927_v59 = vadd.f32 %v888_v26, %v771_v25  ;;  %v1402_v25 = vrot.slane %v1401_v58, 4 }
  0xf3   :  { %1316 = vmatmul.bf16.gmra.mxu1 %v2972_v61  ;;  %v1611_v61 = vrot.slane %v3378_v0, 5 }
  0xf4   :  { %v1178_v15 = vpop.f32.mrf.mxu0 }
  0xf5   :  { %v3115_v31 = vadd.f32 %v1178_v15, %v1072_v29  ;;  %v1612_v7 = vor.u32 %v1611_v61, %v1610_v37  ;;  %v3382_v15 = vld [vmem:[#allocation6_spill] sm:$0xff] }
  0xf6   :  { %1558 = vmatmul.bf16.gmra.mxu2 %v1482_v36  ;;  %v3383_v58 = vshll.u32 %v3382_v15, 16 }
  0xf7   :  { %1845 = vmatmul.bf16.vlgmr.msra.gmra.mxu0 %v1482_v36  ;;  %v1403_v36 = vsel %vm3030_vm6, %v1402_v25, %v3021_v50  ;;  %v1613_v63 = vrot.slane %v1612_v7, 4 }
  0xf8   :  { %v1034_v38 = vpop.f32.mrf.mxu3  ;;  %v775_v52 = vpop.f32.mrf.mxu1  ;;  %v1471_v53 = vunpack.c.l.b16 %v1403_v36 }
  0xf9   :  { %v1073_v19 = vadd.f32 %v1034_v38, %v927_v59  ;;  %v891_v28 = vpop.f32.mrf.mxu2  ;;  %v776_v55 = vadd.f32 %v775_v52, %v661_v54  ;;  %v1614_v54 = vsel %vm3030_vm6, %v1613_v63, %v3021_v50  ;;  %v1420_v38 = vrot.slane %v3383_v58, 5 }
  0xfa   :  { %v928_v12 = vadd.f32 %v891_v28, %v774_v32  ;;  %v3130_v62 = vunpack.c.l.b16 %v1614_v54  ;;  %v1483_v8 = vpack.c.b16 %v1471_v53, %v1470_v22  ;;  %v1641_v26 = vpack.c.b16 %v1472_v10, %v1471_v53  ;;  %v3380_v32 = vld [vmem:[#allocation5_spill] sm:$0xff] }
  0xfb   :  { %v3381_v59 = vshll.u32 %v3380_v32, 16  ;;  %v3386_v25 = vshrl.u32 %v3380_v32, 16  ;;  %v3387_v28 = vshrl.u32 %v3382_v15, 16 }
  0xfc   :  { %v1180_v40 = vpop.f32.mrf.mxu0  ;;  %v1642_v17 = vpack.c.b16 %v3130_v62, %v3110_v60 }
  0xfd   :  { %1716 = vmatmul.bf16.gmra.mxu3 %v1640_v43  ;;  %v3125_v56 = vadd.f32 %v1180_v40, %v1073_v19  ;;  %v1415_v20 = vrot.slane %v3381_v59, 5  ;;  %v3384_v43 = vld [vmem:[#allocation9_spill] sm:$0xff]  ;;  %v1414_v52 = vrot.slane %v3386_v25, 4  ;;  %v1419_v10 = vrot.slane %v3387_v28, 4  ;;  %v3391_v25 = vld [vmem:[#allocation7_spill] sm:$0xff] }
  0xfe   :  { %v3385_v60 = vshll.u32 %v3384_v43, 16  ;;  %v3388_v37 = vshrl.u32 %v3384_v43, 16 }
  0xff   :  { %v1421_v51 = vor.u32 %v1420_v38, %v1419_v10 }
 0x100   :  { %v1037_v30 = vpop.f32.mrf.mxu3  ;;  %v778_v29 = vpop.f32.mrf.mxu1  ;;  %v1425_v0 = vrot.slane %v3385_v60, 5  ;;  %v1424_v40 = vrot.slane %v3388_v37, 4  ;;  %v3394_v37 = vshrl.u32 %v3391_v25, 16 }
 0x101   :  { %v1074_v9 = vadd.f32 %v1037_v30, %v928_v12  ;;  %v893_v35 = vpop.f32.mrf.mxu2  ;;  %v779_v22 = vadd.f32 %v778_v29, %v3000_v48  ;;  %v1416_v12 = vor.u32 %v1415_v20, %v1414_v52  ;;  %v1422_v30 = vrot.slane %v1421_v51, 4 }
 0x102   :  { %v929_v1 = vadd.f32 %v893_v35, %v776_v55  ;;  %v1426_v63 = vor.u32 %v1425_v0, %v1424_v40  ;;  %v3392_v52 = vshll.u32 %v3391_v25, 16  ;;  %v1434_v40 = vrot.slane %v3394_v37, 4 }
 0x103   :  { %1321 = vmatmul.bf16.gmra.mxu1 %v2981_v16  ;;  %v1417_v7 = vrot.slane %v1416_v12, 4 }
 0x104   :  { %v1183_v14 = vpop.f32.mrf.mxu0  ;;  %v1435_v28 = vrot.slane %v3392_v52, 5 }
 0x105   :  { %v3135_v34 = vadd.f32 %v1183_v14, %v1074_v9  ;;  %v1251_v9 = vpack.c.b16 %v2891_v24, %v2799_v41  ;;  %v1418_v35 = vsel %vm3030_vm6, %v1417_v7, %v3021_v50 }
 0x106   :  { %1563 = vmatmul.bf16.gmra.mxu2 %v1483_v8 }
 0x107   :  { %1850 = vmatmul.bf16.gmra.mxu0 %v1483_v8  ;;  %v1427_v8 = vrot.slane %v1426_v63, 4 }
 0x108   :  { %v1039_v11 = vpop.f32.mrf.mxu3  ;;  %v780_v16 = vpop.f32.mrf.mxu1 }
 0x109   :  { %v1075_v4 = vadd.f32 %v1039_v11, %v929_v1  ;;  %v896_v19 = vpop.f32.mrf.mxu2  ;;  %v781_v29 = vadd.f32 %v780_v16, %v3007_v23  ;;  %v1423_v1 = vsel %vm3030_vm6, %v1422_v30, %v3021_v50  ;;  %v1474_v11 = vunpack.c.l.b16 %v1418_v35 }
 0x10a   :  { %v930_v61 = vadd.f32 %v896_v19, %v779_v22  ;;  %v1428_v41 = vsel %vm3030_vm6, %v1427_v8, %v3021_v50  ;;  %v3389_v22 = vld [vmem:[#allocation10_spill] sm:$0xff]  ;;  %v1436_v30 = vor.u32 %v1435_v28, %v1434_v40  ;;  %v1785_v8 = vpack.c.b16 %v3074_v44, %v3130_v62 }
 0x10b   :  { %v3164_v32 = vunpack.c.l.b16 %v1428_v41  ;;  %v3390_v16 = vshll.u32 %v3389_v22, 16  ;;  %v1485_v35 = vpack.c.b16 %v1474_v11, %v3074_v44 }
 0x10c   :  { %v1185_v55 = vpop.f32.mrf.mxu0 }
 0x10d   :  { %1721 = vmatmul.bf16.gmra.mxu3 %v1641_v26  ;;  %v3150_v48 = vadd.f32 %v1185_v55, %v1075_v4  ;;  %v1475_v4 = vunpack.c.l.b16 %v1423_v1  ;;  %v1430_v19 = vrot.slane %v3390_v16, 5  ;;  %v3393_v55 = vshrl.u32 %v3389_v22, 16 }
 0x10f   :  { %v1643_v23 = vpack.c.b16 %v1475_v4, %v1474_v11  ;;  %v3167_v20 = vpack.c.b16 %v3164_v32, %v1475_v4  ;;  %v1429_v12 = vrot.slane %v3393_v55, 4 }
 0x110   :  { %v1042_v36 = vpop.f32.mrf.mxu3  ;;  %v783_v54 = vpop.f32.mrf.mxu1 }
 0x111   :  { %v1076_v53 = vadd.f32 %v1042_v36, %v930_v61  ;;  %v898_v14 = vpop.f32.mrf.mxu2  ;;  %v784_v43 = vadd.f32 %v783_v54, %v3023_v39 }
 0x112   :  { %v931_v26 = vadd.f32 %v898_v14, %v781_v29 }
 0x113   :  { %1326 = vmatmul.bf16.gmra.mxu1 %v1251_v9  ;;  %v1437_v9 = vrot.slane %v1436_v30, 4 }
 0x114   :  { %v1188_v59 = vpop.f32.mrf.mxu0 }
 0x115   :  { %v3169_v15 = vadd.f32 %v1188_v59, %v1076_v53  ;;  %v1438_v1 = vsel %vm3030_vm6, %v1437_v9, %v3021_v50 }
 0x116   :  { %1568 = vmatmul.bf16.gmra.mxu2 %v3113_v3  ;;  %v3196_v4 = vunpack.c.l.b16 %v1438_v1 }
 0x117   :  { %1855 = vmatmul.bf16.gmra.mxu0 %v3113_v3  ;;  %v1431_v3 = vor.u32 %v1430_v19, %v1429_v12 }
 0x118   :  { %v1044_v58 = vpop.f32.mrf.mxu3  ;;  %v785_v60 = vpop.f32.mrf.mxu1 }
 0x119   :  { %v1077_v38 = vadd.f32 %v1044_v58, %v931_v26  ;;  %v901_v0 = vpop.f32.mrf.mxu2  ;;  %v786_v61 = vadd.f32 %v785_v60, %v3062_v57  ;;  %v1432_v7 = vrot.slane %v1431_v3, 4 }
 0x11a   :  { %v932_v10 = vadd.f32 %v901_v0, %v784_v43 }
 0x11b   :  { %v1433_v53 = vsel %vm3030_vm6, %v1432_v7, %v3021_v50 }
 0x11c   :  { %v1190_v51 = vpop.f32.mrf.mxu0  ;;  %v1477_v54 = vunpack.c.l.b16 %v1433_v53 }
 0x11d   :  { %1726 = vmatmul.bf16.gmra.mxu3 %v1642_v17  ;;  %v3183_v36 = vadd.f32 %v1190_v51, %v1077_v38  ;;  %v3395_v38 = vld [vmem:[#allocation8_spill] sm:$0xff] }
 0x11e   :  { %v1644_v14 = vpack.c.b16 %v1477_v54, %v3164_v32  ;;  %v3199_v41 = vpack.c.b16 %v3196_v4, %v1477_v54  ;;  %v3396_v22 = vshll.u32 %v3395_v38, 16  ;;  %v3397_v32 = vld [vmem:[#allocation11_spill] sm:$0xff] }
 0x11f   :  { %v3398_v43 = vshll.u32 %v3397_v32, 16 }
 0x120   :  { %v1047_v39 = vpop.f32.mrf.mxu3  ;;  %v788_v57 = vpop.f32.mrf.mxu1  ;;  %v1440_v16 = vrot.slane %v3396_v22, 5 }
 0x121   :  { %v1078_v63 = vadd.f32 %v1047_v39, %v932_v10  ;;  %v903_v29 = vpop.f32.mrf.mxu2  ;;  %v789_v62 = vadd.f32 %v788_v57, %v3003_v13  ;;  %v1445_v60 = vrot.slane %v3398_v43, 5  ;;  %v3400_v10 = vshrl.u32 %v3397_v32, 16 }
 0x122   :  { %v933_v17 = vadd.f32 %v903_v29, %v786_v61  ;;  %v3399_v61 = vshrl.u32 %v3395_v38, 16 }
 0x123   :  { %1331 = vmatmul.bf16.gmra.mxu1 %v2998_v42  ;;  %v1444_v55 = vrot.slane %v3400_v10, 4 }
 0x124   :  { %v1193_v26 = vpop.f32.mrf.mxu0  ;;  %v1439_v25 = vrot.slane %v3399_v61, 4 }
 0x125   :  { %v3201_v59 = vadd.f32 %v1193_v26, %v1078_v63  ;;  %v1446_v13 = vor.u32 %v1445_v60, %v1444_v55 }
 0x126   :  { %1573 = vmatmul.bf16.gmra.mxu2 %v1485_v35  ;;  %v1441_v28 = vor.u32 %v1440_v16, %v1439_v25 }
 0x127   :  { %1860 = vmatmul.bf16.gmra.mxu0 %v1785_v8  ;;  %v1447_v30 = vrot.slane %v1446_v13, 4  ;;  %v3401_v8 = vld [vmem:[#allocation12_spill] sm:$0xff] }
 0x128   :  { %v1049_v11 = vpop.f32.mrf.mxu3  ;;  %v790_v42 = vpop.f32.mrf.mxu1  ;;  %v1442_v3 = vrot.slane %v1441_v28, 4  ;;  %v3402_v26 = vshll.u32 %v3401_v8, 16 }
 0x129   :  { %v1079_v58 = vadd.f32 %v1049_v11, %v933_v17  ;;  %v906_v19 = vpop.f32.mrf.mxu2  ;;  %v791_v40 = vadd.f32 %v790_v42, %v3019_v46  ;;  %v1448_v53 = vsel %vm3030_vm6, %v1447_v30, %v3021_v50 }
 0x12a   :  { %v934_v0 = vadd.f32 %v906_v19, %v789_v62  ;;  %v1443_v7 = vsel %vm3030_vm6, %v1442_v3, %v3021_v50  ;;  %v1480_v29 = vunpack.c.l.b16 %v1448_v53  ;;  %v1616_v11 = vrot.slane %v3402_v26, 5 }
 0x12b   :  { %v1479_v63 = vunpack.c.l.b16 %v1443_v7 }
 0x12c   :  { %v1195_v52 = vpop.f32.mrf.mxu0 }
 0x12d   :  { %1731 = vmatmul.bf16.gmra.mxu3 %v1643_v23  ;;  %v3212_v12 = vadd.f32 %v1195_v52, %v1079_v58  ;;  %v1645_v9 = vpack.c.b16 %v1479_v63, %v3196_v4  ;;  %v1488_v46 = vpack.c.b16 %v1480_v29, %v1479_v63  ;;  %v3403_v4 = vshrl.u32 %v3401_v8, 16 }
 0x12f   :  { %v1615_v16 = vrot.slane %v3403_v4, 4 }
 0x130   :  { %v1052_v51 = vpop.f32.mrf.mxu3  ;;  %v793_v39 = vpop.f32.mrf.mxu1 }
 0x131   :  { %v1080_v37 = vadd.f32 %v1052_v51, %v934_v0  ;;  %v908_v23 = vpop.f32.mrf.mxu2  ;;  %v794_v58 = vadd.f32 %v793_v39, %v3059_v5  ;;  %v1617_v42 = vor.u32 %v1616_v11, %v1615_v16  ;;  %v1252_v39 = vpack.c.b16 %v2891_v24, %v2867_v6 }
 0x132   :  { %v935_v57 = vadd.f32 %v908_v23, %v791_v40 }
 0x133   :  { %1336 = vmatmul.bf16.gmra.mxu1 %v3013_v27  ;;  %v1618_v43 = vrot.slane %v1617_v42, 4 }
 0x134   :  { %v1198_v54 = vpop.f32.mrf.mxu0 }
 0x135   :  { %v3223_v17 = vadd.f32 %v1198_v54, %v1080_v37  ;;  %v1619_v5 = vsel %vm3030_vm6, %v1618_v43, %v3021_v50 }
 0x136   :  { %1578 = vmatmul.bf16.gmra.mxu2 %v3167_v20  ;;  %v1638_v25 = vunpack.c.l.b16 %v1619_v5 }
 0x137   :  { %1865 = vmatmul.bf16.gmra.mxu0 %v3167_v20 }
 0x138   :  { %v1054_v35 = vpop.f32.mrf.mxu3  ;;  %v795_v38 = vpop.f32.mrf.mxu1 }
 0x139   :  { %v1081_v1 = vadd.f32 %v1054_v35, %v935_v57  ;;  %v911_v27 = vpop.f32.mrf.mxu2  ;;  %v796_v60 = vadd.f32 %v795_v38, %v3076_v49  ;;  %v1786_v38 = vpack.c.b16 %v3074_v44, %v1638_v25 }
 0x13a   :  { %v936_v22 = vadd.f32 %v911_v27, %v794_v58 }
 0x13c   :  { %v1200_v62 = vpop.f32.mrf.mxu0 }
 0x13d   :  { %1736 = vmatmul.bf16.gmra.mxu3 %v1644_v14  ;;  %v3232_v19 = vadd.f32 %v1200_v62, %v1081_v1  ;;  %v1646_v14 = vpack.c.b16 %v1638_v25, %v1480_v29 }
 0x140   :  { %v1057_v32 = vpop.f32.mrf.mxu3  ;;  %v798_v0 = vpop.f32.mrf.mxu1 }
 0x141   :  { %v1082_v20 = vadd.f32 %v1057_v32, %v936_v22  ;;  %v913_v61 = vpop.f32.mrf.mxu2  ;;  %v799_v51 = vadd.f32 %v798_v0, %v3016_v33 }
 0x142   :  { %v937_v52 = vadd.f32 %v913_v61, %v796_v60 }
 0x143   :  { %1341 = vmatmul.bf16.gmra.mxu1 %v3066_v21 }
 0x144   :  { %v1203_v28 = vpop.f32.mrf.mxu0 }
 0x145   :  { %v3239_v10 = vadd.f32 %v1203_v28, %v1082_v20 }
 0x146   :  { %1583 = vmatmul.bf16.gmra.mxu2 %v3199_v41 }
 0x147   :  { %1870 = vmatmul.bf16.gmra.mxu0 %v3199_v41 }
 0x148   :  { %v1059_v55 = vpop.f32.mrf.mxu3  ;;  %v800_v3 = vpop.f32.mrf.mxu1 }
 0x149   :  { %v1083_v49 = vadd.f32 %v1059_v55, %v937_v52  ;;  %v916_v18 = vpop.f32.mrf.mxu2  ;;  %v801_v7 = vadd.f32 %v800_v3, %v3057_v47 }
 0x14a   :  { %v938_v50 = vadd.f32 %v916_v18, %v799_v51 }
 0x14c   :  { %v1205_v13 = vpop.f32.mrf.mxu0 }
 0x14d   :  { %1741 = vmatmul.bf16.gmra.mxu3 %v1645_v9  ;;  %v3244_v37 = vadd.f32 %v1205_v13, %v1083_v49 }
 0x150   :  { %v1062_v21 = vpop.f32.mrf.mxu3  ;;  %v803_v30 = vpop.f32.mrf.mxu1 }
 0x151   :  { %v1084_v40 = vadd.f32 %v1062_v21, %v938_v50  ;;  %v918_v23 = vpop.f32.mrf.mxu2  ;;  %v804_v9 = vadd.f32 %v803_v30, %v3072_v45 }
 0x152   :  { %v939_v41 = vadd.f32 %v918_v23, %v801_v7 }
 0x153   :  { %1346 = vmatmul.bf16.gmra.mxu1 %v1252_v39 }
 0x154   :  { %v1208_v63 = vpop.f32.mrf.mxu0 }
 0x155   :  { %v3249_v33 = vadd.f32 %v1208_v63, %v1084_v40 }
 0x156   :  { %1588 = vmatmul.bf16.gmra.mxu2 %v1488_v46 }
 0x157   :  { %1875 = vmatmul.bf16.gmra.mxu0 %v1488_v46 }
 0x158   :  { %v1064_v57 = vpop.f32.mrf.mxu3  ;;  %v805_v29 = vpop.f32.mrf.mxu1 }
 0x159   :  { %v1085_v53 = vadd.f32 %v1064_v57, %v939_v41  ;;  %v921_v54 = vpop.f32.mrf.mxu2  ;;  %v806_v8 = vadd.f32 %v805_v29, %v3086_v2 }
 0x15a   :  { %v940_v35 = vadd.f32 %v921_v54, %v804_v9 }
 0x15c   :  { %v1210_v6 = vpop.f32.mrf.mxu0 }
 0x15d   :  { %1746 = vmatmul.bf16.gmra.mxu3 %v1646_v14  ;;  %v3252_v24 = vadd.f32 %v1210_v6, %v1085_v53 }
 0x160   :  { %v1067_v47 = vpop.f32.mrf.mxu3  ;;  %v1312_v26 = vpop.f32.mrf.mxu1 }
 0x161   :  { %v1086_v1 = vadd.f32 %v1067_v47, %v940_v35  ;;  %v923_v11 = vpop.f32.mrf.mxu2  ;;  %v1352_v2 = vadd.f32 %v1312_v26, %v3115_v31 }
 0x162   :  { %v941_v58 = vadd.f32 %v923_v11, %v806_v8 }
 0x164   :  { %v1213_v46 = vpop.f32.mrf.mxu0 }
 0x165   :  { %v3256_v27 = vadd.f32 %v1213_v46, %v1086_v1 }
 0x167   :  { %1880 = vmatmul.bf16.gmra.mxu0 %v1786_v38 }
 0x168   :  { %v1069_v45 = vpop.f32.mrf.mxu3  ;;  %v1314_v4 = vpop.f32.mrf.mxu1 }
 0x169   :  { %v1087_v22 = vadd.f32 %v1069_v45, %v941_v58  ;;  %v1554_v16 = vpop.f32.mrf.mxu2  ;;  %v1353_v0 = vadd.f32 %v1314_v4, %v3125_v56 }
 0x16a   :  { %v1594_v60 = vadd.f32 %v1554_v16, %v1352_v2 }
 0x16c   :  { %v1215_v62 = vpop.f32.mrf.mxu0 }
 0x16d   :  { %v3258_v42 = vadd.f32 %v1215_v62, %v1087_v22 }
 0x170   :  { %v1712_v32 = vpop.f32.mrf.mxu3  ;;  %v1317_v43 = vpop.f32.mrf.mxu1 }
 0x171   :  { %v1556_v20 = vpop.f32.mrf.mxu2  ;;  %v1752_v25 = vadd.f32 %v1712_v32, %v1594_v60  ;;  %v1354_v49 = vadd.f32 %v1317_v43, %v3135_v34 }
 0x172   :  { %v1595_v5 = vadd.f32 %v1556_v20, %v1353_v0 }
 0x174   :  { %v1846_v44 = vpop.f32.mrf.mxu0 }
 0x175   :  { %v1886_v55 = vadd.f32 %v1846_v44, %v1752_v25 }
 0x177   :  { %v1956_v13 = vmul.f32 %v1886_v55, %v1886_v55 }
 0x178   :  { %v1714_v61 = vpop.f32.mrf.mxu3  ;;  %v1319_v52 = vpop.f32.mrf.mxu1 }
 0x179   :  { %v1753_v14 = vadd.f32 %v1714_v61, %v1595_v5  ;;  %v1559_v28 = vpop.f32.mrf.mxu2  ;;  %v1355_v23 = vadd.f32 %v1319_v52, %v3150_v48 }
 0x17a   :  { %v1596_v18 = vadd.f32 %v1559_v28, %v1354_v49 }
 0x17c   :  { %v1848_v51 = vpop.f32.mrf.mxu0 }
 0x17d   :  { %v1887_v3 = vadd.f32 %v1848_v51, %v1753_v14 }
 0x17f   :  { %v2419_v31 = vpack.c.bf16 %v1887_v3, %v1886_v55  ;;  %v1934_v21 = vadd.f32 %v1887_v3, %v1886_v55  ;;  %v1957_v40 = vmul.f32 %v1887_v3, %v1887_v3 }
 0x180   :  { %v1717_v50 = vpop.f32.mrf.mxu3  ;;  %v1322_v39 = vpop.f32.mrf.mxu1 }
 0x181   :  { %2420 = vst [vmem:[%s3310_s4] sm:$0xff] %v2419_v31   ;;  %v1972_v56 = vadd.f32 %v1957_v40, %v1956_v13  ;;  %v1754_v7 = vadd.f32 %v1717_v50, %v1596_v18  ;;  %v1561_v30 = vpop.f32.mrf.mxu2  ;;  %v1356_v47 = vadd.f32 %v1322_v39, %v3169_v15 }
 0x182   :  { %v1597_v63 = vadd.f32 %v1561_v30, %v1355_v23 }
 0x184   :  { %v1851_v41 = vpop.f32.mrf.mxu0 }
 0x185   :  { %v1888_v34 = vadd.f32 %v1851_v41, %v1754_v7 }
 0x187   :  { %v1935_v53 = vadd.f32 %v1934_v21, %v1888_v34  ;;  %v1958_v9 = vmul.f32 %v1888_v34, %v1888_v34 }
 0x188   :  { %v1719_v57 = vpop.f32.mrf.mxu3  ;;  %v1324_v29 = vpop.f32.mrf.mxu1 }
 0x189   :  { %v1973_v54 = vadd.f32 %v1972_v56, %v1958_v9  ;;  %v1755_v35 = vadd.f32 %v1719_v57, %v1597_v63  ;;  %v1564_v6 = vpop.f32.mrf.mxu2  ;;  %v1357_v16 = vadd.f32 %v1324_v29, %v3183_v36 }
 0x18a   :  { %v1598_v26 = vadd.f32 %v1564_v6, %v1356_v47 }
 0x18c   :  { %v1853_v1 = vpop.f32.mrf.mxu0 }
 0x18d   :  { %v1889_v8 = vadd.f32 %v1853_v1, %v1755_v35 }
 0x18f   :  { %v2424_v58 = vpack.c.bf16 %v1889_v8, %v1888_v34  ;;  %v1936_v38 = vadd.f32 %v1935_v53, %v1889_v8  ;;  %v1959_v46 = vmul.f32 %v1889_v8, %v1889_v8 }
 0x190   :  { %v1722_v11 = vpop.f32.mrf.mxu3  ;;  %v1327_v48 = vpop.f32.mrf.mxu1 }
 0x191   :  { %2463 = vst [vmem:[%s3310_s4 + $0x8] sm:$0xff] %v2424_v58   ;;  %v1974_v45 = vadd.f32 %v1973_v54, %v1959_v46  ;;  %v1756_v22 = vadd.f32 %v1722_v11, %v1598_v26  ;;  %v1566_v4 = vpop.f32.mrf.mxu2  ;;  %v1358_v61 = vadd.f32 %v1327_v48, %v3201_v59 }
 0x192   :  { %v1599_v15 = vadd.f32 %v1566_v4, %v1357_v16 }
 0x194   :  { %v1856_v62 = vpop.f32.mrf.mxu0 }
 0x195   :  { %v1890_v32 = vadd.f32 %v1856_v62, %v1756_v22 }
 0x197   :  { %v1937_v2 = vadd.f32 %v1936_v38, %v1890_v32  ;;  %v1960_v20 = vmul.f32 %v1890_v32, %v1890_v32 }
 0x198   :  { %v1724_v43 = vpop.f32.mrf.mxu3  ;;  %v1329_v60 = vpop.f32.mrf.mxu1 }
 0x199   :  { %v1975_v0 = vadd.f32 %v1974_v45, %v1960_v20  ;;  %v1757_v44 = vadd.f32 %v1724_v43, %v1599_v15  ;;  %v1569_v5 = vpop.f32.mrf.mxu2  ;;  %v1359_v13 = vadd.f32 %v1329_v60, %v3212_v12 }
 0x19a   :  { %v1600_v14 = vadd.f32 %v1569_v5, %v1358_v61 }
 0x19c   :  { %v1858_v25 = vpop.f32.mrf.mxu0 }
 0x19d   :  { %v1891_v52 = vadd.f32 %v1858_v25, %v1757_v44 }
 0x19f   :  { %v2429_v55 = vpack.c.bf16 %v1891_v52, %v1890_v32  ;;  %v1938_v49 = vadd.f32 %v1937_v2, %v1891_v52  ;;  %v1961_v51 = vmul.f32 %v1891_v52, %v1891_v52 }
 0x1a0   :  { %v1727_v28 = vpop.f32.mrf.mxu3  ;;  %v1332_v36 = vpop.f32.mrf.mxu1 }
 0x1a1   :  { %2464 = vst [vmem:[%s3310_s4 + $0x10] sm:$0xff] %v2429_v55   ;;  %v1976_v3 = vadd.f32 %v1975_v0, %v1961_v51  ;;  %v1758_v18 = vadd.f32 %v1727_v28, %v1600_v14  ;;  %v1571_v50 = vpop.f32.mrf.mxu2  ;;  %v1360_v34 = vadd.f32 %v1332_v36, %v3223_v17 }
 0x1a2   :  { %v1601_v59 = vadd.f32 %v1571_v50, %v1359_v13 }
 0x1a4   :  { %v1861_v31 = vpop.f32.mrf.mxu0 }
 0x1a5   :  { %v1892_v21 = vadd.f32 %v1861_v31, %v1758_v18 }
 0x1a7   :  { %v1939_v39 = vadd.f32 %v1938_v49, %v1892_v21  ;;  %v1962_v56 = vmul.f32 %v1892_v21, %v1892_v21 }
 0x1a8   :  { %v1729_v40 = vpop.f32.mrf.mxu3  ;;  %v1334_v7 = vpop.f32.mrf.mxu1 }
 0x1a9   :  { %v1977_v30 = vadd.f32 %v1976_v3, %v1962_v56  ;;  %v1759_v23 = vadd.f32 %v1729_v40, %v1601_v59  ;;  %v1574_v41 = vpop.f32.mrf.mxu2  ;;  %v1361_v8 = vadd.f32 %v1334_v7, %v3232_v19 }
 0x1aa   :  { %v1602_v53 = vadd.f32 %v1574_v41, %v1360_v34 }
 0x1ac   :  { %v1863_v63 = vpop.f32.mrf.mxu0 }
 0x1ad   :  { %v1893_v57 = vadd.f32 %v1863_v63, %v1759_v23 }
 0x1af   :  { %v2434_v29 = vpack.c.bf16 %v1893_v57, %v1892_v21  ;;  %v1940_v54 = vadd.f32 %v1939_v39, %v1893_v57  ;;  %v1963_v35 = vmul.f32 %v1893_v57, %v1893_v57 }
 0x1b0   :  { %v1732_v9 = vpop.f32.mrf.mxu3  ;;  %v1337_v12 = vpop.f32.mrf.mxu1 }
 0x1b1   :  { %2465 = vst [vmem:[%s3310_s4 + $0x18] sm:$0xff] %v2434_v29   ;;  %v1978_v6 = vadd.f32 %v1977_v30, %v1963_v35  ;;  %v1760_v47 = vadd.f32 %v1732_v9, %v1602_v53  ;;  %v1576_v1 = vpop.f32.mrf.mxu2  ;;  %v1362_v16 = vadd.f32 %v1337_v12, %v3239_v10 }
 0x1b2   :  { %v1603_v17 = vadd.f32 %v1576_v1, %v1361_v8 }
 0x1b4   :  { %v1866_v26 = vpop.f32.mrf.mxu0 }
 0x1b5   :  { %v1894_v11 = vadd.f32 %v1866_v26, %v1760_v47 }
 0x1b7   :  { %v1941_v38 = vadd.f32 %v1940_v54, %v1894_v11  ;;  %v1964_v46 = vmul.f32 %v1894_v11, %v1894_v11 }
 0x1b8   :  { %v1734_v58 = vpop.f32.mrf.mxu3  ;;  %v1339_v48 = vpop.f32.mrf.mxu1 }
 0x1b9   :  { %v1979_v45 = vadd.f32 %v1978_v6, %v1964_v46  ;;  %v1761_v22 = vadd.f32 %v1734_v58, %v1603_v17  ;;  %v1579_v4 = vpop.f32.mrf.mxu2  ;;  %v1363_v61 = vadd.f32 %v1339_v48, %v3244_v37 }
 0x1ba   :  { %v1604_v15 = vadd.f32 %v1579_v4, %v1362_v16 }
 0x1bc   :  { %v1868_v62 = vpop.f32.mrf.mxu0 }
 0x1bd   :  { %v1895_v32 = vadd.f32 %v1868_v62, %v1761_v22 }
 0x1bf   :  { %v2439_v2 = vpack.c.bf16 %v1895_v32, %v1894_v11  ;;  %v1942_v20 = vadd.f32 %v1941_v38, %v1895_v32  ;;  %v1965_v60 = vmul.f32 %v1895_v32, %v1895_v32 }
 0x1c0   :  { %v1737_v43 = vpop.f32.mrf.mxu3  ;;  %v1342_v5 = vpop.f32.mrf.mxu1 }
 0x1c1   :  { %2466 = vst [vmem:[%s3310_s4 + $0x20] sm:$0xff] %v2439_v2   ;;  %v1980_v19 = vadd.f32 %v1979_v45, %v1965_v60  ;;  %v1762_v0 = vadd.f32 %v1737_v43, %v1604_v15  ;;  %v1581_v44 = vpop.f32.mrf.mxu2  ;;  %v1364_v3 = vadd.f32 %v1342_v5, %v3249_v33 }
 0x1c2   :  { %v1605_v10 = vadd.f32 %v1581_v44, %v1363_v61 }
 0x1c4   :  { %v1871_v25 = vpop.f32.mrf.mxu0 }
 0x1c5   :  { %v1896_v52 = vadd.f32 %v1871_v25, %v1762_v0 }
 0x1c7   :  { %v1943_v28 = vadd.f32 %v1942_v20, %v1896_v52  ;;  %v1966_v55 = vmul.f32 %v1896_v52, %v1896_v52 }
 0x1c8   :  { %v1739_v14 = vpop.f32.mrf.mxu3  ;;  %v1344_v50 = vpop.f32.mrf.mxu1 }
 0x1c9   :  { %v1981_v49 = vadd.f32 %v1980_v19, %v1966_v55  ;;  %v1763_v51 = vadd.f32 %v1739_v14, %v1605_v10  ;;  %v1584_v36 = vpop.f32.mrf.mxu2  ;;  %v1365_v30 = vadd.f32 %v1344_v50, %v3252_v24 }
 0x1ca   :  { %v1606_v31 = vadd.f32 %v1584_v36, %v1364_v3 }
 0x1cc   :  { %v1873_v18 = vpop.f32.mrf.mxu0 }
 0x1cd   :  { %v1897_v13 = vadd.f32 %v1873_v18, %v1763_v51 }
 0x1cf   :  { %v2444_v59 = vpack.c.bf16 %v1897_v13, %v1896_v52  ;;  %v1944_v40 = vadd.f32 %v1943_v28, %v1897_v13  ;;  %v1967_v39 = vmul.f32 %v1897_v13, %v1897_v13 }
 0x1d0   :  { %v1742_v21 = vpop.f32.mrf.mxu3  ;;  %v1347_v63 = vpop.f32.mrf.mxu1 }
 0x1d1   :  { %2467 = vst [vmem:[%s3310_s4 + $0x28] sm:$0xff] %v2444_v59   ;;  %v1982_v37 = vadd.f32 %v1981_v49, %v1967_v39  ;;  %v1764_v56 = vadd.f32 %v1742_v21, %v1606_v31  ;;  %v1586_v7 = vpop.f32.mrf.mxu2  ;;  %v1366_v35 = vadd.f32 %v1347_v63, %v3256_v27 }
 0x1d2   :  { %v1607_v33 = vadd.f32 %v1586_v7, %v1365_v30 }
 0x1d4   :  { %v1876_v23 = vpop.f32.mrf.mxu0 }
 0x1d5   :  { %v1898_v41 = vadd.f32 %v1876_v23, %v1764_v56 }
 0x1d7   :  { %v1945_v57 = vadd.f32 %v1944_v40, %v1898_v41  ;;  %v1968_v53 = vmul.f32 %v1898_v41, %v1898_v41 }
 0x1d8   :  { %v1744_v34 = vpop.f32.mrf.mxu3  ;;  %v1349_v24 = vpop.f32.mrf.mxu1 }
 0x1d9   :  { %v1983_v9 = vadd.f32 %v1982_v37, %v1968_v53  ;;  %v1765_v29 = vadd.f32 %v1744_v34, %v1607_v33  ;;  %v1589_v54 = vpop.f32.mrf.mxu2  ;;  %v1367_v46 = vadd.f32 %v1349_v24, %v3258_v42 }
 0x1da   :  { %v1608_v47 = vadd.f32 %v1589_v54, %v1366_v35 }
 0x1dc   :  { %v1878_v12 = vpop.f32.mrf.mxu0 }
 0x1dd   :  { %v1899_v6 = vadd.f32 %v1878_v12, %v1765_v29 }
 0x1df   :  { %v2449_v8 = vpack.c.bf16 %v1899_v6, %v1898_v41  ;;  %v1946_v26 = vadd.f32 %v1945_v57, %v1899_v6  ;;  %v1969_v11 = vmul.f32 %v1899_v6, %v1899_v6 }
 0x1e0   :  { %v1747_v1 = vpop.f32.mrf.mxu3 }
 0x1e1   :  { %2468 = vst [vmem:[%s3310_s4 + $0x30] sm:$0xff] %v2449_v8   ;;  %v1984_v17 = vadd.f32 %v1983_v9, %v1969_v11  ;;  %v1766_v58 = vadd.f32 %v1747_v1, %v1608_v47  ;;  %v1591_v38 = vpop.f32.mrf.mxu2 }
 0x1e2   :  { %v1609_v27 = vadd.f32 %v1591_v38, %v1367_v46 }
 0x1e4   :  { %v1881_v48 = vpop.f32.mrf.mxu0 }
 0x1e5   :  { %v1900_v45 = vadd.f32 %v1881_v48, %v1766_v58 }
 0x1e7   :  { %v1947_v22 = vadd.f32 %v1946_v26, %v1900_v45  ;;  %v1970_v4 = vmul.f32 %v1900_v45, %v1900_v45 }
 0x1e8   :  { %v1749_v16 = vpop.f32.mrf.mxu3 }
 0x1e9   :  { %v1985_v62 = vadd.f32 %v1984_v17, %v1970_v4  ;;  %v1767_v32 = vadd.f32 %v1749_v16, %v1609_v27 }
 0x1ec   :  { %v1883_v15 = vpop.f32.mrf.mxu0 }
 0x1ed   :  { %v1901_v43 = vadd.f32 %v1883_v15, %v1767_v32 }
 0x1ef   :  { %v2454_v2 = vpack.c.bf16 %v1901_v43, %v1900_v45  ;;  %v1948_v20 = vadd.f32 %v1947_v22, %v1901_v43  ;;  %v1971_v60 = vmul.f32 %v1901_v43, %v1901_v43 }
 0x1f1   :  { %2469 = vst [vmem:[%s3310_s4 + $0x38] sm:$0xff] %v2454_v2   ;;  %v1949_v19 = vrot.slane %v1948_v20, 4  ;;  %v1986_v0 = vadd.f32 %v1985_v62, %v1971_v60 }
 0x1f3   :  { %v1950_v42 = vadd.f32 %v1949_v19, %v1948_v20  ;;  %v1987_v44 = vrot.slane %v1986_v0, 4 }
 0x1f5   :  { %v1951_v5 = vrot.slane %v1950_v42, 2  ;;  %v1988_v61 = vadd.f32 %v1987_v44, %v1986_v0 }
 0x1f7   :  { %v1952_v25 = vadd.f32 %v1951_v5, %v1950_v42  ;;  %v1989_v52 = vrot.slane %v1988_v61, 2 }
 0x1f9   :  { %v1953_v10 = vrot.slane %v1952_v25, 1  ;;  %v1990_v14 = vadd.f32 %v1989_v52, %v1988_v61 }
 0x1fb   :  { %v1954_v28 = vadd.f32 %v1953_v10, %v1952_v25  ;;  %v1991_v55 = vrot.slane %v1990_v14, 1 }
 0x1fd   :  { %1955 = vst [vmem:[%s3311_s5] sm:$0x1] %v1954_v28  ;;  %v1992_v49 = vadd.f32 %v1991_v55, %v1990_v14 }
 0x1ff   :  { %1993 = vst [vmem:[%s3312_s6] sm:$0x1] %v1992_v49 }
 0x200   :  { %2006 = vsyncpa [#allocation3], 1 }

</bundles_post_ra>
